<compile_context>
chip_gen: v7x
topology: tpu7x:2x2x1
jax: 0.10.0
libtpu: 0.0.40
codegen_flags: <defaults>
</compile_context>

<pallas_src>
import functools
from collections import namedtuple

import jax
import jax.numpy as jnp
import numpy as np
from jax.experimental import pallas as pl
from jax.experimental.pallas import tpu as pltpu

LossTuple = namedtuple(
    "LossTuple",
    ["rpn_loc_loss", "rpn_cls_loss", "roi_loc_loss", "roi_cls_loss", "total_loss"],
)

RPN_SIGMA = 3.0  # opt.rpn_sigma default
ROI_SIGMA = 1.0  # opt.roi_sigma default


# ----------------------------------------------------------------------------
# Fused Pallas kernel: all four losses + total in one invocation.
# ----------------------------------------------------------------------------
def _smooth_l1(diff, sigma2):
    """Elementwise smooth-L1 (single vselect instead of flag*a + (1-flag)*b)."""
    abs_diff = jnp.abs(diff)
    return jnp.where(abs_diff < (1.0 / sigma2),
                     (0.5 * sigma2) * diff * diff,
                     abs_diff - 0.5 / sigma2)


def _fused_loss_kernel(rpn_pred_ref, rpn_cls_ref, rpn_gt_ref, rpn_lab_ref,
                       roi_pred_ref, roi_cls_ref, roi_gt_ref, roi_lab_ref,
                       o_ref, *, rpn_sigma, roi_sigma):
    f32 = jnp.float32

    # ------------------- RPN losses (native [A,4] / [A,2] layout) -----------
    rpn_lab = rpn_lab_ref[...]                         # [A, 1] i32
    rpn_pos = (rpn_lab > 0).astype(f32)                # [A, 1]
    rpn_valid = (rpn_lab >= 0).astype(f32)             # [A, 1]
    n_rpn_valid = jnp.sum(rpn_valid)                   # reused by both RPN losses

    # _fast_rcnn_loc_loss: masked smooth-L1, normalized by #(label >= 0)
    # (unguarded divide, matching the PyTorch reference semantics).
    sigma2 = rpn_sigma * rpn_sigma
    diff = rpn_pos * (rpn_pred_ref[0] - rpn_gt_ref[...])        # [A, 4]
    rpn_loc_sum = jnp.sum(_smooth_l1(diff, sigma2))

    # F.cross_entropy(rpn_cls[0], gt_rpn_label, ignore_index=-1), 2 classes.
    # Softplus form: lse(l0,l1) - picked == log(1 + exp(other - picked)).
    cls = rpn_cls_ref[0]                               # [A, 2]
    l0 = cls[:, 0:1]                                   # [A, 1]
    l1 = cls[:, 1:2]                                   # [A, 1]
    z = jnp.where(rpn_lab == 1, l0 - l1, l1 - l0)      # other - picked
    softplus = jnp.maximum(z, 0.0) + jnp.log(1.0 + jnp.exp(-jnp.abs(z)))
    rpn_cls_sum = jnp.sum(rpn_valid * softplus)

    inv_rpn_loc = 1.0 / n_rpn_valid                    # matches unguarded ref
    inv_rpn_cls = 1.0 / jnp.maximum(n_rpn_valid, 1.0)
    rpn_loc_loss = rpn_loc_sum * inv_rpn_loc
    rpn_cls_loss = rpn_cls_sum * inv_rpn_cls

    # ------------------- ROI losses (native [S,C*4] / [S,C] layout) ---------
    roi_lab = roi_lab_ref[...]                         # [S, 1] i32
    roi_pos = roi_lab > 0                              # [S, 1] bool
    roi_valid = (roi_lab >= 0).astype(f32)             # [S, 1]
    n_roi_valid = jnp.sum(roi_valid)

    # Class gather + gt expansion folded into the kernel: column j of roi_pred
    # corresponds to (class = j >> 2, delta = j & 3).  Keep only the columns of
    # the GT class with label > 0; expand the [S,4] gt across deltas with
    # selects instead of a wrapper-side 21x jnp.tile.
    pred = roi_pred_ref[...]                           # [S, C*4]
    gt = roi_gt_ref[...]                               # [S, 4]
    col = jax.lax.broadcasted_iota(jnp.int32, pred.shape, 1)
    delta = col & 3
    w = jnp.logical_and((col >> 2) == roi_lab, roi_pos).astype(f32)
    gt_exp = jnp.where(delta == 0, gt[:, 0:1],
             jnp.where(delta == 1, gt[:, 1:2],
             jnp.where(delta == 2, gt[:, 2:3], gt[:, 3:4])))
    sigma2r = roi_sigma * roi_sigma
    diff_r = w * (pred - gt_exp)
    roi_loc_loss = jnp.sum(_smooth_l1(diff_r, sigma2r)) / n_roi_valid

    # F.cross_entropy(roi_cls, gt_roi_label) — mean over samples (no ignore).
    logits = roi_cls_ref[...]                          # [S, C]
    m = jnp.max(logits, axis=1, keepdims=True)                          # [S, 1]
    lse = m + jnp.log(jnp.sum(jnp.exp(logits - m), axis=1, keepdims=True))
    ccol = jax.lax.broadcasted_iota(jnp.int32, logits.shape, 1)
    picked = jnp.sum(jnp.where(ccol == roi_lab, logits, 0.0),
                     axis=1, keepdims=True)                             # [S, 1]
    roi_cls_loss = jnp.sum(lse - picked) * (1.0 / f32(logits.shape[0]))

    # ------------------- outputs -------------------
    total = rpn_loc_loss + rpn_cls_loss + roi_loc_loss + roi_cls_loss
    zero = jnp.zeros((), f32)
    o_ref[0] = rpn_loc_loss
    o_ref[1] = rpn_cls_loss
    o_ref[2] = roi_loc_loss
    o_ref[3] = roi_cls_loss
    o_ref[4] = total
    o_ref[5] = zero
    o_ref[6] = zero
    o_ref[7] = zero


# ----------------------------------------------------------------------------
# Forward wrapper: NO layout ops beyond free label reshapes + one pallas_call.
# ----------------------------------------------------------------------------
@jax.jit
def fasterrcnn_train_forward(imgs, rpn_loc, rpn_cls, gt_rpn_loc, gt_rpn_label,
                             roi_cls, roi_loc, gt_roi_loc, gt_roi_label):
    _, _, H, W = imgs.shape
    _img_size = (H, W)  # used only by the (external) RPN / target generators

    n_anchor = rpn_loc.shape[1]
    n_sample, n_class = roi_cls.shape

    # Native layouts straight from the model; label reshapes are bitcasts.
    rpn_lab = gt_rpn_label.astype(jnp.int32).reshape(n_anchor, 1)
    roi_lab = gt_roi_label.astype(jnp.int32).reshape(n_sample, 1)

    inputs = (rpn_loc, rpn_cls, gt_rpn_loc, rpn_lab,
              roi_loc, roi_cls, gt_roi_loc, roi_lab)

    # Advisory cost estimate: tiny kernel, let XLA overlap it freely.
    bytes_accessed = sum(int(np.prod(x.shape)) * 4 for x in inputs) + 8 * 4
    flops = (30 * 4 * n_anchor + 16 * n_anchor
             + 12 * 4 * n_class * n_sample + 8 * n_class * n_sample)
    transcendentals = 2 * n_anchor + (n_class + 1) * n_sample

    out = pl.pallas_call(
        functools.partial(_fused_loss_kernel,
                          rpn_sigma=RPN_SIGMA, roi_sigma=ROI_SIGMA),
        out_shape=jax.ShapeDtypeStruct((8,), jnp.float32),
        in_specs=[pl.BlockSpec(memory_space=pltpu.MemorySpace.VMEM)] * len(inputs),
        out_specs=pl.BlockSpec(memory_space=pltpu.MemorySpace.SMEM),
        cost_estimate=pl.CostEstimate(flops=flops,
                                      transcendentals=transcendentals,
                                      bytes_accessed=bytes_accessed),
    )(*inputs)

    return LossTuple(out[0], out[1], out[2], out[3], out[4])


# ----------------------------------------------------------------------------
# Pure-JAX reference (for correctness check)
# ----------------------------------------------------------------------------
def _ref_smooth_l1(pred, gt, label, sigma):
    sigma2 = sigma ** 2
    in_w = (label > 0).astype(jnp.float32)[:, None]
    diff = in_w * (pred - gt)
    ad = jnp.abs(diff)
    flag = (ad < 1.0 / sigma2).astype(jnp.float32)
    y = flag * (sigma2 / 2.0) * diff ** 2 + (1.0 - flag) * (ad - 0.5 / sigma2)
    return jnp.sum(y) / jnp.sum((label >= 0).astype(jnp.float32))


def _ref_ce(logits, label):
    lse = jax.scipy.special.logsumexp(logits, axis=-1)
    picked = jnp.take_along_axis(logits, jnp.maximum(label, 0)[:, None], axis=1)[:, 0]
    v = (label >= 0).astype(jnp.float32)
    return jnp.sum(v * (lse - picked)) / jnp.maximum(jnp.sum(v), 1.0)


# ----------------------------------------------------------------------------
if __name__ == "__main__":
    key = jax.random.PRNGKey(0)
    ks = jax.random.split(key, 9)

    # Small, forward-consistent shapes.
    B, C, H, W = 1, 3, 16, 16       # imgs (NCHW); forward indexes batch 0
    n_anchor = 256                  # anchors produced by the (external) RPN
    n_sample = 128                  # ROIs sampled by the proposal-target creator
    n_class = 21                    # 20 fg classes + background

    imgs = jax.random.normal(ks[0], (B, C, H, W), jnp.float32)
    rpn_loc = 0.5 * jax.random.normal(ks[1], (B, n_anchor, 4), jnp.float32)
    rpn_cls = jax.random.normal(ks[2], (B, n_anchor, 2), jnp.float32)
    gt_rpn_loc = 0.5 * jax.random.normal(ks[3], (n_anchor, 4), jnp.float32)
    gt_rpn_label = jax.random.randint(ks[4], (n_anchor,), -1, 2, jnp.int32)  # {-1,0,1}
    roi_cls = jax.random.normal(ks[5], (n_sample, n_class), jnp.float32)
    roi_loc = 0.5 * jax.random.normal(ks[6], (n_sample, n_class * 4), jnp.float32)
    gt_roi_loc = 0.5 * jax.random.normal(ks[7], (n_sample, 4), jnp.float32)
    gt_roi_label = jax.random.randint(ks[8], (n_sample,), 0, n_class, jnp.int32)

    losses = fasterrcnn_train_forward(
        imgs, rpn_loc, rpn_cls, gt_rpn_loc, gt_rpn_label,
        roi_cls, roi_loc, gt_roi_loc, gt_roi_label,
    )
    jax.block_until_ready(losses)

    # Reference check.
    roi_loc_sel = jnp.take_along_axis(
        roi_loc.reshape(n_sample, n_class, 4),
        gt_roi_label[:, None, None], axis=1)[:, 0, :]
    ref = LossTuple(
        _ref_smooth_l1(rpn_loc[0], gt_rpn_loc, gt_rpn_label, RPN_SIGMA),
        _ref_ce(rpn_cls[0], gt_rpn_label),
        _ref_smooth_l1(roi_loc_sel, gt_roi_loc, gt_roi_label, ROI_SIGMA),
        _ref_ce(roi_cls, gt_roi_label),
        0.0,
    )
    ref = ref._replace(total_loss=ref[0] + ref[1] + ref[2] + ref[3])

    for name, got, want in zip(LossTuple._fields, losses, ref):
        np.testing.assert_allclose(np.asarray(got), np.asarray(want),
                                   rtol=1e-3, atol=1e-4, err_msg=name)

    # TODO(synk): extractor / RPN / ROI-head / anchor- & proposal-target creators,
    # NMS, optimizer, Visualizer and ConfusionMeters are external undefined
    # dependencies of the module and are represented here by synthetic inputs.
    print("KERNEL_OK")
</pallas_src>

<mosaic_0001>
module attributes {stable_mosaic.version = 11 : i64} {
  func.func @_fused_loss_kernel(%arg0: memref<1x256x4xf32, #tpu.memory_space<vmem>>, %arg1: memref<1x256x2xf32, #tpu.memory_space<vmem>>, %arg2: memref<256x4xf32, #tpu.memory_space<vmem>>, %arg3: memref<256x1xi32, #tpu.memory_space<vmem>>, %arg4: memref<128x84xf32, #tpu.memory_space<vmem>>, %arg5: memref<128x21xf32, #tpu.memory_space<vmem>>, %arg6: memref<128x4xf32, #tpu.memory_space<vmem>>, %arg7: memref<128x1xi32, #tpu.memory_space<vmem>>, %arg8: memref<8xf32, #tpu.memory_space<smem>>) attributes {dimension_semantics = [], scalar_prefetch = 0 : i64, scratch_operands = 0 : i64, tpu.core_type = #tpu.core_type<tc>} {
    %c0 = arith.constant 0 : index
    %c0_0 = arith.constant 0 : index
    %0 = vector.load %arg3[%c0, %c0_0] : memref<256x1xi32, #tpu.memory_space<vmem>>, vector<256x1xi32>
    %c0_i32 = arith.constant 0 : i32
    %1 = vector.broadcast %c0_i32 : i32 to vector<256x1xi32>
    %2 = arith.cmpi sgt, %0, %1 : vector<256x1xi32>
    %3 = arith.extui %2 : vector<256x1xi1> to vector<256x1xi32>
    %4 = arith.sitofp %3 : vector<256x1xi32> to vector<256x1xf32>
    %c0_i32_1 = arith.constant 0 : i32
    %5 = vector.broadcast %c0_i32_1 : i32 to vector<256x1xi32>
    %6 = arith.cmpi sge, %0, %5 : vector<256x1xi32>
    %7 = arith.extui %6 : vector<256x1xi1> to vector<256x1xi32>
    %8 = arith.sitofp %7 : vector<256x1xi32> to vector<256x1xf32>
    %9 = vector.shape_cast %8 : vector<256x1xf32> to vector<1x256x1xf32>
    %cst = arith.constant dense<0.000000e+00> : vector<1xf32>
    %10 = vector.multi_reduction <add>, %9, %cst [1, 2] : vector<1x256x1xf32> to vector<1xf32>
    %11 = vector.shape_cast %10 : vector<1xf32> to vector<1x1x1xf32>
    %12 = vector.extract %11[0, 0, 0] : f32 from vector<1x1x1xf32>
    %c0_2 = arith.constant 0 : index
    %c0_3 = arith.constant 0 : index
    %c0_4 = arith.constant 0 : index
    %13 = vector.load %arg0[%c0_2, %c0_3, %c0_4] : memref<1x256x4xf32, #tpu.memory_space<vmem>>, vector<1x256x4xf32>
    %14 = vector.shape_cast %13 : vector<1x256x4xf32> to vector<256x4xf32>
    %c0_5 = arith.constant 0 : index
    %c0_6 = arith.constant 0 : index
    %15 = vector.load %arg2[%c0_5, %c0_6] : memref<256x4xf32, #tpu.memory_space<vmem>>, vector<256x4xf32>
    %16 = arith.subf %14, %15 : vector<256x4xf32>
    %17 = vector.broadcast %4 : vector<256x1xf32> to vector<256x4xf32>
    %18 = arith.mulf %17, %16 : vector<256x4xf32>
    %19 = math.absf %18 : vector<256x4xf32>
    %cst_7 = arith.constant 0.111111112 : f32
    %20 = vector.broadcast %cst_7 : f32 to vector<256x4xf32>
    %21 = arith.cmpf olt, %19, %20 : vector<256x4xf32>
    %cst_8 = arith.constant 4.500000e+00 : f32
    %22 = vector.broadcast %cst_8 : f32 to vector<256x4xf32>
    %23 = arith.mulf %22, %18 : vector<256x4xf32>
    %24 = arith.mulf %23, %18 : vector<256x4xf32>
    %cst_9 = arith.constant 0.055555556 : f32
    %25 = vector.broadcast %cst_9 : f32 to vector<256x4xf32>
    %26 = arith.subf %19, %25 : vector<256x4xf32>
    %27 = arith.select %21, %24, %26 : vector<256x4xi1>, vector<256x4xf32>
    %28 = vector.shape_cast %27 : vector<256x4xf32> to vector<1x256x4xf32>
    %cst_10 = arith.constant dense<0.000000e+00> : vector<1xf32>
    %29 = vector.multi_reduction <add>, %28, %cst_10 [1, 2] : vector<1x256x4xf32> to vector<1xf32>
    %30 = vector.shape_cast %29 : vector<1xf32> to vector<1x1x1xf32>
    %31 = vector.extract %30[0, 0, 0] : f32 from vector<1x1x1xf32>
    %c0_11 = arith.constant 0 : index
    %c0_12 = arith.constant 0 : index
    %c0_13 = arith.constant 0 : index
    %32 = vector.load %arg1[%c0_11, %c0_12, %c0_13] : memref<1x256x2xf32, #tpu.memory_space<vmem>>, vector<1x256x2xf32>
    %33 = vector.shape_cast %32 : vector<1x256x2xf32> to vector<256x2xf32>
    %34 = vector.extract_strided_slice %33 {offsets = [0, 0], sizes = [256, 1], strides = [1, 1]} : vector<256x2xf32> to vector<256x1xf32>
    %35 = vector.extract_strided_slice %33 {offsets = [0, 1], sizes = [256, 1], strides = [1, 1]} : vector<256x2xf32> to vector<256x1xf32>
    %c1_i32 = arith.constant 1 : i32
    %36 = vector.broadcast %c1_i32 : i32 to vector<256x1xi32>
    %37 = arith.cmpi eq, %0, %36 : vector<256x1xi32>
    %38 = arith.subf %34, %35 : vector<256x1xf32>
    %39 = arith.subf %35, %34 : vector<256x1xf32>
    %40 = arith.select %37, %38, %39 : vector<256x1xi1>, vector<256x1xf32>
    %cst_14 = arith.constant 0.000000e+00 : f32
    %41 = vector.broadcast %cst_14 : f32 to vector<256x1xf32>
    %42 = arith.maximumf %40, %41 : vector<256x1xf32>
    %43 = math.absf %40 : vector<256x1xf32>
    %cst_15 = arith.constant 0.000000e+00 : f32
    %44 = vector.broadcast %cst_15 : f32 to vector<256x1xf32>
    %45 = arith.subf %44, %43 : vector<256x1xf32>
    %46 = math.exp %45 : vector<256x1xf32>
    %cst_16 = arith.constant 1.000000e+00 : f32
    %47 = vector.broadcast %cst_16 : f32 to vector<256x1xf32>
    %48 = arith.addf %47, %46 : vector<256x1xf32>
    %49 = math.log %48 : vector<256x1xf32>
    %50 = arith.addf %42, %49 : vector<256x1xf32>
    %51 = arith.mulf %8, %50 : vector<256x1xf32>
    %52 = vector.shape_cast %51 : vector<256x1xf32> to vector<1x256x1xf32>
    %cst_17 = arith.constant dense<0.000000e+00> : vector<1xf32>
    %53 = vector.multi_reduction <add>, %52, %cst_17 [1, 2] : vector<1x256x1xf32> to vector<1xf32>
    %54 = vector.shape_cast %53 : vector<1xf32> to vector<1x1x1xf32>
    %55 = vector.extract %54[0, 0, 0] : f32 from vector<1x1x1xf32>
    %cst_18 = arith.constant 1.000000e+00 : f32
    %56 = arith.divf %cst_18, %12 : f32
    %cst_19 = arith.constant 1.000000e+00 : f32
    %57 = arith.maximumf %12, %cst_19 : f32
    %cst_20 = arith.constant 1.000000e+00 : f32
    %58 = arith.divf %cst_20, %57 : f32
    %59 = arith.mulf %31, %56 : f32
    %60 = arith.mulf %55, %58 : f32
    %c0_21 = arith.constant 0 : index
    %c0_22 = arith.constant 0 : index
    %61 = vector.load %arg7[%c0_21, %c0_22] : memref<128x1xi32, #tpu.memory_space<vmem>>, vector<128x1xi32>
    %c0_i32_23 = arith.constant 0 : i32
    %62 = vector.broadcast %c0_i32_23 : i32 to vector<128x1xi32>
    %63 = arith.cmpi sgt, %61, %62 : vector<128x1xi32>
    %c0_i32_24 = arith.constant 0 : i32
    %64 = vector.broadcast %c0_i32_24 : i32 to vector<128x1xi32>
    %65 = arith.cmpi sge, %61, %64 : vector<128x1xi32>
    %66 = arith.extui %65 : vector<128x1xi1> to vector<128x1xi32>
    %67 = arith.sitofp %66 : vector<128x1xi32> to vector<128x1xf32>
    %68 = vector.shape_cast %67 : vector<128x1xf32> to vector<1x128x1xf32>
    %cst_25 = arith.constant dense<0.000000e+00> : vector<1xf32>
    %69 = vector.multi_reduction <add>, %68, %cst_25 [1, 2] : vector<1x128x1xf32> to vector<1xf32>
    %70 = vector.shape_cast %69 : vector<1xf32> to vector<1x1x1xf32>
    %71 = vector.extract %70[0, 0, 0] : f32 from vector<1x1x1xf32>
    %c0_26 = arith.constant 0 : index
    %c0_27 = arith.constant 0 : index
    %72 = vector.load %arg4[%c0_26, %c0_27] : memref<128x84xf32, #tpu.memory_space<vmem>>, vector<128x84xf32>
    %c0_28 = arith.constant 0 : index
    %c0_29 = arith.constant 0 : index
    %73 = vector.load %arg6[%c0_28, %c0_29] : memref<128x4xf32, #tpu.memory_space<vmem>>, vector<128x4xf32>
    %74 = tpu.iota {dimensions = array<i32: 1>} : vector<128x84xi32>
    %c3_i32 = arith.constant 3 : i32
    %75 = vector.broadcast %c3_i32 : i32 to vector<128x84xi32>
    %76 = arith.andi %74, %75 : vector<128x84xi32>
    %c2_i32 = arith.constant 2 : i32
    %77 = vector.broadcast %c2_i32 : i32 to vector<128x84xi32>
    %78 = arith.shrsi %74, %77 : vector<128x84xi32>
    %79 = vector.broadcast %61 : vector<128x1xi32> to vector<128x84xi32>
    %80 = arith.cmpi eq, %78, %79 : vector<128x84xi32>
    %81 = vector.broadcast %63 : vector<128x1xi1> to vector<128x84xi1>
    %82 = arith.andi %80, %81 : vector<128x84xi1>
    %83 = arith.extui %82 : vector<128x84xi1> to vector<128x84xi32>
    %84 = arith.sitofp %83 : vector<128x84xi32> to vector<128x84xf32>
    %c0_i32_30 = arith.constant 0 : i32
    %85 = vector.broadcast %c0_i32_30 : i32 to vector<128x84xi32>
    %86 = arith.cmpi eq, %76, %85 : vector<128x84xi32>
    %87 = vector.extract_strided_slice %73 {offsets = [0, 0], sizes = [128, 1], strides = [1, 1]} : vector<128x4xf32> to vector<128x1xf32>
    %c1_i32_31 = arith.constant 1 : i32
    %88 = vector.broadcast %c1_i32_31 : i32 to vector<128x84xi32>
    %89 = arith.cmpi eq, %76, %88 : vector<128x84xi32>
    %90 = vector.extract_strided_slice %73 {offsets = [0, 1], sizes = [128, 1], strides = [1, 1]} : vector<128x4xf32> to vector<128x1xf32>
    %c2_i32_32 = arith.constant 2 : i32
    %91 = vector.broadcast %c2_i32_32 : i32 to vector<128x84xi32>
    %92 = arith.cmpi eq, %76, %91 : vector<128x84xi32>
    %93 = vector.extract_strided_slice %73 {offsets = [0, 2], sizes = [128, 1], strides = [1, 1]} : vector<128x4xf32> to vector<128x1xf32>
    %94 = vector.extract_strided_slice %73 {offsets = [0, 3], sizes = [128, 1], strides = [1, 1]} : vector<128x4xf32> to vector<128x1xf32>
    %95 = vector.shape_cast %93 : vector<128x1xf32> to vector<128x1xf32>
    %96 = vector.broadcast %95 : vector<128x1xf32> to vector<128x84xf32>
    %97 = vector.shape_cast %94 : vector<128x1xf32> to vector<128x1xf32>
    %98 = vector.broadcast %97 : vector<128x1xf32> to vector<128x84xf32>
    %99 = arith.select %92, %96, %98 : vector<128x84xi1>, vector<128x84xf32>
    %100 = vector.shape_cast %90 : vector<128x1xf32> to vector<128x1xf32>
    %101 = vector.broadcast %100 : vector<128x1xf32> to vector<128x84xf32>
    %102 = arith.select %89, %101, %99 : vector<128x84xi1>, vector<128x84xf32>
    %103 = vector.shape_cast %87 : vector<128x1xf32> to vector<128x1xf32>
    %104 = vector.broadcast %103 : vector<128x1xf32> to vector<128x84xf32>
    %105 = arith.select %86, %104, %102 : vector<128x84xi1>, vector<128x84xf32>
    %106 = arith.subf %72, %105 : vector<128x84xf32>
    %107 = arith.mulf %84, %106 : vector<128x84xf32>
    %108 = math.absf %107 : vector<128x84xf32>
    %cst_33 = arith.constant 1.000000e+00 : f32
    %109 = vector.broadcast %cst_33 : f32 to vector<128x84xf32>
    %110 = arith.cmpf olt, %108, %109 : vector<128x84xf32>
    %cst_34 = arith.constant 5.000000e-01 : f32
    %111 = vector.broadcast %cst_34 : f32 to vector<128x84xf32>
    %112 = arith.mulf %111, %107 : vector<128x84xf32>
    %113 = arith.mulf %112, %107 : vector<128x84xf32>
    %cst_35 = arith.constant 5.000000e-01 : f32
    %114 = vector.broadcast %cst_35 : f32 to vector<128x84xf32>
    %115 = arith.subf %108, %114 : vector<128x84xf32>
    %116 = arith.select %110, %113, %115 : vector<128x84xi1>, vector<128x84xf32>
    %117 = vector.shape_cast %116 : vector<128x84xf32> to vector<1x128x84xf32>
    %cst_36 = arith.constant dense<0.000000e+00> : vector<1xf32>
    %118 = vector.multi_reduction <add>, %117, %cst_36 [1, 2] : vector<1x128x84xf32> to vector<1xf32>
    %119 = vector.shape_cast %118 : vector<1xf32> to vector<1x1x1xf32>
    %120 = vector.extract %119[0, 0, 0] : f32 from vector<1x1x1xf32>
    %121 = arith.divf %120, %71 : f32
    %c0_37 = arith.constant 0 : index
    %c0_38 = arith.constant 0 : index
    %122 = vector.load %arg5[%c0_37, %c0_38] : memref<128x21xf32, #tpu.memory_space<vmem>>, vector<128x21xf32>
    %cst_39 = arith.constant dense<0xFF800000> : vector<128xf32>
    %123 = vector.multi_reduction <maximumf>, %122, %cst_39 [1] : vector<128x21xf32> to vector<128xf32>
    %124 = vector.shape_cast %123 : vector<128xf32> to vector<128x1xf32>
    %125 = vector.broadcast %124 : vector<128x1xf32> to vector<128x21xf32>
    %126 = arith.subf %122, %125 : vector<128x21xf32>
    %127 = math.exp %126 : vector<128x21xf32>
    %cst_40 = arith.constant dense<0.000000e+00> : vector<128xf32>
    %128 = vector.multi_reduction <add>, %127, %cst_40 [1] : vector<128x21xf32> to vector<128xf32>
    %129 = vector.shape_cast %128 : vector<128xf32> to vector<128x1xf32>
    %130 = math.log %129 : vector<128x1xf32>
    %131 = arith.addf %124, %130 : vector<128x1xf32>
    %132 = tpu.iota {dimensions = array<i32: 1>} : vector<128x21xi32>
    %133 = vector.broadcast %61 : vector<128x1xi32> to vector<128x21xi32>
    %134 = arith.cmpi eq, %132, %133 : vector<128x21xi32>
    %cst_41 = arith.constant 0.000000e+00 : f32
    %135 = vector.broadcast %cst_41 : f32 to vector<128x21xf32>
    %136 = arith.select %134, %122, %135 : vector<128x21xi1>, vector<128x21xf32>
    %cst_42 = arith.constant dense<0.000000e+00> : vector<128xf32>
    %137 = vector.multi_reduction <add>, %136, %cst_42 [1] : vector<128x21xf32> to vector<128xf32>
    %138 = vector.shape_cast %137 : vector<128xf32> to vector<128x1xf32>
    %139 = arith.subf %131, %138 : vector<128x1xf32>
    %140 = vector.shape_cast %139 : vector<128x1xf32> to vector<1x128x1xf32>
    %cst_43 = arith.constant dense<0.000000e+00> : vector<1xf32>
    %141 = vector.multi_reduction <add>, %140, %cst_43 [1, 2] : vector<1x128x1xf32> to vector<1xf32>
    %142 = vector.shape_cast %141 : vector<1xf32> to vector<1x1x1xf32>
    %143 = vector.extract %142[0, 0, 0] : f32 from vector<1x1x1xf32>
    %cst_44 = arith.constant 1.000000e+00 : f32
    %cst_45 = arith.constant 1.280000e+02 : f32
    %144 = arith.divf %cst_44, %cst_45 : f32
    %145 = arith.mulf %143, %144 : f32
    %146 = arith.addf %59, %60 : f32
    %147 = arith.addf %146, %121 : f32
    %148 = arith.addf %147, %145 : f32
    %c0_46 = arith.constant 0 : index
    %149 = memref.load %arg8[%c0_46] : memref<8xf32, #tpu.memory_space<smem>>
    memref.store %59, %arg8[%c0_46] : memref<8xf32, #tpu.memory_space<smem>>
    %c1 = arith.constant 1 : index
    %150 = memref.load %arg8[%c1] : memref<8xf32, #tpu.memory_space<smem>>
    memref.store %60, %arg8[%c1] : memref<8xf32, #tpu.memory_space<smem>>
    %c2 = arith.constant 2 : index
    %151 = memref.load %arg8[%c2] : memref<8xf32, #tpu.memory_space<smem>>
    memref.store %121, %arg8[%c2] : memref<8xf32, #tpu.memory_space<smem>>
    %c3 = arith.constant 3 : index
    %152 = memref.load %arg8[%c3] : memref<8xf32, #tpu.memory_space<smem>>
    memref.store %145, %arg8[%c3] : memref<8xf32, #tpu.memory_space<smem>>
    %c4 = arith.constant 4 : index
    %153 = memref.load %arg8[%c4] : memref<8xf32, #tpu.memory_space<smem>>
    memref.store %148, %arg8[%c4] : memref<8xf32, #tpu.memory_space<smem>>
    %cst_47 = arith.constant 0.000000e+00 : f32
    %c5 = arith.constant 5 : index
    %154 = memref.load %arg8[%c5] : memref<8xf32, #tpu.memory_space<smem>>
    memref.store %cst_47, %arg8[%c5] : memref<8xf32, #tpu.memory_space<smem>>
    %cst_48 = arith.constant 0.000000e+00 : f32
    %c6 = arith.constant 6 : index
    %155 = memref.load %arg8[%c6] : memref<8xf32, #tpu.memory_space<smem>>
    memref.store %cst_48, %arg8[%c6] : memref<8xf32, #tpu.memory_space<smem>>
    %cst_49 = arith.constant 0.000000e+00 : f32
    %c7 = arith.constant 7 : index
    %156 = memref.load %arg8[%c7] : memref<8xf32, #tpu.memory_space<smem>>
    memref.store %cst_49, %arg8[%c7] : memref<8xf32, #tpu.memory_space<smem>>
    return
  }
}

</mosaic_0001>

<bundles_post_ra>
// kernel: fasterrcnn_train_forward.1
= control target key start
LH: loop header
LB: loop body
LE: loop exit
PB: predicated region body
PF: predicated region fallthrough
CT: control target
= control target key end

     0   :  { %vm7233_vm0 = vcmask 7168   ;;  %v7115_v3 = vmov 0   ;;  %v7117_v5 = vmov 0.0   ;;  %s3587_s25 = smov 127   ;;  %s7106_s0 = inlined_call_operand.vmem [shape: f32[1,256,4], index: 0, kind: input, shape index: {}]   ;;  %s7107_s1 = inlined_call_operand.vmem [shape: f32[1,256,2], index: 1, kind: input, shape index: {}]   ;;  %s7108_s2 = inlined_call_operand.vmem [shape: f32[256,4], index: 2, kind: input, shape index: {}]   ;;  %s7109_s3 = inlined_call_operand.vmem [shape: s32[256,1], index: 3, kind: input, shape index: {}]   ;;  %s7110_s4 = inlined_call_operand.vmem [shape: f32[128,84], index: 4, kind: input, shape index: {}]   ;;  %s7111_s5 = inlined_call_operand.vmem [shape: f32[128,21], index: 5, kind: input, shape index: {}]   ;;  %s7112_s6 = inlined_call_operand.vmem [shape: f32[128,4], index: 6, kind: input, shape index: {}]   ;;  %s7113_s7 = inlined_call_operand.vmem [shape: s32[128,1], index: 7, kind: input, shape index: {}]   ;;  %s7114_s8 = inlined_call_operand.vmem [shape: f32[8], index: 8, kind: output, shape index: {}]  }
   0x1   :  { %v32_v0 = vld [vmem:[%s7109_s3 + $0x10] sm:$0xff]  ;;  %v33_v1 = vld [vmem:[%s7109_s3 + $0x18] sm:$0xff]  ;;  %v30_v2 = vld [vmem:[%s7109_s3] sm:$0xff]  ;;  %3195 = vset.pattern.permute.xlu1 %v7115_v3  ;;  %3189 = vset.pattern.permute.xlu0 %v7115_v3 }
   0x2   :  { %vm64_vm1 = vcmp.gt.s32.totalorder %v32_v0, 0  ;;  %vm65_vm2 = vcmp.gt.s32.totalorder %v33_v1, 0  ;;  %vm160_vm3 = vcmp.ge.s32.totalorder %v32_v0, 0  ;;  %vm161_vm4 = vcmp.ge.s32.totalorder %v33_v1, 0  ;;  %v31_v4 = vld [vmem:[%s7109_s3 + $0x8] sm:$0xff]  ;;  %v34_v10 = vld [vmem:[%s7109_s3 + $0x20] sm:$0xff] }
   0x3   :  { %v3019_v6 = vsel %vm64_vm1, 1.0, %v7117_v5  ;;  %v3020_v7 = vsel %vm65_vm2, 1.0, %v7117_v5  ;;  %v3657_v8 = vsel %vm160_vm3, 1.0, %v7117_v5  ;;  %v3660_v9 = vsel %vm161_vm4, 1.0, %v7117_v5  ;;  %v35_v14 = vld [vmem:[%s7109_s3 + $0x28] sm:$0xff]  ;;  %v3683_v19 = vld [vmem:[%s7109_s3 + $0xd0] sm:$0xff] }
   0x4   :  { %7237 = vst [vmem:[#allocation5_spill] sm:$0xff] %v3657_v8  ;;  %7238 = vst [vmem:[#allocation6_spill] sm:$0xff] %v3660_v9  ;;  %v258_v11 = vsel %vm7233_vm0, %v3657_v8, 0.0  ;;  %v260_v12 = vsel %vm7233_vm0, %v3660_v9, 0.0  ;;  %v3196_v13 = vpack.i.bf16 %v3020_v7, %v3019_v6  ;;  %vm62_vm5 = vcmp.gt.s32.totalorder %v30_v2, 0  ;;  %v3692_v23 = vld [vmem:[%s7109_s3 + $0xd8] sm:$0xff] }
   0x5   :  { %vm63_vm6 = vcmp.gt.s32.totalorder %v31_v4, 0  ;;  %v3017_v15 = vsel %vm62_vm5, 1.0, %v7117_v5  ;;  %vm158_vm7 = vcmp.ge.s32.totalorder %v30_v2, 0  ;;  %vm159_vm8 = vcmp.ge.s32.totalorder %v31_v4, 0  ;;  %v36_v31 = vld [vmem:[%s7109_s3 + $0x30] sm:$0xff]  ;;  %v37_v32 = vld [vmem:[%s7109_s3 + $0x38] sm:$0xff] }
   0x6   :  { %3197 = vperm.xlu1 %3195, %v3196_v13   ;;  %v3018_v16 = vsel %vm63_vm6, 1.0, %v7117_v5  ;;  %v3675_v17 = vsel %vm158_vm7, 1.0, %v7117_v5  ;;  %v3678_v18 = vsel %vm159_vm8, 1.0, %v7117_v5  ;;  %vm66_vm9 = vcmp.gt.s32.totalorder %v34_v10, 0  ;;  %v3719_v39 = vld [vmem:[%s7109_s3 + $0xf0] sm:$0xff]  ;;  %v3724_v40 = vld [vmem:[%s7109_s3 + $0xf8] sm:$0xff] }
   0x7   :  { %7239 = vst [vmem:[#allocation7_spill] sm:$0xff] %v3675_v17  ;;  %7240 = vst [vmem:[#allocation8_spill] sm:$0xff] %v3678_v18  ;;  %v255_v20 = vsel %vm7233_vm0, %v3675_v17, 0.0  ;;  %v256_v21 = vsel %vm7233_vm0, %v3678_v18, 0.0  ;;  %v3190_v22 = vpack.i.bf16 %v3018_v16, %v3017_v15  ;;  %vm67_vm10 = vcmp.gt.s32.totalorder %v35_v14, 0  ;;  %v38_v45 = vld [vmem:[%s7109_s3 + $0x40] sm:$0xff] }
   0x8   :  { %v257_v24 = vadd.f32 %v256_v21, %v255_v20  ;;  %v3021_v25 = vsel %vm66_vm9, 1.0, %v7117_v5  ;;  %v3022_v26 = vsel %vm67_vm10, 1.0, %v7117_v5  ;;  %vm162_vm11 = vcmp.ge.s32.totalorder %v34_v10, 0  ;;  %v39_v46 = vld [vmem:[%s7109_s3 + $0x48] sm:$0xff]  ;;  %v40_v53 = vld [vmem:[%s7109_s3 + $0x50] sm:$0xff]  ;;  %v41_v55 = vld [vmem:[%s7109_s3 + $0x58] sm:$0xff] }
   0x9   :  { %3191 = vperm.xlu0 %3189, %v3190_v22   ;;  %vm163_vm12 = vcmp.ge.s32.totalorder %v35_v14, 0  ;;  %v3697_v27 = vsel %vm162_vm11, 1.0, %v7117_v5  ;;  %v3201_v28 = vpack.i.bf16 %v3022_v26, %v3021_v25  ;;  %vm88_vm13 = vcmp.gt.s32.totalorder %v3683_v19, 0  ;;  %v42_v1 = vld [vmem:[%s7109_s3 + $0x60] sm:$0xff]  ;;  %v43_v2 = vld [vmem:[%s7109_s3 + $0x68] sm:$0xff]  ;;  %v44_v14 = vld [vmem:[%s7109_s3 + $0x70] sm:$0xff] }
   0xa   :  { %7241 = vst [vmem:[#allocation9_spill] sm:$0xff] %v3697_v27  ;;  %v259_v29 = vadd.f32 %v258_v11, %v257_v24  ;;  %v3701_v30 = vsel %vm163_vm12, 1.0, %v7117_v5  ;;  %vm89_vm14 = vcmp.gt.s32.totalorder %v3692_v23, 0  ;;  %v262_v33 = vsel %vm7233_vm0, %v3697_v27, 0.0  ;;  %v3777_v10 = vld [vmem:[%s7107_s1] sm:$0xff]  ;;  %v45_v20 = vld [vmem:[%s7109_s3 + $0x78] sm:$0xff] }
   0xb   :  { %7242 = vst [vmem:[#allocation10_spill] sm:$0xff] %v3701_v30  ;;  %3202 = vperm.xlu1 %3195, %v3201_v28   ;;  %v3043_v34 = vsel %vm88_vm13, 1.0, %v7117_v5  ;;  %v3044_v35 = vsel %vm89_vm14, 1.0, %v7117_v5  ;;  %v264_v37 = vsel %vm7233_vm0, %v3701_v30, 0.0  ;;  %vm68_vm15 = vcmp.gt.s32.totalorder %v36_v31, 0  ;;  %v3802_v28 = vld [vmem:[%s7107_s1 + $0x8] sm:$0xff] }
   0xc   :  { %v261_v36 = vadd.f32 %v260_v12, %v259_v29  ;;  %v3256_v38 = vpack.i.bf16 %v3044_v35, %v3043_v34  ;;  %vm69_vm1 = vcmp.gt.s32.totalorder %v37_v32, 0  ;;  %vm164_vm2 = vcmp.ge.s32.totalorder %v36_v31, 0  ;;  %v47_v34 = vld [vmem:[%s7109_s3 + $0x88] sm:$0xff] }
   0xd   :  { %vm165_vm3 = vcmp.ge.s32.totalorder %v37_v32, 0  ;;  %v3023_v42 = vsel %vm68_vm15, 1.0, %v7117_v5  ;;  %v3024_v43 = vsel %vm69_vm1, 1.0, %v7117_v5  ;;  %v3729_v44 = vsel %vm164_vm2, 1.0, %v7117_v5 }
   0xe   :  { %v263_v41 = vadd.f32 %v262_v33, %v261_v36  ;;  %3257 = vperm.xlu0 %3189, %v3256_v38   ;;  %7243 = vst [vmem:[#allocation11_spill] sm:$0xff] %v3729_v44  ;;  %v3738_v47 = vsel %vm165_vm3, 1.0, %v7117_v5  ;;  %v266_v48 = vsel %vm7233_vm0, %v3729_v44, 0.0  ;;  %v3206_v49 = vpack.i.bf16 %v3024_v43, %v3023_v42  ;;  %v46_v33 = vld [vmem:[%s7109_s3 + $0x80] sm:$0xff]  ;;  %v48_v42 = vld [vmem:[%s7109_s3 + $0x90] sm:$0xff] }
   0xf   :  { %7244 = vst [vmem:[#allocation12_spill] sm:$0xff] %v3738_v47  ;;  %vm92_vm4 = vcmp.gt.s32.totalorder %v3719_v39, 0  ;;  %v268_v51 = vsel %vm7233_vm0, %v3738_v47, 0.0  ;;  %vm93_vm5 = vcmp.gt.s32.totalorder %v3724_v40, 0  ;;  %vm70_vm6 = vcmp.gt.s32.totalorder %v38_v45, 0 }
  0x10   :  { %v265_v50 = vadd.f32 %v264_v37, %v263_v41  ;;  %v3047_v52 = vsel %vm92_vm4, 1.0, %v7117_v5  ;;  %3207 = vperm.xlu1 %3195, %v3206_v49   ;;  %v3048_v54 = vsel %vm93_vm5, 1.0, %v7117_v5  ;;  %vm71_vm7 = vcmp.gt.s32.totalorder %v39_v46, 0 }
  0x11   :  { %vm166_vm8 = vcmp.ge.s32.totalorder %v38_v45, 0  ;;  %v3266_v57 = vpack.i.bf16 %v3048_v54, %v3047_v52  ;;  %v3025_v58 = vsel %vm70_vm6, 1.0, %v7117_v5  ;;  %v3026_v59 = vsel %vm71_vm7, 1.0, %v7117_v5  ;;  %v49_v52 = vld [vmem:[%s7109_s3 + $0x98] sm:$0xff] }
  0x12   :  { %v267_v56 = vadd.f32 %v266_v48, %v265_v50  ;;  %vm167_vm9 = vcmp.ge.s32.totalorder %v39_v46, 0  ;;  %v3757_v60 = vsel %vm166_vm8, 1.0, %v7117_v5  ;;  %v3211_v61 = vpack.i.bf16 %v3026_v59, %v3025_v58  ;;  %v3833_v46 = vld [vmem:[%s7107_s1 + $0x10] sm:$0xff] }
  0x13   :  { %7245 = vst [vmem:[#allocation13_spill] sm:$0xff] %v3757_v60  ;;  %vm72_vm10 = vcmp.gt.s32.totalorder %v40_v53, 0  ;;  %3267 = vperm.xlu0 %3189, %v3266_v57   ;;  %v3760_v63 = vsel %vm167_vm9, 1.0, %v7117_v5  ;;  %v270_v0 = vsel %vm7233_vm0, %v3757_v60, 0.0  ;;  %vm73_vm11 = vcmp.gt.s32.totalorder %v41_v55, 0 }
  0x14   :  { %v269_v62 = vadd.f32 %v268_v51, %v267_v56  ;;  %7246 = vst [vmem:[#allocation14_spill] sm:$0xff] %v3760_v63  ;;  %v272_v4 = vsel %vm7233_vm0, %v3760_v63, 0.0  ;;  %3212 = vperm.xlu1 %3195, %v3211_v61   ;;  %v3027_v6 = vsel %vm72_vm10, 1.0, %v7117_v5  ;;  %v3028_v7 = vsel %vm73_vm11, 1.0, %v7117_v5  ;;  %v50_v56 = vld [vmem:[%s7109_s3 + $0xa0] sm:$0xff] }
  0x15   :  { %vm168_vm12 = vcmp.ge.s32.totalorder %v40_v53, 0  ;;  %vm169_vm13 = vcmp.ge.s32.totalorder %v41_v55, 0  ;;  %v3216_v13 = vpack.i.bf16 %v3028_v7, %v3027_v6  ;;  %vm74_vm14 = vcmp.gt.s32.totalorder %v42_v1, 0 }
  0x16   :  { %v271_v11 = vadd.f32 %v270_v0, %v269_v62  ;;  %v3780_v12 = vsel %vm168_vm12, 1.0, %v7117_v5  ;;  %v3786_v15 = vsel %vm169_vm13, 1.0, %v7117_v5  ;;  %vm75_vm15 = vcmp.gt.s32.totalorder %v43_v2, 0 }
  0x17   :  { %7247 = vst [vmem:[#allocation15_spill] sm:$0xff] %v3780_v12  ;;  %7248 = vst [vmem:[#allocation16_spill] sm:$0xff] %v3786_v15  ;;  %v274_v16 = vsel %vm7233_vm0, %v3780_v12, 0.0  ;;  %v276_v22 = vsel %vm7233_vm0, %v3786_v15, 0.0  ;;  %v3029_v24 = vsel %vm74_vm14, 1.0, %v7117_v5  ;;  %v3030_v25 = vsel %vm75_vm15, 1.0, %v7117_v5  ;;  %976 = vrot.lane.b32.xlu0 %v3777_v10, %s3587_s25 }
  0x18   :  { %v273_v21 = vadd.f32 %v272_v4, %v271_v11  ;;  %3217 = vperm.xlu1 %3195, %v3216_v13   ;;  %vm170_vm1 = vcmp.ge.s32.totalorder %v42_v1, 0  ;;  %vm171_vm2 = vcmp.ge.s32.totalorder %v43_v2, 0  ;;  %v3221_v26 = vpack.i.bf16 %v3030_v25, %v3029_v24 }
  0x19   :  { %vm76_vm3 = vcmp.gt.s32.totalorder %v44_v14, 0  ;;  %v3805_v31 = vsel %vm170_vm1, 1.0, %v7117_v5  ;;  %v3808_v32 = vsel %vm171_vm2, 1.0, %v7117_v5  ;;  %vm77_vm4 = vcmp.gt.s32.totalorder %v45_v20, 0 }
  0x1a   :  { %v275_v29 = vadd.f32 %v274_v16, %v273_v21  ;;  %7249 = vst [vmem:[#allocation17_spill] sm:$0xff] %v3805_v31  ;;  %7250 = vst [vmem:[#allocation18_spill] sm:$0xff] %v3808_v32  ;;  %v278_v35 = vsel %vm7233_vm0, %v3805_v31, 0.0  ;;  %v3031_v36 = vsel %vm76_vm3, 1.0, %v7117_v5  ;;  %v3032_v37 = vsel %vm77_vm4, 1.0, %v7117_v5 }
  0x1b   :  { %v280_v41 = vsel %vm7233_vm0, %v3808_v32, 0.0  ;;  %vm172_vm5 = vcmp.ge.s32.totalorder %v44_v14, 0  ;;  %vm173_vm6 = vcmp.ge.s32.totalorder %v45_v20, 0  ;;  %978 = vrot.lane.b32.xlu0 %v3802_v28, %s3587_s25  ;;  %v3226_v45 = vpack.i.bf16 %v3032_v37, %v3031_v36 }
  0x1c   :  { %v277_v38 = vadd.f32 %v276_v22, %v275_v29  ;;  %3222 = vperm.xlu1 %3195, %v3221_v26   ;;  %v3828_v43 = vsel %vm172_vm5, 1.0, %v7117_v5  ;;  %vm78_vm7 = vcmp.gt.s32.totalorder %v46_v33, 0  ;;  %vm79_vm8 = vcmp.gt.s32.totalorder %v47_v34, 0 }
  0x1d   :  { %7251 = vst [vmem:[#allocation19_spill] sm:$0xff] %v3828_v43  ;;  %v3836_v49 = vsel %vm173_vm6, 1.0, %v7117_v5  ;;  %v282_v50 = vsel %vm7233_vm0, %v3828_v43, 0.0  ;;  %v3033_v51 = vsel %vm78_vm7, 1.0, %v7117_v5  ;;  %v3034_v53 = vsel %vm79_vm8, 1.0, %v7117_v5 }
  0x1e   :  { %v279_v48 = vadd.f32 %v278_v35, %v277_v38  ;;  %7252 = vst [vmem:[#allocation20_spill] sm:$0xff] %v3836_v49  ;;  %vm174_vm9 = vcmp.ge.s32.totalorder %v46_v33, 0  ;;  %vm175_vm10 = vcmp.ge.s32.totalorder %v47_v34, 0  ;;  %vm80_vm11 = vcmp.gt.s32.totalorder %v48_v42, 0 }
  0x1f   :  { %v3846_v55 = vsel %vm174_vm9, 1.0, %v7117_v5  ;;  %980 = vrot.lane.b32.xlu0 %v3833_v46, %s3587_s25 }
  0x20   :  { %v281_v54 = vadd.f32 %v280_v41, %v279_v48  ;;  %7253 = vst [vmem:[#allocation21_spill] sm:$0xff] %v3846_v55 }
  0x21   :  { %13 = vsyncpa [#allocation3], 0  ;;  %v284_v57 = vsel %vm7233_vm0, %v3836_v49, 0.0  ;;  %3227 = vperm.xlu1 %3195, %v3226_v45   ;;  %v3856_v58 = vsel %vm175_vm10, 1.0, %v7117_v5  ;;  %v3231_v59 = vpack.i.bf16 %v3034_v53, %v3033_v51  ;;  %vm81_vm12 = vcmp.gt.s32.totalorder %v49_v52, 0  ;;  %v51_v61 = vld [vmem:[%s7109_s3 + $0xa8] sm:$0xff] }
  0x22   :  { %7254 = vst [vmem:[#allocation22_spill] sm:$0xff] %v3856_v58  ;;  %v283_v62 = vadd.f32 %v282_v50, %v281_v54  ;;  %v3035_v0 = vsel %vm80_vm11, 1.0, %v7117_v5  ;;  %v3036_v1 = vsel %vm81_vm12, 1.0, %v7117_v5  ;;  %vm176_vm13 = vcmp.ge.s32.totalorder %v48_v42, 0  ;;  %v52_v7 = vld [vmem:[%s7109_s3 + $0xb0] sm:$0xff]  ;;  %v53_v11 = vld [vmem:[%s7109_s3 + $0xb8] sm:$0xff] }
  0x23   :  { %v286_v2 = vsel %vm7233_vm0, %v3846_v55, 0.0  ;;  %vm177_vm14 = vcmp.ge.s32.totalorder %v49_v52, 0  ;;  %vm82_vm15 = vcmp.gt.s32.totalorder %v50_v56, 0  ;;  %v3866_v6 = vsel %vm176_vm13, 1.0, %v7117_v5  ;;  %v54_v29 = vld [vmem:[%s7109_s3 + $0xc0] sm:$0xff]  ;;  %v55_v33 = vld [vmem:[%s7109_s3 + $0xc8] sm:$0xff] }
  0x24   :  { %v285_v4 = vadd.f32 %v284_v57, %v283_v62  ;;  %7255 = vst [vmem:[#allocation23_spill] sm:$0xff] %v3866_v6  ;;  %vm83_vm1 = vcmp.gt.s32.totalorder %v51_v61, 0  ;;  %v288_v13 = vsel %vm7233_vm0, %v3856_v58, 0.0  ;;  %v3236_v14 = vpack.i.bf16 %v3036_v1, %v3035_v0  ;;  %v58_v50 = vld [vmem:[%s7109_s3 + $0xe0] sm:$0xff]  ;;  %v59_v51 = vld [vmem:[%s7109_s3 + $0xe8] sm:$0xff]  ;;  %s3588_s16 = smov 1  }
  0x25   :  { %3232 = vperm.xlu1 %3195, %v3231_v59   ;;  %vm178_vm2 = vcmp.ge.s32.totalorder %v50_v56, 0  ;;  %v3877_v20 = vsel %vm177_vm14, 1.0, %v7117_v5  ;;  %v3037_v21 = vsel %vm82_vm15, 1.0, %v7117_v5  ;;  %v3038_v22 = vsel %vm83_vm1, 1.0, %v7117_v5  ;;  %v4147_v3 = vld [vmem:[%s7106_s0 + $0xd0] sm:$0xff]  ;;  %v4283_v32 = vld [vmem:[%s7108_s2 + $0x48] sm:$0xff] }
  0x26   :  { %v287_v16 = vadd.f32 %v286_v2, %v285_v4  ;;  %7256 = vst [vmem:[#allocation24_spill] sm:$0xff] %v3877_v20  ;;  %v290_v24 = vsel %vm7233_vm0, %v3866_v6, 0.0  ;;  %vm179_vm3 = vcmp.ge.s32.totalorder %v51_v61, 0  ;;  %vm84_vm4 = vcmp.gt.s32.totalorder %v52_v7, 0  ;;  %7270 = vst [vmem:[#allocation38_spill] sm:$0xff] %v4147_v3  ;;  %v4235_v6 = vld [vmem:[%s7107_s1 + $0xa8] sm:$0xff] }
  0x27   :  { %vm85_vm5 = vcmp.gt.s32.totalorder %v53_v11, 0  ;;  %v3884_v26 = vsel %vm178_vm2, 1.0, %v7117_v5  ;;  %v292_v34 = vsel %vm7233_vm0, %v3877_v20, 0.0  ;;  %v3241_v35 = vpack.i.bf16 %v3038_v22, %v3037_v21  ;;  %7282 = vst [vmem:[#allocation46_spill] sm:$0xff] %v4235_v6  ;;  %v4340_v47 = vld [vmem:[%s7106_s0 + $0x68] sm:$0xff]  ;;  %v4371_v12 = vld [vmem:[%s7106_s0 + $0x78] sm:$0xff] }
  0x28   :  { %v289_v25 = vadd.f32 %v288_v13, %v287_v16  ;;  %7257 = vst [vmem:[#allocation25_spill] sm:$0xff] %v3884_v26  ;;  %vm180_vm6 = vcmp.ge.s32.totalorder %v52_v7, 0  ;;  %v3895_v37 = vsel %vm179_vm3, 1.0, %v7117_v5  ;;  %v3039_v38 = vsel %vm84_vm4, 1.0, %v7117_v5  ;;  %v4345_v30 = vld [vmem:[%s7108_s2 + $0x68] sm:$0xff]  ;;  %v4376_v18 = vld [vmem:[%s7108_s2 + $0x78] sm:$0xff] }
  0x29   :  { %3237 = vperm.xlu1 %3195, %v3236_v14   ;;  %7258 = vst [vmem:[#allocation26_spill] sm:$0xff] %v3895_v37  ;;  %v3040_v41 = vsel %vm85_vm5, 1.0, %v7117_v5  ;;  %v294_v42 = vsel %vm7233_vm0, %v3884_v26, 0.0  ;;  %vm181_vm7 = vcmp.ge.s32.totalorder %v53_v11, 0  ;;  %vm86_vm8 = vcmp.gt.s32.totalorder %v54_v29, 0  ;;  %v4383_v27 = vld [vmem:[%s7106_s0 + $0x80] sm:$0xff] }
  0x2a   :  { %v291_v36 = vadd.f32 %v290_v24, %v289_v25  ;;  %vm87_vm9 = vcmp.gt.s32.totalorder %v55_v33, 0  ;;  %v3902_v48 = vsel %vm180_vm6, 1.0, %v7117_v5  ;;  %v296_v52 = vsel %vm7233_vm0, %v3895_v37, 0.0  ;;  %v4388_v8 = vld [vmem:[%s7106_s0 + $0x88] sm:$0xff] }
  0x2b   :  { %7259 = vst [vmem:[#allocation27_spill] sm:$0xff] %v3902_v48  ;;  %v3246_v53 = vpack.i.bf16 %v3040_v41, %v3039_v38  ;;  %vm182_vm10 = vcmp.ge.s32.totalorder %v54_v29, 0  ;;  %v3913_v56 = vsel %vm181_vm7, 1.0, %v7117_v5  ;;  %v3041_v57 = vsel %vm86_vm8, 1.0, %v7117_v5  ;;  %v3955_v38 = vld [vmem:[%s7107_s1 + $0x48] sm:$0xff] }
  0x2c   :  { %v293_v45 = vadd.f32 %v292_v34, %v291_v36  ;;  %7260 = vst [vmem:[#allocation28_spill] sm:$0xff] %v3913_v56  ;;  %v3042_v59 = vsel %vm87_vm9, 1.0, %v7117_v5  ;;  %v298_v61 = vsel %vm7233_vm0, %v3902_v48, 0.0  ;;  %vm183_vm11 = vcmp.ge.s32.totalorder %v55_v33, 0  ;;  %v4218_v48 = vld [vmem:[%s7108_s2 + $0xf0] sm:$0xff] }
  0x2d   :  { %3242 = vperm.xlu1 %3195, %v3241_v35   ;;  %vm90_vm12 = vcmp.gt.s32.totalorder %v58_v50, 0  ;;  %vm91_vm13 = vcmp.gt.s32.totalorder %v59_v51, 0  ;;  %v3920_v0 = vsel %vm182_vm10, 1.0, %v7117_v5  ;;  %vm184_vm14 = vcmp.ge.s32.totalorder %v3683_v19, 0  ;;  %7277 = vst [vmem:[#allocation45_spill] sm:$0xff] %v4218_v48  ;;  %v4469_v48 = vld [vmem:[%s7106_s0 + $0xa8] sm:$0xff] }
  0x2e   :  { %v295_v54 = vadd.f32 %v294_v42, %v293_v45  ;;  %7261 = vst [vmem:[#allocation29_spill] sm:$0xff] %v3920_v0  ;;  %v300_v1 = vsel %vm7233_vm0, %v3913_v56, 0.0  ;;  %v3251_v2 = vpack.i.bf16 %v3042_v59, %v3041_v57  ;;  %v3926_v7 = vsel %vm183_vm11, 1.0, %v7117_v5  ;;  %v3981_v59 = vld [vmem:[%s7107_s1 + $0x80] sm:$0xff] }
  0x2f   :  { %7262 = vst [vmem:[#allocation30_spill] sm:$0xff] %v3926_v7  ;;  %v3045_v11 = vsel %vm90_vm12, 1.0, %v7117_v5  ;;  %v3046_v13 = vsel %vm91_vm13, 1.0, %v7117_v5  ;;  %vm185_vm15 = vcmp.ge.s32.totalorder %v3692_v23, 0  ;;  %v302_v14 = vsel %vm7233_vm0, %v3920_v0, 0.0 }
  0x30   :  { %v297_v62 = vadd.f32 %v296_v52, %v295_v54  ;;  %v3934_v19 = vsel %vm184_vm14, 1.0, %v7117_v5  ;;  %v304_v21 = vsel %vm7233_vm0, %v3926_v7, 0.0  ;;  %v3261_v22 = vpack.i.bf16 %v3046_v13, %v3045_v11  ;;  %v4016_v11 = vld [vmem:[%s7107_s1 + $0xd0] sm:$0xff]  ;;  %v4023_v13 = vld [vmem:[%s7107_s1 + $0x18] sm:$0xff] }
  0x31   :  { %3247 = vperm.xlu1 %3195, %v3246_v53   ;;  %7263 = vst [vmem:[#allocation31_spill] sm:$0xff] %v3934_v19  ;;  %vm186_vm1 = vcmp.ge.s32.totalorder %v58_v50, 0  ;;  %v3939_v25 = vsel %vm185_vm15, 1.0, %v7117_v5  ;;  %vm187_vm2 = vcmp.ge.s32.totalorder %v59_v51, 0  ;;  %v306_v23 = vsel %vm7233_vm0, %v3934_v19, 0.0 }
  0x32   :  { %v299_v4 = vadd.f32 %v298_v61, %v297_v62  ;;  %7264 = vst [vmem:[#allocation32_spill] sm:$0xff] %v3939_v25  ;;  %v3944_v29 = vsel %vm186_vm1, 1.0, %v7117_v5  ;;  %vm188_vm3 = vcmp.ge.s32.totalorder %v3719_v39, 0  ;;  %v308_v34 = vsel %vm7233_vm0, %v3939_v25, 0.0  ;;  %v3988_v62 = vld [vmem:[%s7107_s1 + $0x90] sm:$0xff] }
  0x33   :  { %7265 = vst [vmem:[#allocation33_spill] sm:$0xff] %v3944_v29  ;;  %v3950_v35 = vsel %vm187_vm2, 1.0, %v7117_v5  ;;  %vm189_vm4 = vcmp.ge.s32.totalorder %v3724_v40, 0  ;;  %v310_v41 = vsel %vm7233_vm0, %v3944_v29, 0.0  ;;  %v3961_v42 = vsel %vm188_vm3, 1.0, %v7117_v5  ;;  %v894_v40 = vld [vmem:[%s7107_s1 + $0x70] sm:$0xff] }
  0x34   :  { %v301_v16 = vadd.f32 %v300_v1, %v299_v4  ;;  %7266 = vst [vmem:[#allocation34_spill] sm:$0xff] %v3950_v35  ;;  %7267 = vst [vmem:[#allocation35_spill] sm:$0xff] %v3961_v42  ;;  %v312_v45 = vsel %vm7233_vm0, %v3950_v35, 0.0  ;;  %v3968_v50 = vsel %vm189_vm4, 1.0, %v7117_v5  ;;  %v314_v52 = vsel %vm7233_vm0, %v3961_v42, 0.0  ;;  %v3995_v1 = vld [vmem:[%s7107_s1 + $0xa0] sm:$0xff] }
  0x35   :  { %3252 = vperm.xlu1 %3195, %v3251_v2   ;;  %7268 = vst [vmem:[#allocation36_spill] sm:$0xff] %v3968_v50  ;;  %v316_v54 = vsel %vm7233_vm0, %v3968_v50, 0.0  ;;  %v4002_v2 = vld [vmem:[%s7107_s1 + $0xb0] sm:$0xff]  ;;  %v4009_v4 = vld [vmem:[%s7107_s1 + $0xc0] sm:$0xff]  ;;  %v4171_v42 = vld [vmem:[%s7108_s2 + $0xd8] sm:$0xff]  ;;  %vm807_vm5 = vcmask 31744  }
  0x36   :  { %v303_v24 = vadd.f32 %v302_v14, %v301_v16  ;;  %v4028_v14 = vld [vmem:[%s7107_s1 + $0xe0] sm:$0xff]  ;;  %7274 = vst [vmem:[#allocation42_spill] sm:$0xff] %v4171_v42  ;;  %v4176_v35 = vld [vmem:[%s7106_s0 + $0x30] sm:$0xff] }
  0x37   :  { %v884_v16 = vld [vmem:[%s7107_s1 + $0x20] sm:$0xff] }
  0x38   :  { %v305_v33 = vadd.f32 %v304_v21, %v303_v24  ;;  %v4040_v21 = vld [vmem:[%s7107_s1 + $0xf0] sm:$0xff] }
  0x39   :  { %3262 = vperm.xlu1 %3195, %v3261_v22   ;;  %v4048_v22 = vld [vmem:[%s7107_s1 + $0x28] sm:$0xff]  ;;  %v886_v24 = vld [vmem:[%s7107_s1 + $0x30] sm:$0xff] }
  0x3a   :  { %v307_v36 = vadd.f32 %v306_v23, %v305_v33  ;;  %v4063_v23 = vld [vmem:[%s7107_s1 + $0x38] sm:$0xff] }
  0x3b   :  { %v4081_v33 = vld [vmem:[%s7107_s1 + $0x58] sm:$0xff] }
  0x3c   :  { %v309_v39 = vadd.f32 %v308_v34, %v307_v36  ;;  %v892_v34 = vld [vmem:[%s7107_s1 + $0x60] sm:$0xff]  ;;  %v4094_v36 = vld [vmem:[%s7107_s1 + $0x68] sm:$0xff] }
  0x3d   :  { %994 = vrot.lane.b32.xlu1 %v3955_v38, %s3587_s25 }
  0x3e   :  { %v311_v51 = vadd.f32 %v310_v41, %v309_v39  ;;  %v329_v41 = vld [vmem:[%s7106_s0 + $0x10] sm:$0xff]  ;;  %v330_v39 = vld [vmem:[%s7106_s0 + $0x18] sm:$0xff] }
  0x40   :  { %v313_v53 = vadd.f32 %v312_v45, %v311_v51  ;;  %v361_v45 = vld [vmem:[%s7108_s2 + $0x10] sm:$0xff]  ;;  %v362_v51 = vld [vmem:[%s7108_s2 + $0x18] sm:$0xff] }
  0x41   :  { %1004 = vrot.lane.b32.xlu1 %v894_v40, %s3587_s25 }
  0x42   :  { %v315_v57 = vadd.f32 %v314_v52, %v313_v53  ;;  %v4114_v52 = vld [vmem:[%s7107_s1 + $0x78] sm:$0xff]  ;;  %v327_v53 = vld [vmem:[%s7106_s0] sm:$0xff] }
  0x43   :  { %7269 = vst [vmem:[#allocation37_spill] sm:$0xff] %v4114_v52 }
  0x44   :  { %v317_v61 = vadd.f32 %v316_v54, %v315_v57  ;;  %v328_v54 = vld [vmem:[%s7106_s0 + $0x8] sm:$0xff]  ;;  %v359_v57 = vld [vmem:[%s7108_s2] sm:$0xff] }
  0x45   :  { %1008 = vrot.lane.b32.xlu1 %v3981_v59, %s3587_s25  ;;  %v391_v29 = vsub.f32 %v327_v53, %v359_v57  ;;  %v4203_v57 = vld [vmem:[%s7107_s1 + $0x98] sm:$0xff] }
  0x46   :  { %318 = vadd.xlane.f32.xlu0 %v317_v61  ;;  %v4131_v61 = vld [vmem:[%s7106_s0 + $0x20] sm:$0xff]  ;;  %7275 = vst [vmem:[#allocation43_spill] sm:$0xff] %v4203_v57  ;;  %v4208_v53 = vld [vmem:[%s7108_s2 + $0x38] sm:$0xff] }
  0x49   :  { %1012 = vrot.lane.b32.xlu1 %v3988_v62, %s3587_s25 }
  0x4d   :  { %1016 = vrot.lane.b32.xlu1 %v3995_v1, %s3587_s25 }
  0x51   :  { %1020 = vrot.lane.b32.xlu1 %v4002_v2, %s3587_s25 }
  0x55   :  { %1024 = vrot.lane.b32.xlu1 %v4009_v4, %s3587_s25 }
  0x59   :  { %1028 = vrot.lane.b32.xlu1 %v4016_v11, %s3587_s25 }
  0x5c   :  { %982 = vrot.lane.b32.xlu0 %v4023_v13, %s3587_s25 }
  0x5d   :  { %1032 = vrot.lane.b32.xlu1 %v4028_v14, %s3587_s25 }
  0x60   :  { %984 = vrot.lane.b32.xlu0 %v884_v16, %s3587_s25 }
  0x61   :  { %1036 = vrot.lane.b32.xlu1 %v4040_v21, %s3587_s25 }
  0x64   :  { %986 = vrot.lane.b32.xlu0 %v4048_v22, %s3587_s25 }
  0x65   :  { %1104 = vrot.lane.b32.xlu1 %v3777_v10, %s3588_s16  ;;  %v888_v10 = vld [vmem:[%s7107_s1 + $0x40] sm:$0xff] }
  0x68   :  { %988 = vrot.lane.b32.xlu0 %v886_v24, %s3587_s25 }
  0x69   :  { %1108 = vrot.lane.b32.xlu1 %v3833_v46, %s3588_s16  ;;  %v890_v46 = vld [vmem:[%s7107_s1 + $0x50] sm:$0xff] }
  0x6c   :  { %990 = vrot.lane.b32.xlu0 %v4063_v23, %s3587_s25 }
  0x6d   :  { %1112 = vrot.lane.b32.xlu1 %v884_v16, %s3588_s16  ;;  %v332_v16 = vld [vmem:[%s7106_s0 + $0x28] sm:$0xff] }
  0x70   :  { %992 = vrot.lane.b32.xlu0 %v888_v10, %s3587_s25 }
  0x71   :  { %1116 = vrot.lane.b32.xlu1 %v886_v24, %s3588_s16  ;;  %v393_v24 = vsub.f32 %v329_v41, %v361_v45  ;;  %v4154_v41 = vld [vmem:[%s7106_s0 + $0xd8] sm:$0xff]  ;;  %v4166_v45 = vld [vmem:[%s7107_s1 + $0x88] sm:$0xff] }
  0x72   :  { %7271 = vst [vmem:[#allocation39_spill] sm:$0xff] %v4154_v41  ;;  %7273 = vst [vmem:[#allocation41_spill] sm:$0xff] %v4166_v45 }
  0x74   :  { %996 = vrot.lane.b32.xlu0 %v890_v46, %s3587_s25 }
  0x75   :  { %1120 = vrot.lane.b32.xlu1 %v888_v10, %s3588_s16  ;;  %v394_v10 = vsub.f32 %v330_v39, %v362_v51  ;;  %v4159_v39 = vld [vmem:[%s7108_s2 + $0xd0] sm:$0xff] }
  0x76   :  { %7272 = vst [vmem:[#allocation40_spill] sm:$0xff] %v4159_v39 }
  0x78   :  { %998 = vrot.lane.b32.xlu0 %v4081_v33, %s3587_s25 }
  0x79   :  { %1124 = vrot.lane.b32.xlu1 %v890_v46, %s3588_s16  ;;  %v4139_v46 = vld [vmem:[%s7108_s2 + $0x20] sm:$0xff] }
  0x7c   :  { %1000 = vrot.lane.b32.xlu0 %v892_v34, %s3587_s25 }
  0x7d   :  { %1128 = vrot.lane.b32.xlu1 %v892_v34, %s3588_s16  ;;  %v364_v34 = vld [vmem:[%s7108_s2 + $0x28] sm:$0xff] }
  0x7e   :  { %v396_v56 = vsub.f32 %v332_v16, %v364_v34 }
  0x80   :  { %1002 = vrot.lane.b32.xlu0 %v4094_v36, %s3587_s25 }
  0x81   :  { %1132 = vrot.lane.b32.xlu1 %v894_v40, %s3588_s16  ;;  %v360_v40 = vld [vmem:[%s7108_s2 + $0x8] sm:$0xff] }
  0x82   :  { %v392_v25 = vsub.f32 %v328_v54, %v360_v40  ;;  %v4194_v54 = vld [vmem:[%s7106_s0 + $0x38] sm:$0xff] }
  0x83   :  { %v398_v49 = vsub.f32 %v4194_v54, %v4208_v53  ;;  %v4260_v54 = vld [vmem:[%s7106_s0 + $0x40] sm:$0xff]  ;;  %v4278_v53 = vld [vmem:[%s7106_s0 + $0x48] sm:$0xff] }
  0x84   :  { %1006 = vrot.lane.b32.xlu0 %v4114_v52, %s3587_s25 }
  0x85   :  { %v3198_v5 = vpop.permute.xlu1 %3197  ;;  %1136 = vrot.lane.b32.xlu1 %v3981_v59, %s3588_s16  ;;  %v4181_v59 = vld [vmem:[%s7108_s2 + $0x30] sm:$0xff] }
  0x86   :  { %v3200_v51 = vunpack.i.h.bf16 %v3198_v5  ;;  %v3199_v50 = vunpack.i.l.bf16 %v3198_v5  ;;  %v395_v5 = vsub.f32 %v4131_v61, %v4139_v46 }
  0x88   :  { %v586_v19 = vmul.f32 %v3200_v51, %v394_v10  ;;  %v585_v7 = vmul.f32 %v3199_v50, %v393_v24  ;;  %v3192_v0 = vpop.permute.xlu0 %3191  ;;  %1010 = vrot.lane.b32.xlu0 %v4166_v45, %s3587_s25 }
  0x89   :  { %v3194_v37 = vunpack.i.h.bf16 %v3192_v0  ;;  %v3193_v20 = vunpack.i.l.bf16 %v3192_v0  ;;  %1140 = vrot.lane.b32.xlu1 %v3988_v62, %s3588_s16  ;;  %v4213_v62 = vld [vmem:[%s7106_s0 + $0xf0] sm:$0xff] }
  0x8a   :  { %v618_v0 = vand.u32 2147483647, %v586_v19  ;;  %v682_v40 = vmul.f32 4.5, %v586_v19  ;;  %v617_v61 = vand.u32 2147483647, %v585_v7  ;;  %v681_v16 = vmul.f32 4.5, %v585_v7  ;;  %v3203_v24 = vpop.permute.xlu1 %3202 }
  0x8b   :  { %v584_v10 = vmul.f32 %v3194_v37, %v392_v25  ;;  %v583_v46 = vmul.f32 %v3193_v20, %v391_v29  ;;  %v3205_v34 = vunpack.i.h.bf16 %v3203_v24  ;;  %v3204_v51 = vunpack.i.l.bf16 %v3203_v24  ;;  %7276 = vst [vmem:[#allocation44_spill] sm:$0xff] %v4213_v62  ;;  %v4355_v37 = vld [vmem:[%s7108_s2 + $0x70] sm:$0xff]  ;;  %v4504_v62 = vld [vmem:[%s7108_s2 + $0xb8] sm:$0xff] }
  0x8c   :  { %vm4220_vm6 = vcmp.lt.f32.partialorder %v618_v0, 0.11111111  ;;  %v714_v20 = vmul.f32 %v682_v40, %v586_v19  ;;  %v3084_v25 = vadd.f32 -0.055555556, %v618_v0  ;;  %vm4224_vm7 = vcmp.lt.f32.partialorder %v617_v61, 0.11111111  ;;  %1014 = vrot.lane.b32.xlu0 %v4203_v57, %s3587_s25 }
  0x8d   :  { %v713_v24 = vmul.f32 %v681_v16, %v585_v7  ;;  %v3083_v50 = vadd.f32 -0.055555556, %v617_v61  ;;  %v616_v26 = vand.u32 2147483647, %v584_v10  ;;  %v680_v58 = vmul.f32 4.5, %v584_v10  ;;  %1144 = vrot.lane.b32.xlu1 %v3995_v1, %s3588_s16  ;;  %v4242_v7 = vld [vmem:[%s7106_s0 + $0xf8] sm:$0xff] }
  0x8e   :  { %v615_v19 = vand.u32 2147483647, %v583_v46  ;;  %v679_v0 = vmul.f32 4.5, %v583_v46  ;;  %v588_v40 = vmul.f32 %v3205_v34, %v396_v56  ;;  %7283 = vst [vmem:[#allocation47_spill] sm:$0xff] %v4242_v7  ;;  %v778_v61 = vsel %vm4220_vm6, %v714_v20, %v3084_v25  ;;  %v4253_v56 = vld [vmem:[%s7108_s2 + $0xf8] sm:$0xff]  ;;  %v4265_v34 = vld [vmem:[%s7108_s2 + $0x40] sm:$0xff] }
  0x8f   :  { %vm4246_vm8 = vcmp.lt.f32.partialorder %v616_v26, 0.11111111  ;;  %v712_v16 = vmul.f32 %v680_v58, %v584_v10  ;;  %7286 = vst [vmem:[#allocation48_spill] sm:$0xff] %v4253_v56  ;;  %v777_v58 = vsel %vm4224_vm7, %v713_v24, %v3083_v50  ;;  %v3082_v10 = vadd.f32 -0.055555556, %v616_v26  ;;  %v4273_v25 = vpop.permute.xlu1 %3207  ;;  %v4319_v1 = vld [vmem:[%s7108_s2 + $0x58] sm:$0xff] }
  0x90   :  { %vm4269_vm9 = vcmp.lt.f32.partialorder %v615_v19, 0.11111111  ;;  %v711_v20 = vmul.f32 %v679_v0, %v583_v46  ;;  %1018 = vrot.lane.b32.xlu0 %v4235_v6, %s3587_s25  ;;  %v3081_v26 = vadd.f32 -0.055555556, %v615_v19  ;;  %v620_v50 = vand.u32 2147483647, %v588_v40 }
  0x91   :  { %v684_v29 = vmul.f32 4.5, %v588_v40  ;;  %v587_v24 = vmul.f32 %v3204_v51, %v395_v5  ;;  %1148 = vrot.lane.b32.xlu1 %v4002_v2, %s3588_s16  ;;  %v4292_v46 = vld [vmem:[%s7107_s1 + $0xb8] sm:$0xff]  ;;  %v776_v0 = vsel %vm4246_vm8, %v712_v16, %v3082_v10  ;;  %v3210_v55 = vunpack.i.h.bf16 %v4273_v25  ;;  %v4304_v2 = vld [vmem:[%s7106_s0 + $0x50] sm:$0xff]  ;;  %v4324_v16 = vld [vmem:[%s7106_s0 + $0x60] sm:$0xff] }
  0x92   :  { %7289 = vst [vmem:[#allocation49_spill] sm:$0xff] %v4292_v46  ;;  %v4309_v5 = vld [vmem:[%s7106_s0 + $0x58] sm:$0xff]  ;;  %v4314_v51 = vld [vmem:[%s7108_s2 + $0x50] sm:$0xff]  ;;  %v4329_v10 = vld [vmem:[%s7108_s2 + $0x60] sm:$0xff]  ;;  %v813_v15 = vsel %vm807_vm5, %v778_v61, 0.0  ;;  %v809_v19 = vsel %vm807_vm5, %v776_v0, 0.0  ;;  %v775_v63 = vsel %vm4269_vm9, %v711_v20, %v3081_v26 }
  0x93   :  { %v4350_v61 = vld [vmem:[%s7106_s0 + $0x70] sm:$0xff]  ;;  %v4360_v20 = vld [vmem:[%s7107_s1 + $0xc8] sm:$0xff]  ;;  %v811_v26 = vsel %vm807_vm5, %v777_v58, 0.0  ;;  %v808_v0 = vsel %vm807_vm5, %v775_v63, 0.0  ;;  %v619_v43 = vand.u32 2147483647, %v587_v24  ;;  %v4364_v9 = vpop.permute.xlu1 %3212  ;;  %v716_v60 = vmul.f32 %v684_v29, %v588_v40 }
  0x94   :  { %7290 = vst [vmem:[#allocation50_spill] sm:$0xff] %v4360_v20  ;;  %v683_v31 = vmul.f32 4.5, %v587_v24  ;;  %1022 = vrot.lane.b32.xlu0 %v4292_v46, %s3587_s25  ;;  %v810_v58 = vadd.f32 %v809_v19, %v808_v0  ;;  %v3086_v63 = vadd.f32 -0.055555556, %v620_v50  ;;  %v590_v44 = vmul.f32 %v3210_v55, %v398_v49  ;;  %v4393_v19 = vld [vmem:[%s7108_s2 + $0x80] sm:$0xff]  ;;  %v4398_v49 = vld [vmem:[%s7108_s2 + $0x88] sm:$0xff] }
  0x95   :  { %1152 = vrot.lane.b32.xlu1 %v4009_v4, %s3588_s16  ;;  %v4403_v55 = vld [vmem:[%s7106_s0 + $0x90] sm:$0xff]  ;;  %vm4405_vm10 = vcmp.lt.f32.partialorder %v620_v50, 0.11111111  ;;  %vm4409_vm11 = vcmp.lt.f32.partialorder %v619_v43, 0.11111111  ;;  %v4422_v50 = vld [vmem:[%s7106_s0 + $0x98] sm:$0xff]  ;;  %v3215_v42 = vunpack.i.h.bf16 %v4364_v9  ;;  %v3214_v39 = vunpack.i.l.bf16 %v4364_v9 }
  0x96   :  { %v715_v29 = vmul.f32 %v683_v31, %v587_v24  ;;  %v3085_v0 = vadd.f32 -0.055555556, %v619_v43  ;;  %v812_v17 = vadd.f32 %v811_v26, %v810_v58  ;;  %v4427_v31 = vld [vmem:[%s7108_s2 + $0x90] sm:$0xff]  ;;  %v4432_v43 = vld [vmem:[%s7108_s2 + $0x98] sm:$0xff]  ;;  %v622_v26 = vand.u32 2147483647, %v590_v44 }
  0x97   :  { %v4436_v58 = vpop.permute.xlu1 %3217  ;;  %v4447_v56 = vld [vmem:[%s7106_s0 + $0xa0] sm:$0xff]  ;;  %v4487_v4 = vld [vmem:[%s7106_s0 + $0xb0] sm:$0xff]  ;;  %v7300_v9 = vsub.f32 %v4278_v53, %v4283_v32 }
  0x98   :  { %v779_v24 = vsel %vm4409_vm11, %v715_v29, %v3085_v0  ;;  %1026 = vrot.lane.b32.xlu0 %v4360_v20, %s3587_s25  ;;  %v4452_v40 = vld [vmem:[%s7108_s2 + $0xa0] sm:$0xff]  ;;  %v780_v29 = vsel %vm4405_vm10, %v716_v60, %v3086_v63  ;;  %v814_v0 = vadd.f32 %v813_v15, %v812_v17  ;;  %v4464_v20 = vld [vmem:[%s7107_s1 + $0xd8] sm:$0xff]  ;;  %v4474_v17 = vld [vmem:[%s7108_s2 + $0xa8] sm:$0xff]  ;;  %v3088_v46 = vadd.f32 -0.055555556, %v622_v26 }
  0x99   :  { %v815_v7 = vsel %vm807_vm5, %v779_v24, 0.0  ;;  %1156 = vrot.lane.b32.xlu1 %v4016_v11, %s3588_s16  ;;  %7295 = vst [vmem:[#allocation51_spill] sm:$0xff] %v4464_v20  ;;  %v4492_v24 = vld [vmem:[%s7106_s0 + $0xb8] sm:$0xff]  ;;  %v4497_v60 = vld [vmem:[%s7108_s2 + $0xb0] sm:$0xff]  ;;  %v686_v11 = vmul.f32 4.5, %v590_v44  ;;  %v4509_v6 = vld [vmem:[%s7106_s0 + $0xc0] sm:$0xff]  ;;  %v3209_v63 = vunpack.i.l.bf16 %v4273_v25  ;;  %v3219_v53 = vunpack.i.l.bf16 %v4436_v58 }
  0x9a   :  { %7296 = vst [vmem:[#allocation52_spill] sm:$0xff] %v4497_v60  ;;  %v816_v15 = vadd.f32 %v815_v7, %v814_v0  ;;  %v4514_v57 = vld [vmem:[%s7108_s2 + $0xc0] sm:$0xff]  ;;  %v817_v7 = vsel %vm807_vm5, %v780_v29, 0.0  ;;  %vm4517_vm12 = vcmp.lt.f32.partialorder %v622_v26, 0.11111111  ;;  %v4533_v26 = vld [vmem:[%s7107_s1 + $0xe8] sm:$0xff]  ;;  %v7301_v29 = vsub.f32 %v4260_v54, %v4265_v34 }
  0x9b   :  { %v4523_v41 = vpop.permute.xlu1 %3222  ;;  %v718_v45 = vmul.f32 %v686_v11, %v590_v44  ;;  %v592_v11 = vmul.f32 %v3215_v42, %v7300_v9 }
  0x9c   :  { %1030 = vrot.lane.b32.xlu0 %v4464_v20, %s3587_s25  ;;  %v7299_v20 = vsub.f32 %v4176_v35, %v4181_v59  ;;  %v818_v52 = vadd.f32 %v817_v7, %v816_v15  ;;  %v591_v60 = vmul.f32 %v3214_v39, %v7301_v29  ;;  %v3220_v35 = vunpack.i.h.bf16 %v4436_v58  ;;  %v4583_v29 = vld [vmem:[%s7108_s2 + $0xc8] sm:$0xff] }
  0x9d   :  { %1160 = vrot.lane.b32.xlu1 %v4028_v14, %s3588_s16  ;;  %v782_v25 = vsel %vm4517_vm12, %v718_v45, %v3088_v46  ;;  %v4564_v45 = vld [vmem:[%s7107_s1 + $0xf8] sm:$0xff]  ;;  %v624_v54 = vand.u32 2147483647, %v592_v11  ;;  %v688_v39 = vmul.f32 4.5, %v592_v11  ;;  %v7304_v7 = vsub.f32 %v4309_v5, %v4319_v1 }
  0x9e   :  { %v589_v44 = vmul.f32 %v3209_v63, %v7299_v20  ;;  %v821_v59 = vsel %vm807_vm5, %v782_v25, 0.0  ;;  %v623_v34 = vand.u32 2147483647, %v591_v60  ;;  %v687_v46 = vmul.f32 4.5, %v591_v60  ;;  %v4578_v25 = vld [vmem:[%s7106_s0 + $0xc8] sm:$0xff] }
  0x9f   :  { %v594_v0 = vmul.f32 %v3220_v35, %v7304_v7  ;;  %vm4585_vm14 = vcmp.lt.f32.partialorder %v624_v54, 0.11111111  ;;  %v3090_v9 = vadd.f32 -0.055555556, %v624_v54 }
  0xa0   :  { %v621_v32 = vand.u32 2147483647, %v589_v44  ;;  %v685_v42 = vmul.f32 4.5, %v589_v44  ;;  %v4557_v20 = vpop.permute.xlu1 %3227  ;;  %1034 = vrot.lane.b32.xlu0 %v4533_v26, %s3587_s25  ;;  %vm4589_vm15 = vcmp.lt.f32.partialorder %v623_v34, 0.11111111  ;;  %v719_v1 = vmul.f32 %v687_v46, %v591_v60 }
  0xa1   :  { %1164 = vrot.lane.b32.xlu1 %v4040_v21, %s3588_s16  ;;  %v3089_v35 = vadd.f32 -0.055555556, %v623_v34  ;;  %v690_v54 = vmul.f32 4.5, %v594_v0  ;;  %v416_v46 = vsub.f32 %v4578_v25, %v4583_v29  ;;  %v3230_v34 = vunpack.i.h.bf16 %v4557_v20 }
  0xa2   :  { %vm4568_vm13 = vcmp.lt.f32.partialorder %v621_v32, 0.11111111  ;;  %v717_v58 = vmul.f32 %v685_v42, %v589_v44  ;;  %v3087_v63 = vadd.f32 -0.055555556, %v621_v32  ;;  %v720_v44 = vmul.f32 %v688_v39, %v592_v11 }
  0xa3   :  { %v626_v42 = vand.u32 2147483647, %v594_v0  ;;  %v7309_v39 = vsub.f32 %v4304_v2, %v4314_v51  ;;  %v783_v60 = vsel %vm4589_vm15, %v719_v1, %v3089_v35  ;;  %v722_v2 = vmul.f32 %v690_v54, %v594_v0 }
  0xa4   :  { %v781_v5 = vsel %vm4568_vm13, %v717_v58, %v3087_v63  ;;  %v4595_v7 = vpop.permute.xlu1 %3232  ;;  %1038 = vrot.lane.b32.xlu0 %v4564_v45, %s3587_s25  ;;  %v784_v11 = vsel %vm4585_vm14, %v720_v44, %v3090_v9  ;;  %v4616_v58 = vld [vmem:[%s7106_s0 + $0xe0] sm:$0xff]  ;;  %v823_v63 = vsel %vm807_vm5, %v783_v60, 0.0  ;;  %v3225_v9 = vunpack.i.h.bf16 %v4523_v41 }
  0xa5   :  { %v819_v3 = vsel %vm807_vm5, %v781_v5, 0.0  ;;  %v593_v14 = vmul.f32 %v3219_v53, %v7309_v39  ;;  %vm4607_vm1 = vcmp.lt.f32.partialorder %v626_v42, 0.11111111  ;;  %v3092_v51 = vadd.f32 -0.055555556, %v626_v42 }
  0xa6   :  { %v820_v15 = vadd.f32 %v819_v3, %v818_v52  ;;  %v4622_v52 = vld [vmem:[%s7108_s2 + $0xe0] sm:$0xff]  ;;  %v825_v21 = vsel %vm807_vm5, %v784_v11, 0.0  ;;  %v7314_v11 = vsub.f32 %v4340_v47, %v4345_v30 }
  0xa7   :  { %v625_v3 = vand.u32 2147483647, %v593_v14  ;;  %v689_v44 = vmul.f32 4.5, %v593_v14  ;;  %v786_v0 = vsel %vm4607_vm1, %v722_v2, %v3092_v51  ;;  %v419_v39 = vsub.f32 %v4616_v58, %v4622_v52  ;;  %v7359_v52 = vld [vmem:[#allocation46_spill] sm:$0xff] }
  0xa8   :  { %v822_v53 = vadd.f32 %v821_v59, %v820_v15  ;;  %v4626_v32 = vpop.permute.xlu1 %3237  ;;  %1106 = vrot.lane.b32.xlu0 %v3802_v28, %s3588_s16  ;;  %v3224_v59 = vunpack.i.l.bf16 %v4523_v41  ;;  %v596_v54 = vmul.f32 %v3225_v9, %v7314_v11  ;;  %v829_v28 = vsel %vm807_vm5, %v786_v0, 0.0 }
  0xa9   :  { %vm4632_vm2 = vcmp.lt.f32.partialorder %v625_v3, 0.11111111  ;;  %v3091_v1 = vadd.f32 -0.055555556, %v625_v3  ;;  %v721_v42 = vmul.f32 %v689_v44, %v593_v14  ;;  %v7315_v15 = vsub.f32 %v4324_v16, %v4329_v10 }
  0xaa   :  { %v824_v35 = vadd.f32 %v823_v63, %v822_v53  ;;  %v3229_v2 = vunpack.i.l.bf16 %v4557_v20  ;;  %v628_v63 = vand.u32 2147483647, %v596_v54  ;;  %v692_v30 = vmul.f32 4.5, %v596_v54 }
  0xab   :  { %v595_v60 = vmul.f32 %v3224_v59, %v7315_v15  ;;  %v785_v14 = vsel %vm4632_vm2, %v721_v42, %v3091_v1  ;;  %v7316_v10 = vsub.f32 %v4371_v12, %v4376_v18 }
  0xac   :  { %v826_v41 = vadd.f32 %v825_v21, %v824_v35  ;;  %v4650_v47 = vpop.permute.xlu1 %3242  ;;  %1110 = vrot.lane.b32.xlu0 %v4023_v13, %s3588_s16  ;;  %v827_v51 = vsel %vm807_vm5, %v785_v14, 0.0  ;;  %vm660_vm3 = vcmp.lt.f32.partialorder %v628_v63, 0.11111111  ;;  %v724_v21 = vmul.f32 %v692_v30, %v596_v54 }
  0xad   :  { %v627_v3 = vand.u32 2147483647, %v595_v60  ;;  %v691_v16 = vmul.f32 4.5, %v595_v60  ;;  %v598_v53 = vmul.f32 %v3230_v34, %v7316_v10  ;;  %v3094_v44 = vadd.f32 -0.055555556, %v628_v63 }
  0xae   :  { %v828_v20 = vadd.f32 %v827_v51, %v826_v41  ;;  %v7317_v13 = vsub.f32 %v4350_v61, %v4355_v37  ;;  %v3235_v37 = vunpack.i.h.bf16 %v4595_v7  ;;  %v7320_v10 = vsub.f32 %v4388_v8, %v4398_v49 }
  0xaf   :  { %vm659_vm4 = vcmp.lt.f32.partialorder %v627_v3, 0.11111111  ;;  %v723_v9 = vmul.f32 %v691_v16, %v595_v60  ;;  %v3093_v0 = vadd.f32 -0.055555556, %v627_v3  ;;  %v630_v5 = vand.u32 2147483647, %v598_v53 }
  0xb0   :  { %v830_v1 = vadd.f32 %v829_v28, %v828_v20  ;;  %v788_v59 = vsel %vm660_vm3, %v724_v21, %v3094_v44  ;;  %v694_v35 = vmul.f32 4.5, %v598_v53  ;;  %v597_v42 = vmul.f32 %v3229_v2, %v7317_v13  ;;  %v4661_v11 = vpop.permute.xlu1 %3247  ;;  %1114 = vrot.lane.b32.xlu0 %v4048_v22, %s3588_s16 }
  0xb1   :  { %v833_v18 = vsel %vm807_vm5, %v788_v59, 0.0  ;;  %v787_v12 = vsel %vm659_vm4, %v723_v9, %v3093_v0  ;;  %vm4666_vm6 = vcmp.lt.f32.partialorder %v630_v5, 0.11111111  ;;  %v3096_v15 = vadd.f32 -0.055555556, %v630_v5  ;;  %v4692_v5 = vpop.permute.xlu0 %3257 }
  0xb2   :  { %v831_v28 = vsel %vm807_vm5, %v787_v12, 0.0  ;;  %v726_v60 = vmul.f32 %v694_v35, %v598_v53  ;;  %v629_v34 = vand.u32 2147483647, %v597_v42  ;;  %v693_v41 = vmul.f32 4.5, %v597_v42 }
  0xb3   :  { %v832_v61 = vadd.f32 %v831_v28, %v830_v1  ;;  %v3234_v2 = vunpack.i.l.bf16 %v4595_v7  ;;  %v3240_v22 = vunpack.i.h.bf16 %v4626_v32  ;;  %v600_v7 = vmul.f32 %v3235_v37, %v7320_v10 }
  0xb4   :  { %v790_v14 = vsel %vm4666_vm6, %v726_v60, %v3096_v15  ;;  %vm661_vm7 = vcmp.lt.f32.partialorder %v629_v34, 0.11111111  ;;  %v725_v63 = vmul.f32 %v693_v41, %v597_v42  ;;  %v3095_v30 = vadd.f32 -0.055555556, %v629_v34  ;;  %v4676_v51 = vpop.permute.xlu1 %3252  ;;  %1118 = vrot.lane.b32.xlu0 %v4063_v23, %s3588_s16 }
  0xb5   :  { %v834_v3 = vadd.f32 %v833_v18, %v832_v61  ;;  %v837_v16 = vsel %vm807_vm5, %v790_v14, 0.0  ;;  %v7321_v53 = vsub.f32 %v4383_v27, %v4393_v19  ;;  %v7322_v44 = vsub.f32 %v4422_v50, %v4432_v43 }
  0xb6   :  { %v789_v21 = vsel %vm661_vm7, %v725_v63, %v3095_v30  ;;  %v3239_v0 = vunpack.i.l.bf16 %v4626_v32  ;;  %v3245_v23 = vunpack.i.h.bf16 %v4650_v47  ;;  %v632_v59 = vand.u32 2147483647, %v600_v7 }
  0xb7   :  { %v599_v20 = vmul.f32 %v3234_v2, %v7321_v53  ;;  %v602_v9 = vmul.f32 %v3240_v22, %v7322_v44  ;;  %v835_v1 = vsel %vm807_vm5, %v789_v21, 0.0  ;;  %v696_v8 = vmul.f32 4.5, %v600_v7 }
  0xb8   :  { %v836_v35 = vadd.f32 %v835_v1, %v834_v3  ;;  %v4695_v42 = vpop.permute.xlu1 %3262  ;;  %1122 = vrot.lane.b32.xlu0 %v3955_v38, %s3588_s16  ;;  %vm4699_vm8 = vcmp.lt.f32.partialorder %v632_v59, 0.11111111  ;;  %v3098_v32 = vadd.f32 -0.055555556, %v632_v59  ;;  %v7329_v41 = vsub.f32 %v4403_v55, %v4427_v31  ;;  %v4727_v3 = vpop.permute.xlu0 %3267  ;;  %v4747_v59 = vld [vmem:[%s7106_s0 + $0xe8] sm:$0xff]  ;;  %s3589_s0 = smov 1.0  }
  0xb9   :  { %v631_v49 = vand.u32 2147483647, %v599_v20  ;;  %v695_v13 = vmul.f32 4.5, %v599_v20  ;;  %v634_v27 = vand.u32 2147483647, %v602_v9  ;;  %v698_v19 = vmul.f32 4.5, %v602_v9 }
  0xba   :  { %v728_v43 = vmul.f32 %v696_v8, %v600_v7  ;;  %v838_v12 = vadd.f32 %v837_v16, %v836_v35  ;;  %v601_v61 = vmul.f32 %v3239_v0, %v7329_v41  ;;  %v3259_v37 = vunpack.i.l.bf16 %v4692_v5  ;;  %v4752_v8 = vld [vmem:[%s7108_s2 + $0xe8] sm:$0xff]  ;;  %v7350_v0 = vld [vmem:[#allocation39_spill] sm:$0xff]  ;;  %s3008_s2 = sshll.u32 %s7114_s8, 4  ;;  %s3009_s2 = int_to_ptr.vmem [resolvable:$true] %s3008_s2 }
  0xbb   :  { %vm4703_vm9 = vcmp.lt.f32.partialorder %v631_v49, 0.11111111  ;;  %v727_v54 = vmul.f32 %v695_v13, %v599_v20  ;;  %v3097_v15 = vadd.f32 -0.055555556, %v631_v49  ;;  %vm4707_vm10 = vcmp.lt.f32.partialorder %v634_v27, 0.11111111  ;;  %p3576_p1 = scmp.lt.s32.totalorder %s3009_s2, %s3009_s2 }
  0xbc   :  { %v792_v38 = vsel %vm4699_vm8, %v728_v43, %v3098_v32  ;;  %v730_v60 = vmul.f32 %v698_v19, %v602_v9  ;;  %v3100_v34 = vadd.f32 -0.055555556, %v634_v27  ;;  %v7330_v22 = vsub.f32 %v4469_v48, %v4474_v17  ;;  %v4723_v30 = vpop.permute.xlu1 %994  ;;  %1126 = vrot.lane.b32.xlu0 %v4081_v33, %s3588_s16  ;;  %v4765_v32 = vpop.permute.xlu0 %976  ;;  %s3571_s20 = scalar_lea.vmem %s3009_s2, 16 }
  0xbd   :  { %v791_v2 = vsel %vm4703_vm9, %v727_v54, %v3097_v15  ;;  %v3244_v63 = vunpack.i.l.bf16 %v4650_v47  ;;  %v841_v55 = vsel %vm807_vm5, %v792_v38, 0.0  ;;  %v633_v16 = vand.u32 2147483647, %v601_v61  ;;  %p3572_p0 = scmp.ne.s32.totalorder %s3009_s2, %s3571_s20  ;;  %p3577_p2 = scmp.lt.s32.totalorder %s3571_s20, %s3571_s20 }
  0xbe   :  { %v604_v14 = vmul.f32 %v3245_v23, %v7330_v22  ;;  %v839_v31 = vsel %vm807_vm5, %v791_v2, 0.0  ;;  %v697_v10 = vmul.f32 4.5, %v601_v61  ;;  %v794_v48 = vsel %vm4707_vm10, %v730_v60, %v3100_v34  ;;  %v7339_v60 = vld [vmem:[#allocation52_spill] sm:$0xff]  ;;  %v7341_v2 = vld [vmem:[#allocation37_spill] sm:$0xff] }
  0xbf   :  { %v840_v7 = vadd.f32 %v839_v31, %v838_v12  ;;  %vm4733_vm11 = vcmp.lt.f32.partialorder %v633_v16, 0.11111111  ;;  %v3099_v33 = vadd.f32 -0.055555556, %v633_v16  ;;  %v7333_v21 = vsub.f32 %v4447_v56, %v4452_v40  ;;  %p3578_p3 = por %p3577_p2, %p3576_p1 }
  0xc0   :  { %v636_v17 = vand.u32 2147483647, %v604_v14  ;;  %v700_v53 = vmul.f32 4.5, %v604_v14  ;;  %v729_v20 = vmul.f32 %v697_v10, %v601_v61  ;;  %v4754_v49 = vpop.permute.xlu1 %1004  ;;  %1130 = vrot.lane.b32.xlu0 %v4094_v36, %s3588_s16  ;;  %v3250_v13 = vunpack.i.h.bf16 %v4661_v11 }
  0xc1   :  { %v603_v44 = vmul.f32 %v3244_v63, %v7333_v21  ;;  %v842_v9 = vadd.f32 %v841_v55, %v840_v7  ;;  %v845_v27 = vsel %vm807_vm5, %v794_v48, 0.0  ;;  %v3249_v50 = vunpack.i.l.bf16 %v4661_v11  ;;  %v7343_v63 = vld [vmem:[#allocation40_spill] sm:$0xff]  ;;  %p3579_p4 = pnand %p3578_p3, %p3572_p0 }
  0xc2   :  { %vm4740_vm12 = vcmp.lt.f32.partialorder %v636_v17, 0.11111111  ;;  %v732_v23 = vmul.f32 %v700_v53, %v604_v14  ;;  %v3102_v1 = vadd.f32 -0.055555556, %v636_v17  ;;  %v793_v56 = vsel %vm4733_vm11, %v729_v20, %v3099_v33  ;;  %v7342_v14 = vld [vmem:[#allocation38_spill] sm:$0xff]  ;;  %v7347_v20 = vld [vmem:[#allocation41_spill] sm:$0xff]  ;;  %v4805_v33 = vpop.permute.xlu0 %978 }
  0xc3   :  { %v635_v40 = vand.u32 2147483647, %v603_v44  ;;  %v699_v35 = vmul.f32 4.5, %v603_v44  ;;  %v843_v19 = vsel %vm807_vm5, %v793_v56, 0.0  ;;  %v3255_v43 = vunpack.i.h.bf16 %v4676_v51 }
  0xc4   :  { %v844_v18 = vadd.f32 %v843_v19, %v842_v9  ;;  %v420_v54 = vsub.f32 %v4747_v59, %v4752_v8  ;;  %v796_v15 = vsel %vm4740_vm12, %v732_v23, %v3102_v1  ;;  %v7338_v11 = vsub.f32 %v4492_v24, %v4504_v62  ;;  %v4781_v61 = vpop.permute.xlu1 %1008  ;;  %1134 = vrot.lane.b32.xlu0 %v7341_v2, %s3588_s16  ;;  %v7351_v23 = vld [vmem:[#allocation42_spill] sm:$0xff] }
  0xc5   :  { %vm4767_vm13 = vcmp.lt.f32.partialorder %v635_v40, 0.11111111  ;;  %v731_v12 = vmul.f32 %v699_v35, %v603_v44  ;;  %v3101_v28 = vadd.f32 -0.055555556, %v635_v40  ;;  %v7340_v34 = vsub.f32 %v4487_v4, %v7339_v60 }
  0xc6   :  { %v606_v38 = vmul.f32 %v3250_v13, %v7338_v11  ;;  %v3260_v22 = vunpack.i.h.bf16 %v4692_v5  ;;  %v7344_v55 = vsub.f32 %v7342_v14, %v7343_v63  ;;  %v846_v16 = vadd.f32 %v845_v27, %v844_v18  ;;  %v4834_v2 = vpop.permute.xlu0 %980 }
  0xc7   :  { %v605_v41 = vmul.f32 %v3249_v50, %v7340_v34  ;;  %v608_v62 = vmul.f32 %v3255_v43, %v416_v46  ;;  %v795_v4 = vsel %vm4767_vm13, %v731_v12, %v3101_v28  ;;  %v849_v48 = vsel %vm807_vm5, %v796_v15, 0.0  ;;  %v7354_v28 = vld [vmem:[#allocation43_spill] sm:$0xff] }
  0xc8   :  { %v609_v31 = vmul.f32 %v3259_v37, %v7344_v55  ;;  %v638_v24 = vand.u32 2147483647, %v606_v38  ;;  %v702_v10 = vmul.f32 4.5, %v606_v38  ;;  %v847_v17 = vsel %vm807_vm5, %v795_v4, 0.0  ;;  %v4801_v46 = vpop.permute.xlu1 %1012  ;;  %1138 = vrot.lane.b32.xlu0 %v7347_v20, %s3588_s16  ;;  %v7365_v37 = vld [vmem:[#allocation47_spill] sm:$0xff] }
  0xc9   :  { %v637_v7 = vand.u32 2147483647, %v605_v41  ;;  %v701_v5 = vmul.f32 4.5, %v605_v41  ;;  %v3254_v53 = vunpack.i.l.bf16 %v4676_v51  ;;  %v848_v47 = vadd.f32 %v847_v17, %v846_v16 }
  0xca   :  { %vm4797_vm14 = vcmp.lt.f32.partialorder %v638_v24, 0.11111111  ;;  %v734_v25 = vmul.f32 %v702_v10, %v606_v38  ;;  %v3104_v29 = vadd.f32 -0.055555556, %v638_v24  ;;  %v3264_v9 = vunpack.i.l.bf16 %v4695_v42 }
  0xcb   :  { %vm4807_vm15 = vcmp.lt.f32.partialorder %v637_v7, 0.11111111  ;;  %v733_v44 = vmul.f32 %v701_v5, %v605_v41  ;;  %v3103_v51 = vadd.f32 -0.055555556, %v637_v7  ;;  %v7352_v1 = vsub.f32 %v7350_v0, %v7351_v23 }
  0xcc   :  { %v850_v8 = vadd.f32 %v849_v48, %v848_v47  ;;  %v640_v56 = vand.u32 2147483647, %v608_v62  ;;  %v704_v40 = vmul.f32 4.5, %v608_v62  ;;  %v798_v35 = vsel %vm4797_vm14, %v734_v25, %v3104_v29  ;;  %v4825_v15 = vpop.permute.xlu1 %1016  ;;  %1142 = vrot.lane.b32.xlu0 %v7354_v28, %s3588_s16  ;;  %v7366_v25 = vld [vmem:[#allocation48_spill] sm:$0xff] }
  0xcd   :  { %v610_v59 = vmul.f32 %v3260_v22, %v7352_v1  ;;  %v797_v13 = vsel %vm4807_vm15, %v733_v44, %v3103_v51  ;;  %v7353_v27 = vsub.f32 %v4509_v6, %v4514_v57  ;;  %v3265_v50 = vunpack.i.h.bf16 %v4695_v42 }
  0xce   :  { %v641_v43 = vand.u32 2147483647, %v609_v31  ;;  %v705_v18 = vmul.f32 4.5, %v609_v31  ;;  %v3270_v36 = vunpack.i.h.bf16 %v4727_v3  ;;  %v851_v12 = vsel %vm807_vm5, %v797_v13, 0.0 }
  0xcf   :  { %v607_v19 = vmul.f32 %v3254_v53, %v7353_v27  ;;  %v3269_v11 = vunpack.i.l.bf16 %v4727_v3  ;;  %v611_v6 = vmul.f32 %v3264_v9, %v419_v39  ;;  %v853_v57 = vsel %vm807_vm5, %v798_v35, 0.0  ;;  %v7360_v39 = vld [vmem:[#allocation44_spill] sm:$0xff] }
  0xd0   :  { %v852_v42 = vadd.f32 %v851_v12, %v850_v8  ;;  %v736_v34 = vmul.f32 %v704_v40, %v608_v62  ;;  %v3106_v41 = vadd.f32 -0.055555556, %v640_v56  ;;  %v612_v3 = vmul.f32 %v3265_v50, %v420_v54  ;;  %v4844_v58 = vpop.permute.xlu1 %1020  ;;  %1146 = vrot.lane.b32.xlu0 %v7359_v52, %s3588_s16  ;;  %v7361_v62 = vld [vmem:[#allocation45_spill] sm:$0xff] }
  0xd1   :  { %v639_v38 = vand.u32 2147483647, %v607_v19  ;;  %v703_v60 = vmul.f32 4.5, %v607_v19  ;;  %v642_v55 = vand.u32 2147483647, %v610_v59  ;;  %v706_v16 = vmul.f32 4.5, %v610_v59 }
  0xd2   :  { %vm4840_vm2 = vcmp.lt.f32.partialorder %v640_v56, 0.11111111  ;;  %v7362_v24 = vsub.f32 %v7360_v39, %v7361_v62  ;;  %v643_v48 = vand.u32 2147483647, %v611_v6  ;;  %v707_v54 = vmul.f32 4.5, %v611_v6 }
  0xd3   :  { %vm4836_vm1 = vcmp.lt.f32.partialorder %v639_v38, 0.11111111  ;;  %v735_v14 = vmul.f32 %v703_v60, %v607_v19  ;;  %v3105_v63 = vadd.f32 -0.055555556, %v639_v38  ;;  %vm4853_vm3 = vcmp.lt.f32.partialorder %v641_v43, 0.11111111  ;;  %v319_v9 = vpop.xlane.xlu0 %318 }
  0xd4   :  { %v613_v10 = vmul.f32 %v3269_v11, %v7362_v24  ;;  %v737_v5 = vmul.f32 %v705_v18, %v609_v31  ;;  %v3107_v53 = vadd.f32 -0.055555556, %v641_v43  ;;  %v854_v47 = vadd.f32 %v853_v57, %v852_v42  ;;  %v4863_v8 = vpop.permute.xlu1 %1024  ;;  %v7368_v31 = vld [vmem:[#allocation49_spill] sm:$0xff]  ;;  %v7373_v57 = vld [vmem:[#allocation50_spill] sm:$0xff] }
  0xd5   :  { %v799_v7 = vsel %vm4836_vm1, %v735_v14, %v3105_v63  ;;  %v7367_v29 = vsub.f32 %v7365_v37, %v7366_v25  ;;  %v800_v21 = vsel %vm4840_vm2, %v736_v34, %v3106_v41  ;;  %v708_v51 = vmul.f32 4.5, %v612_v3  ;;  %1150 = vrot.lane.b32.xlu0 %v7368_v31, %s3588_s16  ;;  %v4955_v42 = vld [vmem:[%s7107_s1 + $0x20] sm:$0xff] }
  0xd6   :  { %v855_v44 = vsel %vm807_vm5, %v799_v7, 0.0  ;;  %v738_v0 = vmul.f32 %v706_v16, %v610_v59  ;;  %v3108_v23 = vadd.f32 -0.055555556, %v642_v55  ;;  %v644_v1 = vand.u32 2147483647, %v612_v3 }
  0xd7   :  { %v614_v20 = vmul.f32 %v3270_v36, %v7367_v29  ;;  %vm4867_vm4 = vcmp.lt.f32.partialorder %v642_v55, 0.11111111  ;;  %v709_v40 = vmul.f32 4.5, %v613_v10  ;;  %v739_v35 = vmul.f32 %v707_v54, %v611_v6  ;;  %v4878_v12 = vpop.permute.xlu0 %982 }
  0xd8   :  { %v3109_v13 = vadd.f32 -0.055555556, %v643_v48  ;;  %v645_v27 = vand.u32 2147483647, %v613_v10  ;;  %v801_v19 = vsel %vm4853_vm3, %v737_v5, %v3107_v53  ;;  %v856_v50 = vadd.f32 %v855_v44, %v854_v47  ;;  %v4882_v6 = vpop.permute.xlu1 %1028 }
  0xd9   :  { %v857_v59 = vsel %vm807_vm5, %v800_v21, 0.0  ;;  %v740_v43 = vmul.f32 %v708_v51, %v612_v3  ;;  %v646_v18 = vand.u32 2147483647, %v614_v20  ;;  %vm4874_vm6 = vcmp.lt.f32.partialorder %v643_v48, 0.11111111  ;;  %1154 = vrot.lane.b32.xlu0 %v7373_v57, %s3588_s16  ;;  %v7378_v48 = vld [vmem:[#allocation51_spill] sm:$0xff] }
  0xda   :  { %v710_v28 = vmul.f32 4.5, %v614_v20  ;;  %v3110_v11 = vadd.f32 -0.055555556, %v644_v1  ;;  %v802_v38 = vsel %vm4867_vm4, %v738_v0, %v3108_v23  ;;  %v858_v60 = vadd.f32 %v857_v59, %v856_v50 }
  0xdb   :  { %vm4886_vm7 = vcmp.lt.f32.partialorder %v644_v1, 0.11111111  ;;  %v859_v34 = vsel %vm807_vm5, %v801_v19, 0.0  ;;  %v320_v41 = vrot.slane %v319_v9, 4  ;;  %v741_v22 = vmul.f32 %v709_v40, %v613_v10  ;;  %v4898_v52 = vpop.permute.xlu0 %984 }
  0xdc   :  { %v3111_v14 = vadd.f32 -0.055555556, %v645_v27  ;;  %v803_v63 = vsel %vm4874_vm6, %v739_v35, %v3109_v13  ;;  %v860_v3 = vadd.f32 %v859_v34, %v858_v60  ;;  %vm4893_vm8 = vcmp.lt.f32.partialorder %v645_v27, 0.11111111  ;;  %v4902_v7 = vpop.permute.xlu1 %1032 }
  0xdd   :  { %v861_v16 = vsel %vm807_vm5, %v802_v38, 0.0  ;;  %v321_v4 = vadd.f32 %v320_v41, %v319_v9  ;;  %v742_v39 = vmul.f32 %v710_v28, %v614_v20  ;;  %v3112_v62 = vadd.f32 -0.055555556, %v646_v18  ;;  %1158 = vrot.lane.b32.xlu0 %v7378_v48, %s3588_s16 }
  0xde   :  { %v804_v24 = vsel %vm4886_vm7, %v740_v43, %v3110_v11  ;;  %v862_v10 = vadd.f32 %v861_v16, %v860_v3  ;;  %vm4906_vm9 = vcmp.lt.f32.partialorder %v646_v18, 0.11111111  ;;  %v863_v17 = vsel %vm807_vm5, %v803_v63, 0.0  ;;  %v4937_v43 = vld [vmem:[%s7107_s1] sm:$0xff]  ;;  %v4946_v11 = vld [vmem:[%s7107_s1 + $0x10] sm:$0xff] }
  0xdf   :  { %v322_v5 = vrot.slane %v321_v4, 2  ;;  %v805_v53 = vsel %vm4893_vm8, %v741_v22, %v3111_v14  ;;  %v865_v37 = vsel %vm807_vm5, %v804_v24, 0.0  ;;  %v4914_v25 = vpop.permute.xlu0 %986  ;;  %v806_v20 = vsel %vm4906_vm9, %v742_v39, %v3112_v62  ;;  %v4964_v14 = vld [vmem:[%s7107_s1 + $0x30] sm:$0xff]  ;;  %v4973_v16 = vld [vmem:[%s7107_s1 + $0x40] sm:$0xff] }
  0xe0   :  { %v864_v47 = vadd.f32 %v863_v17, %v862_v10  ;;  %v4918_v44 = vpop.permute.xlu1 %1036  ;;  %v867_v51 = vsel %vm807_vm5, %v805_v53, 0.0  ;;  %v869_v23 = vsel %vm807_vm5, %v806_v20, 0.0  ;;  %v4982_v24 = vld [vmem:[%s7107_s1 + $0x50] sm:$0xff] }
  0xe1   :  { %v323_v29 = vadd.f32 %v322_v5, %v321_v4  ;;  %7381 = vst [vmem:[#allocation52_spill] sm:$0xff] %v4918_v44  ;;  %1162 = vrot.lane.b32.xlu0 %v4533_v26, %s3588_s16  ;;  %v4991_v5 = vld [vmem:[%s7107_s1 + $0x60] sm:$0xff] }
  0xe2   :  { %v866_v21 = vadd.f32 %v865_v37, %v864_v47 }
  0xe3   :  { %v324_v9 = vrot.slane %v323_v29, 1  ;;  %v4924_v31 = vpop.permute.xlu0 %988 }
  0xe4   :  { %v868_v0 = vadd.f32 %v867_v51, %v866_v21  ;;  %v1105_v40 = vpop.permute.xlu1 %1104  ;;  %v5009_v51 = vld [vmem:[%s7107_s1 + $0x80] sm:$0xff] }
  0xe5   :  { %v325_v1 = vadd.f32 %v324_v9, %v323_v29  ;;  %1166 = vrot.lane.b32.xlu0 %v4564_v45, %s3588_s16  ;;  %v1200_v18 = vsub.f32 %v4937_v43, %v1105_v40  ;;  %v5000_v29 = vld [vmem:[%s7107_s1 + $0x70] sm:$0xff] }
  0xe6   :  { %v870_v56 = vadd.f32 %v869_v23, %v868_v0 }
  0xe7   :  { %3161 = vpush %v325_v1  ;;  %v4928_v35 = vpop.permute.xlu0 %990  ;;  %v5018_v1 = vld [vmem:[%s7107_s1 + $0x90] sm:$0xff] }
  0xe8   :  { %871 = vadd.xlane.f32.xlu1 %v870_v56  ;;  %v1109_v13 = vpop.permute.xlu1 %1108 }
  0xe9   :  { %v1202_v38 = vsub.f32 %v4946_v11, %v1109_v13 }
  0xeb   :  { %v4930_v27 = vpop.permute.xlu0 %992 }
  0xec   :  { %v1113_v19 = vpop.permute.xlu1 %1112 }
  0xed   :  { %v1204_v34 = vsub.f32 %v4955_v42, %v1113_v19  ;;  %v5027_v19 = vld [vmem:[%s7107_s1 + $0xa0] sm:$0xff] }
  0xef   :  { %v4932_v50 = vpop.permute.xlu0 %996 }
  0xf0   :  { %v1117_v59 = vpop.permute.xlu1 %1116 }
  0xf1   :  { %v1206_v63 = vsub.f32 %v4964_v14, %v1117_v59 }
  0xf3   :  { %v4940_v36 = vpop.permute.xlu0 %998 }
  0xf4   :  { %v1121_v28 = vpop.permute.xlu1 %1120 }
  0xf5   :  { %v1208_v4 = vsub.f32 %v4973_v16, %v1121_v28  ;;  %v5036_v28 = vld [vmem:[%s7107_s1 + $0xb0] sm:$0xff] }
  0xf7   :  { %v4949_v60 = vpop.permute.xlu0 %1000 }
  0xf8   :  { %v1125_v57 = vpop.permute.xlu1 %1124 }
  0xf9   :  { %1264 = vrot.lane.b32.xlu1 %v1200_v18, %s3587_s25  ;;  %v1210_v10 = vsub.f32 %v4982_v24, %v1125_v57 }
  0xfb   :  { %v4958_v41 = vpop.permute.xlu0 %1002 }
  0xfc   :  { %7382 = vst [vmem:[#allocation37_spill] sm:$0xff] %v4958_v41  ;;  %v1129_v22 = vpop.permute.xlu1 %1128 }
  0xfd   :  { %1268 = vrot.lane.b32.xlu1 %v1202_v38, %s3587_s25  ;;  %v1212_v53 = vsub.f32 %v4991_v5, %v1129_v22  ;;  %v5045_v22 = vld [vmem:[%s7107_s1 + $0xc0] sm:$0xff] }
  0xff   :  { %v4967_v3 = vpop.permute.xlu0 %1006 }
 0x100   :  { %7383 = vst [vmem:[#allocation38_spill] sm:$0xff] %v4967_v3  ;;  %v1133_v55 = vpop.permute.xlu1 %1132 }
 0x101   :  { %1272 = vrot.lane.b32.xlu1 %v1204_v34, %s3587_s25  ;;  %v1214_v20 = vsub.f32 %v5000_v29, %v1133_v55 }
 0x103   :  { %v4976_v39 = vpop.permute.xlu0 %1010 }
 0x104   :  { %7384 = vst [vmem:[#allocation40_spill] sm:$0xff] %v4976_v39  ;;  %v1137_v62 = vpop.permute.xlu1 %1136 }
 0x105   :  { %1276 = vrot.lane.b32.xlu1 %v1206_v63, %s3587_s25  ;;  %v1216_v9 = vsub.f32 %v5009_v51, %v1137_v62 }
 0x107   :  { %v4985_v54 = vpop.permute.xlu0 %1014 }
 0x108   :  { %7385 = vst [vmem:[#allocation41_spill] sm:$0xff] %v4985_v54  ;;  %v1141_v17 = vpop.permute.xlu1 %1140 }
 0x109   :  { %1280 = vrot.lane.b32.xlu1 %v1208_v4, %s3587_s25  ;;  %v1218_v56 = vsub.f32 %v5018_v1, %v1141_v17  ;;  %v5051_v4 = vld [vmem:[%s7107_s1 + $0x8] sm:$0xff]  ;;  %v5059_v17 = vld [vmem:[%s7107_s1 + $0xd0] sm:$0xff] }
 0x10b   :  { %v4994_v47 = vpop.permute.xlu0 %1018 }
 0x10c   :  { %7386 = vst [vmem:[#allocation39_spill] sm:$0xff] %v4994_v47  ;;  %v1145_v37 = vpop.permute.xlu1 %1144 }
 0x10d   :  { %1284 = vrot.lane.b32.xlu1 %v1210_v10, %s3587_s25  ;;  %v1220_v59 = vsub.f32 %v5027_v19, %v1145_v37 }
 0x10f   :  { %v5003_v21 = vpop.permute.xlu0 %1022 }
 0x110   :  { %7387 = vst [vmem:[#allocation42_spill] sm:$0xff] %v5003_v21  ;;  %v1149_v23 = vpop.permute.xlu1 %1148 }
 0x111   :  { %1288 = vrot.lane.b32.xlu1 %v1212_v53, %s3587_s25  ;;  %v1222_v38 = vsub.f32 %v5036_v28, %v1149_v23  ;;  %v5073_v23 = vld [vmem:[%s7107_s1 + $0xe0] sm:$0xff] }
 0x113   :  { %v5012_v0 = vpop.permute.xlu0 %1026 }
 0x114   :  { %7388 = vst [vmem:[#allocation43_spill] sm:$0xff] %v5012_v0  ;;  %v1153_v13 = vpop.permute.xlu1 %1152 }
 0x115   :  { %1292 = vrot.lane.b32.xlu1 %v1214_v20, %s3587_s25  ;;  %v1224_v63 = vsub.f32 %v5045_v22, %v1153_v13  ;;  %v5065_v20 = vld [vmem:[%s7107_s1 + $0x18] sm:$0xff] }
 0x117   :  { %v5021_v40 = vpop.permute.xlu0 %1030 }
 0x118   :  { %7389 = vst [vmem:[#allocation46_spill] sm:$0xff] %v5021_v40  ;;  %v1157_v34 = vpop.permute.xlu1 %1156  ;;  %s3162_s15 = spop %3161 }
 0x119   :  { %1296 = vrot.lane.b32.xlu1 %v1216_v9, %s3587_s25  ;;  %v1226_v53 = vsub.f32 %v5059_v17, %v1157_v34 }
 0x11b   :  { %v5030_v18 = vpop.permute.xlu0 %1034 }
 0x11c   :  { %7390 = vst [vmem:[#allocation44_spill] sm:$0xff] %v5030_v18  ;;  %v1161_v10 = vpop.permute.xlu1 %1160  ;;  %v7393_v18 = vmov 0.0  }
 0x11d   :  { %1300 = vrot.lane.b32.xlu1 %v1218_v56, %s3587_s25  ;;  %v1228_v56 = vsub.f32 %v5073_v23, %v1161_v10  ;;  %v5093_v10 = vld [vmem:[%s7107_s1 + $0x38] sm:$0xff] }
 0x11f   :  { %v5039_v57 = vpop.permute.xlu0 %1038 }
 0x120   :  { %7391 = vst [vmem:[#allocation45_spill] sm:$0xff] %v5039_v57 }
 0x121   :  { %1304 = vrot.lane.b32.xlu1 %v1220_v59, %s3587_s25  ;;  %v1165_v59 = vpop.permute.xlu1 %1164 }
 0x123   :  { %v1107_v55 = vpop.permute.xlu0 %1106 }
 0x124   :  { %v1201_v62 = vsub.f32 %v5051_v4, %v1107_v55 }
 0x125   :  { %1308 = vrot.lane.b32.xlu1 %v1222_v38, %s3587_s25  ;;  %v5079_v38 = vld [vmem:[%s7107_s1 + $0x28] sm:$0xff] }
 0x126   :  { %1266 = vrot.lane.b32.xlu0 %v1201_v62, %s3587_s25 }
 0x127   :  { %v1111_v37 = vpop.permute.xlu0 %1110 }
 0x128   :  { %v1203_v9 = vsub.f32 %v5065_v20, %v1111_v37 }
 0x129   :  { %1312 = vrot.lane.b32.xlu1 %v1224_v63, %s3587_s25  ;;  %v5087_v63 = vld [vmem:[%s7107_s1 + $0xf0] sm:$0xff] }
 0x12a   :  { %1270 = vrot.lane.b32.xlu0 %v1203_v9, %s3587_s25  ;;  %v1230_v55 = vsub.f32 %v5087_v63, %v1165_v59  ;;  %v1794_v9 = vld [vmem:[%s7113_s7 + $0x8] sm:$0xff] }
 0x12b   :  { %v1115_v13 = vpop.permute.xlu0 %1114  ;;  %vm1826_vm10 = vcmp.ge.s32.totalorder %v1794_v9, 0 }
 0x12c   :  { %v1205_v34 = vsub.f32 %v5079_v38, %v1115_v13  ;;  %v3114_v40 = vsel %vm1826_vm10, 1.0, %v7393_v18 }
 0x12d   :  { %1316 = vrot.lane.b32.xlu1 %v1226_v53, %s3587_s25  ;;  %v1874_v47 = vsel %vm7233_vm0, %v3114_v40, 0.0 }
 0x12e   :  { %1274 = vrot.lane.b32.xlu0 %v1205_v34, %s3587_s25  ;;  %v1795_v34 = vld [vmem:[%s7113_s7 + $0x10] sm:$0xff] }
 0x12f   :  { %v1119_v62 = vpop.permute.xlu0 %1118  ;;  %vm1827_vm11 = vcmp.ge.s32.totalorder %v1795_v34, 0 }
 0x130   :  { %v1207_v53 = vsub.f32 %v5093_v10, %v1119_v62 }
 0x131   :  { %1320 = vrot.lane.b32.xlu1 %v1228_v56, %s3587_s25  ;;  %v5104_v56 = vld [vmem:[%s7107_s1 + $0x48] sm:$0xff] }
 0x132   :  { %1278 = vrot.lane.b32.xlu0 %v1207_v53, %s3587_s25  ;;  %v5120_v53 = vld [vmem:[%s7113_s7] sm:$0xff] }
 0x133   :  { %v1123_v37 = vpop.permute.xlu0 %1122  ;;  %vm1825_vm5 = vcmp.ge.s32.totalorder %v5120_v53, 0 }
 0x134   :  { %v1209_v13 = vsub.f32 %v5104_v56, %v1123_v37 }
 0x135   :  { %1324 = vrot.lane.b32.xlu1 %v1230_v55, %s3587_s25  ;;  %v5114_v55 = vld [vmem:[%s7107_s1 + $0x58] sm:$0xff] }
 0x136   :  { %1282 = vrot.lane.b32.xlu0 %v1209_v13, %s3587_s25  ;;  %v1797_v13 = vld [vmem:[%s7113_s7 + $0x20] sm:$0xff] }
 0x137   :  { %v1127_v59 = vpop.permute.xlu0 %1126  ;;  %vm1829_vm13 = vcmp.ge.s32.totalorder %v1797_v13, 0 }
 0x138   :  { %v1211_v62 = vsub.f32 %v5114_v55, %v1127_v59  ;;  %v5130_v59 = vld [vmem:[%s7107_s1 + $0x68] sm:$0xff] }
 0x139   :  { %1953 = vperm.xlu1 %3195, %v1794_v9   ;;  %7392 = vst [vmem:[#allocation47_spill] sm:$0xff] %v5130_v59  ;;  %v5139_v9 = vld [vmem:[%s7107_s1 + $0x78] sm:$0xff] }
 0x13a   :  { %1286 = vrot.lane.b32.xlu0 %v1211_v62, %s3587_s25  ;;  %v3113_v62 = vsel %vm1825_vm5, 1.0, %v7393_v18  ;;  %7394 = vst [vmem:[#allocation48_spill] sm:$0xff] %v5139_v9 }
 0x13b   :  { %v1131_v37 = vpop.permute.xlu0 %1130 }
 0x13c   :  { %v1213_v57 = vsub.f32 %v5130_v59, %v1131_v37  ;;  %v5145_v37 = vld [vmem:[%s7113_s7 + $0x18] sm:$0xff] }
 0x13d   :  { %1956 = vperm.xlu1 %3195, %v1795_v34   ;;  %v3115_v34 = vsel %vm1827_vm11, 1.0, %v7393_v18  ;;  %vm1828_vm12 = vcmp.ge.s32.totalorder %v5145_v37, 0 }
 0x13e   :  { %1290 = vrot.lane.b32.xlu0 %v1213_v57, %s3587_s25  ;;  %v1873_v57 = vsel %vm7233_vm0, %v3113_v62, 0.0  ;;  %v1876_v3 = vsel %vm7233_vm0, %v3115_v34, 0.0  ;;  %v3116_v40 = vsel %vm1828_vm12, 1.0, %v7393_v18  ;;  %v5164_v62 = vld [vmem:[%s7107_s1 + $0x98] sm:$0xff] }
 0x13f   :  { %v1135_v0 = vpop.permute.xlu0 %1134  ;;  %7396 = vst [vmem:[#allocation50_spill] sm:$0xff] %v5164_v62 }
 0x140   :  { %v1215_v21 = vsub.f32 %v5139_v9, %v1135_v0  ;;  %v5155_v0 = vld [vmem:[%s7107_s1 + $0x88] sm:$0xff]  ;;  %v1875_v9 = vadd.f32 %v1874_v47, %v1873_v57  ;;  %v1878_v47 = vsel %vm7233_vm0, %v3116_v40, 0.0 }
 0x141   :  { %1962 = vperm.xlu1 %3195, %v1797_v13   ;;  %7395 = vst [vmem:[#allocation49_spill] sm:$0xff] %v5155_v0  ;;  %v5179_v57 = vld [vmem:[%s7107_s1 + $0xa8] sm:$0xff] }
 0x142   :  { %1294 = vrot.lane.b32.xlu0 %v1215_v21, %s3587_s25  ;;  %v1877_v41 = vadd.f32 %v1876_v3, %v1875_v9  ;;  %7397 = vst [vmem:[#allocation51_spill] sm:$0xff] %v5179_v57  ;;  %v1799_v9 = vld [vmem:[%s7113_s7 + $0x30] sm:$0xff] }
 0x143   :  { %v1139_v54 = vpop.permute.xlu0 %1138  ;;  %vm1831_vm15 = vcmp.ge.s32.totalorder %v1799_v9, 0  ;;  %v5206_v9 = vld [vmem:[%s7107_s1 + $0xc8] sm:$0xff] }
 0x144   :  { %v1217_v39 = vsub.f32 %v5155_v0, %v1139_v54  ;;  %v5170_v54 = vld [vmem:[%s7113_s7 + $0x28] sm:$0xff]  ;;  %v1879_v34 = vadd.f32 %v1878_v47, %v1877_v41  ;;  %7400 = vst [vmem:[#allocation55_spill] sm:$0xff] %v5206_v9 }
 0x145   :  { %vm1830_vm14 = vcmp.ge.s32.totalorder %v5170_v54, 0 }
 0x146   :  { %1298 = vrot.lane.b32.xlu0 %v1217_v39, %s3587_s25  ;;  %v3117_v39 = vsel %vm1829_vm13, 1.0, %v7393_v18 }
 0x147   :  { %v1143_v21 = vpop.permute.xlu0 %1142  ;;  %v1880_v40 = vsel %vm7233_vm0, %v3117_v39, 0.0  ;;  %v3119_v39 = vsel %vm1831_vm15, 1.0, %v7393_v18 }
 0x148   :  { %v1219_v59 = vsub.f32 %v5164_v62, %v1143_v21  ;;  %v5191_v62 = vld [vmem:[%s7107_s1 + $0xb8] sm:$0xff]  ;;  %v1881_v41 = vadd.f32 %v1880_v40, %v1879_v34  ;;  %v1801_v34 = vld [vmem:[%s7113_s7 + $0x40] sm:$0xff] }
 0x149   :  { %7398 = vst [vmem:[#allocation53_spill] sm:$0xff] %v5191_v62  ;;  %vm1833_vm2 = vcmp.ge.s32.totalorder %v1801_v34, 0 }
 0x14a   :  { %1302 = vrot.lane.b32.xlu0 %v1219_v59, %s3587_s25  ;;  %v3118_v59 = vsel %vm1830_vm14, 1.0, %v7393_v18 }
 0x14b   :  { %v1147_v13 = vpop.permute.xlu0 %1146  ;;  %v1882_v47 = vsel %vm7233_vm0, %v3118_v59, 0.0  ;;  %v1884_v59 = vsel %vm7233_vm0, %v3119_v39, 0.0 }
 0x14c   :  { %v1221_v3 = vsub.f32 %v5179_v57, %v1147_v13  ;;  %v5197_v57 = vld [vmem:[%s7113_s7 + $0x38] sm:$0xff]  ;;  %v1883_v40 = vadd.f32 %v1882_v47, %v1881_v41  ;;  %v3121_v41 = vsel %vm1833_vm2, 1.0, %v7393_v18 }
 0x14d   :  { %7399 = vst [vmem:[#allocation54_spill] sm:$0xff] %v5197_v57  ;;  %vm1832_vm1 = vcmp.ge.s32.totalorder %v5197_v57, 0 }
 0x14e   :  { %1306 = vrot.lane.b32.xlu0 %v1221_v3, %s3587_s25  ;;  %v1885_v0 = vadd.f32 %v1884_v59, %v1883_v40 }
 0x14f   :  { %v1151_v21 = vpop.permute.xlu0 %1150 }
 0x150   :  { %v1223_v13 = vsub.f32 %v5191_v62, %v1151_v21 }
 0x152   :  { %1310 = vrot.lane.b32.xlu0 %v1223_v13, %s3587_s25  ;;  %v3120_v13 = vsel %vm1832_vm1, 1.0, %v7393_v18 }
 0x153   :  { %v1155_v3 = vpop.permute.xlu0 %1154 }
 0x154   :  { %v1225_v21 = vsub.f32 %v5206_v9, %v1155_v3  ;;  %v5219_v3 = vld [vmem:[%s7113_s7 + $0x48] sm:$0xff]  ;;  %v1886_v9 = vsel %vm7233_vm0, %v3120_v13, 0.0  ;;  %v1805_v13 = vld [vmem:[%s7113_s7 + $0x60] sm:$0xff] }
 0x155   :  { %7401 = vst [vmem:[#allocation56_spill] sm:$0xff] %v5219_v3  ;;  %vm1834_vm3 = vcmp.ge.s32.totalorder %v5219_v3, 0  ;;  %vm1837_vm7 = vcmp.ge.s32.totalorder %v1805_v13, 0 }
 0x156   :  { %1314 = vrot.lane.b32.xlu0 %v1225_v21, %s3587_s25  ;;  %v1887_v21 = vadd.f32 %v1886_v9, %v1885_v0  ;;  %v3122_v40 = vsel %vm1834_vm3, 1.0, %v7393_v18 }
 0x157   :  { %v1159_v62 = vpop.permute.xlu0 %1158  ;;  %v1890_v0 = vsel %vm7233_vm0, %v3122_v40, 0.0 }
 0x158   :  { %v1227_v57 = vsub.f32 %v7378_v48, %v1159_v62  ;;  %v1803_v48 = vld [vmem:[%s7113_s7 + $0x50] sm:$0xff]  ;;  %v1888_v62 = vsel %vm7233_vm0, %v3121_v41, 0.0 }
 0x159   :  { %vm1835_vm4 = vcmp.ge.s32.totalorder %v1803_v48, 0  ;;  %v1889_v59 = vadd.f32 %v1888_v62, %v1887_v21  ;;  %v3125_v62 = vsel %vm1837_vm7, 1.0, %v7393_v18 }
 0x15a   :  { %1318 = vrot.lane.b32.xlu0 %v1227_v57, %s3587_s25  ;;  %v3123_v9 = vsel %vm1835_vm4, 1.0, %v7393_v18 }
 0x15b   :  { %v1163_v47 = vpop.permute.xlu0 %1162  ;;  %v1891_v41 = vadd.f32 %v1890_v0, %v1889_v59 }
 0x15c   :  { %v1229_v39 = vsub.f32 %v4533_v26, %v1163_v47  ;;  %v1804_v26 = vld [vmem:[%s7113_s7 + $0x58] sm:$0xff] }
 0x15d   :  { %vm1836_vm6 = vcmp.ge.s32.totalorder %v1804_v26, 0  ;;  %v1808_v26 = vld [vmem:[%s7113_s7 + $0x78] sm:$0xff] }
 0x15e   :  { %1322 = vrot.lane.b32.xlu0 %v1229_v39, %s3587_s25  ;;  %v3124_v47 = vsel %vm1836_vm6, 1.0, %v7393_v18  ;;  %v1806_v39 = vld [vmem:[%s7113_s7 + $0x68] sm:$0xff]  ;;  %vm1840_vm5 = vcmp.ge.s32.totalorder %v1808_v26, 0 }
 0x15f   :  { %v1167_v34 = vpop.permute.xlu0 %1166  ;;  %v1894_v48 = vsel %vm7233_vm0, %v3124_v47, 0.0  ;;  %vm1838_vm8 = vcmp.ge.s32.totalorder %v1806_v39, 0 }
 0x160   :  { %v1231_v57 = vsub.f32 %v4564_v45, %v1167_v34  ;;  %v1892_v45 = vsel %vm7233_vm0, %v3123_v9, 0.0  ;;  %v1807_v34 = vld [vmem:[%s7113_s7 + $0x70] sm:$0xff]  ;;  %v3126_v59 = vsel %vm1838_vm8, 1.0, %v7393_v18 }
 0x161   :  { %v1893_v21 = vadd.f32 %v1892_v45, %v1891_v41  ;;  %vm1839_vm9 = vcmp.ge.s32.totalorder %v1807_v34, 0  ;;  %v1898_v9 = vsel %vm7233_vm0, %v3126_v59, 0.0  ;;  %v3128_v34 = vsel %vm1840_vm5, 1.0, %v7393_v18 }
 0x162   :  { %1326 = vrot.lane.b32.xlu0 %v1231_v57, %s3587_s25  ;;  %v1896_v57 = vsel %vm7233_vm0, %v3125_v62, 0.0  ;;  %v3127_v41 = vsel %vm1839_vm9, 1.0, %v7393_v18  ;;  %v5412_v18 = vld [vmem:[%s7107_s1 + $0xe8] sm:$0xff] }
 0x163   :  { %v1895_v40 = vadd.f32 %v1894_v48, %v1893_v21  ;;  %v1900_v21 = vsel %vm7233_vm0, %v3127_v41, 0.0  ;;  %v3512_v48 = vld [vmem:[%s7109_s3] sm:$0xff]  ;;  %v1074_v41 = vsub.f32 %v4946_v11, %v4834_v2 }
 0x164   :  { %vm912_vm10 = vcmp.eq.s32.totalorder %v3512_v48, 1 }
 0x165   :  { %v1897_v0 = vadd.f32 %v1896_v57, %v1895_v40  ;;  %v1072_v40 = vsub.f32 %v4937_v43, %v4765_v32  ;;  %v3514_v32 = vld [vmem:[%s7109_s3 + $0x20] sm:$0xff] }
 0x166   :  { %vm916_vm12 = vcmp.eq.s32.totalorder %v3514_v32, 1 }
 0x167   :  { %v1899_v47 = vadd.f32 %v1898_v9, %v1897_v0  ;;  %v1902_v0 = vsel %vm7233_vm0, %v3128_v34, 0.0  ;;  %v3513_v9 = vld [vmem:[%s7109_s3 + $0x10] sm:$0xff] }
 0x168   :  { %vm914_vm11 = vcmp.eq.s32.totalorder %v3513_v9, 1  ;;  %v3516_v9 = vld [vmem:[%s7109_s3 + $0x40] sm:$0xff] }
 0x169   :  { %v1901_v59 = vadd.f32 %v1900_v21, %v1899_v47  ;;  %v1076_v47 = vsub.f32 %v4955_v42, %v4898_v52  ;;  %vm920_vm14 = vcmp.eq.s32.totalorder %v3516_v9, 1 }
 0x16b   :  { %v1903_v43 = vadd.f32 %v1902_v0, %v1901_v59 }
 0x175   :  { %v872_v13 = vpop.xlane.xlu1 %871 }
 0x176   :  { %v873_v45 = vrot.slane %v872_v13, 4 }
 0x178   :  { %v874_v39 = vadd.f32 %v873_v45, %v872_v13 }
 0x179   :  { %v1265_v62 = vpop.permute.xlu1 %1264 }
 0x17a   :  { %v875_v57 = vrot.slane %v874_v39, 2  ;;  %v5266_v3 = vsel %vm912_vm10, %v1072_v40, %v1265_v62  ;;  %v3515_v40 = vld [vmem:[%s7109_s3 + $0x30] sm:$0xff]  ;;  %vm2653_vm10 = vcmask 171008  }
 0x17b   :  { %v1424_v48 = vand.u32 2147483647, %v5266_v3  ;;  %vm918_vm13 = vcmp.eq.s32.totalorder %v3515_v40, 1  ;;  %v3518_v40 = vld [vmem:[%s7109_s3 + $0x60] sm:$0xff] }
 0x17c   :  { %v876_v26 = vadd.f32 %v875_v57, %v874_v39  ;;  %v1078_v57 = vsub.f32 %v4964_v14, %v4924_v31  ;;  %vm924_vm1 = vcmp.eq.s32.totalorder %v3518_v40, 1 }
 0x17d   :  { %v1269_v13 = vpop.permute.xlu1 %1268  ;;  %v1456_v2 = vsub.f32 0.0, %v1424_v48 }
 0x17e   :  { %v877_v45 = vrot.slane %v876_v26, 1  ;;  %v5280_v39 = vsel %vm914_vm11, %v1074_v41, %v1269_v13  ;;  %v1080_v13 = vsub.f32 %v4973_v16, %v4930_v27 }
 0x17f   :  { %v1426_v11 = vand.u32 2147483647, %v5280_v39 }
 0x180   :  { %v878_v21 = vadd.f32 %v877_v45, %v876_v26  ;;  %v1488_v26 = vmul.f32 1.442695, %v1456_v2 }
 0x181   :  { %v1273_v62 = vpop.permute.xlu1 %1272  ;;  %1904 = vadd.xlane.f32.xlu0 %v1903_v43  ;;  %v1458_v0 = vsub.f32 0.0, %v1426_v11  ;;  %v3517_v43 = vld [vmem:[%s7109_s3 + $0x50] sm:$0xff] }
 0x182   :  { %v5282_v34 = vsel %vm916_vm12, %v1076_v47, %v1273_v62  ;;  %3163 = vpush %v878_v21  ;;  %3285 = vpow2.f32 %v1488_v26  ;;  %vm922_vm15 = vcmp.eq.s32.totalorder %v3517_v43, 1  ;;  %v1082_v47 = vsub.f32 %v4982_v24, %v4932_v50 }
 0x183   :  { %v1428_v52 = vand.u32 2147483647, %v5282_v34  ;;  %v1492_v14 = vmul.f32 1.442695, %v1458_v0 }
 0x185   :  { %v1277_v42 = vpop.permute.xlu1 %1276  ;;  %v1460_v45 = vsub.f32 0.0, %v1428_v52  ;;  %3287 = vpow2.f32 %v1492_v14  ;;  %v1084_v52 = vsub.f32 %v4991_v5, %v4949_v60  ;;  %v1086_v60 = vsub.f32 %v5000_v29, %v4754_v49  ;;  %v3519_v5 = vld [vmem:[%s7109_s3 + $0x8] sm:$0xff]  ;;  %v5405_v29 = vld [vmem:[%s7107_s1 + $0xd8] sm:$0xff] }
 0x186   :  { %v5291_v59 = vsel %vm918_vm13, %v1078_v57, %v1277_v42  ;;  %vm913_vm2 = vcmp.eq.s32.totalorder %v3519_v5, 1  ;;  %v7403_v5 = vld [vmem:[#allocation47_spill] sm:$0xff] }
 0x187   :  { %v1430_v41 = vand.u32 2147483647, %v5291_v59  ;;  %v1496_v21 = vmul.f32 1.442695, %v1460_v45  ;;  %7419 = vst [vmem:[#allocation47_spill] sm:$0xff] %v5412_v18 }
 0x189   :  { %v1281_v48 = vpop.permute.xlu1 %1280  ;;  %v1462_v32 = vsub.f32 0.0, %v1430_v41  ;;  %3289 = vpow2.f32 %v1496_v21  ;;  %v1073_v41 = vsub.f32 %v5051_v4, %v4805_v33 }
 0x18a   :  { %v5299_v31 = vsel %vm920_vm14, %v1080_v13, %v1281_v48 }
 0x18b   :  { %v1432_v27 = vand.u32 2147483647, %v5299_v31  ;;  %v1500_v2 = vmul.f32 1.442695, %v1462_v32  ;;  %v1088_v32 = vsub.f32 %v5009_v51, %v4781_v61  ;;  %v3520_v61 = vld [vmem:[%s7109_s3 + $0x70] sm:$0xff] }
 0x18c   :  { %v3286_v42 = vpop.eup %3285  ;;  %vm926_vm3 = vcmp.eq.s32.totalorder %v3520_v61, 1 }
 0x18d   :  { %v1285_v16 = vpop.permute.xlu1 %1284  ;;  %v1464_v11 = vsub.f32 0.0, %v1432_v27  ;;  %3291 = vpow2.f32 %v1500_v2  ;;  %v1552_v45 = vadd.f32 1.0, %v3286_v42 }
 0x18e   :  { %v5307_v62 = vsel %vm922_vm15, %v1082_v47, %v1285_v16  ;;  %v3521_v16 = vld [vmem:[%s7109_s3 + $0x80] sm:$0xff] }
 0x18f   :  { %v1434_v50 = vand.u32 2147483647, %v5307_v62  ;;  %v1504_v26 = vmul.f32 1.442695, %v1464_v11  ;;  %v3288_v48 = vpop.eup %3287  ;;  %vm928_vm4 = vcmp.eq.s32.totalorder %v3521_v16, 1  ;;  %v1075_v11 = vsub.f32 %v5065_v20, %v4878_v12 }
 0x190   :  { %v1554_v27 = vadd.f32 1.0, %v3288_v48 }
 0x191   :  { %v1289_v57 = vpop.permute.xlu1 %1288  ;;  %v1466_v9 = vsub.f32 0.0, %v1434_v50  ;;  %3293 = vpow2.f32 %v1504_v26 }
 0x192   :  { %v5315_v24 = vsel %vm924_vm1, %v1084_v52, %v1289_v57  ;;  %3295 = vlog2.f32 %v1552_v45  ;;  %v3522_v52 = vld [vmem:[%s7109_s3 + $0x18] sm:$0xff]  ;;  %v7407_v57 = vld [vmem:[#allocation49_spill] sm:$0xff] }
 0x193   :  { %v1436_v13 = vand.u32 2147483647, %v5315_v24  ;;  %v1508_v43 = vmul.f32 1.442695, %v1466_v9  ;;  %v3290_v49 = vpop.eup %3289  ;;  %vm915_vm6 = vcmp.eq.s32.totalorder %v3522_v52, 1  ;;  %v1077_v9 = vsub.f32 %v5079_v38, %v4914_v25 }
 0x194   :  { %v1556_v42 = vadd.f32 1.0, %v3290_v49  ;;  %v1398_v52 = vmax.f32 %v5291_v59, 0.0 }
 0x195   :  { %v1293_v0 = vpop.permute.xlu1 %1292  ;;  %v1468_v21 = vsub.f32 0.0, %v1436_v13  ;;  %3297 = vpow2.f32 %v1508_v43 }
 0x196   :  { %v5358_v26 = vsel %vm926_vm3, %v1086_v60, %v1293_v0  ;;  %3299 = vlog2.f32 %v1554_v27  ;;  %v7402_v60 = vld [vmem:[#allocation37_spill] sm:$0xff] }
 0x197   :  { %1950 = vperm.xlu0 %3189, %v5120_v53   ;;  %v3292_v50 = vpop.eup %3291  ;;  %v1512_v13 = vmul.f32 1.442695, %v1468_v21  ;;  %v1438_v25 = vand.u32 2147483647, %v5358_v26  ;;  %v7405_v21 = vld [vmem:[#allocation48_spill] sm:$0xff]  ;;  %3301 = vlog2.f32 %v1556_v42  ;;  %7417 = vst [vmem:[#allocation37_spill] sm:$0xff] %v5405_v29 }
 0x198   :  { %v1267_v47 = vpop.permute.xlu0 %1266  ;;  %v5437_v29 = vld [vmem:[%s7107_s1 + $0xf8] sm:$0xff] }
 0x199   :  { %v1297_v51 = vpop.permute.xlu1 %1296  ;;  %v5345_v2 = vsel %vm913_vm2, %v1073_v41, %v1267_v47  ;;  %v1558_v47 = vadd.f32 1.0, %v3292_v50  ;;  %3303 = vpow2.f32 %v1512_v13  ;;  %v1470_v0 = vsub.f32 0.0, %v1438_v25  ;;  %v3524_v13 = vld [vmem:[%s7109_s3 + $0x90] sm:$0xff]  ;;  %7423 = vst [vmem:[#allocation48_spill] sm:$0xff] %v5437_v29 }
 0x19a   :  { %v1425_v12 = vand.u32 2147483647, %v5345_v2  ;;  %v5366_v41 = vsel %vm928_vm4, %v1088_v32, %v1297_v51  ;;  %v7404_v32 = vld [vmem:[#allocation38_spill] sm:$0xff]  ;;  %vm930_vm8 = vcmp.eq.s32.totalorder %v3524_v13, 1  ;;  %v7427_v50 = vsub.f32 %v5093_v10, %v4928_v35 }
 0x19b   :  { %1959 = vperm.xlu0 %3189, %v5145_v37   ;;  %v1440_v51 = vand.u32 2147483647, %v5366_v41  ;;  %v7406_v37 = vld [vmem:[#allocation40_spill] sm:$0xff]  ;;  %v1516_v61 = vmul.f32 1.442695, %v1470_v0  ;;  %v5494_v35 = vld [vmem:[%s7111_s5 + $0x28] sm:$0xff] }
 0x19c   :  { %v1271_v20 = vpop.permute.xlu0 %1270  ;;  %v1457_v48 = vsub.f32 0.0, %v1425_v12  ;;  %v3294_v12 = vpop.eup %3293 }
 0x19d   :  { %v1301_v38 = vpop.permute.xlu1 %1300  ;;  %v5376_v49 = vsel %vm915_vm6, %v1075_v11, %v1271_v20  ;;  %v3296_v4 = vpop.eup %3295  ;;  %v1560_v42 = vadd.f32 1.0, %v3294_v12  ;;  %v1472_v45 = vsub.f32 0.0, %v1440_v51  ;;  %v5425_v12 = vld [vmem:[%s7111_s5] sm:$0xff]  ;;  %v7422_v51 = vsub.f32 %v5018_v1, %v4801_v46  ;;  %v7425_v1 = vld [vmem:[#allocation56_spill] sm:$0xff] }
 0x19e   :  { %v1490_v27 = vmul.f32 1.442695, %v1457_v48  ;;  %v1427_v53 = vand.u32 2147483647, %v5376_v49  ;;  %7421 = vst [vmem:[#allocation38_spill] sm:$0xff] %v5425_v12  ;;  %v1396_v11 = vmax.f32 %v5282_v34, 0.0 }
 0x19f   :  { %1965 = vperm.xlu0 %3189, %v5170_v54   ;;  %v3523_v54 = vld [vmem:[%s7109_s3 + $0x28] sm:$0xff]  ;;  %v3298_v25 = vpop.eup %3297  ;;  %v1585_v20 = vmul.f32 0.6931472, %v3296_v4  ;;  %v1520_v13 = vmul.f32 1.442695, %v1472_v45 }
 0x1a0   :  { %v1275_v16 = vpop.permute.xlu0 %1274  ;;  %vm917_vm7 = vcmp.eq.s32.totalorder %v3523_v54, 1  ;;  %3305 = vpow2.f32 %v1490_v27  ;;  %v7416_v54 = vld [vmem:[#allocation54_spill] sm:$0xff]  ;;  %v1459_v33 = vsub.f32 0.0, %v1427_v53  ;;  %v3527_v53 = vld [vmem:[%s7109_s3 + $0xa0] sm:$0xff] }
 0x1a1   :  { %3307 = vlog2.f32 %v1558_v47  ;;  %v5400_v48 = vsel %vm917_vm7, %v1077_v9, %v1275_v16  ;;  %vm932_vm9 = vcmp.eq.s32.totalorder %v3527_v53, 1  ;;  %v1305_v9 = vpop.permute.xlu1 %1304  ;;  %v3528_v16 = vld [vmem:[%s7109_s3 + $0x38] sm:$0xff]  ;;  %v1392_v47 = vmax.f32 %v5266_v3, 0.0  ;;  %v5444_v3 = vld [vmem:[%s7109_s3 + $0xb0] sm:$0xff]  ;;  %v5453_v4 = vld [vmem:[%s7109_s3 + $0x48] sm:$0xff]  ;;  %7429 = vst [vmem:[#allocation54_spill] sm:$0xff] %v5494_v35 }
 0x1a2   :  { %vm919_vm5 = vcmp.eq.s32.totalorder %v3528_v16, 1  ;;  %v1494_v18 = vmul.f32 1.442695, %v1459_v33  ;;  %vm934_vm11 = vcmp.eq.s32.totalorder %v5444_v3, 1  ;;  %v1429_v46 = vand.u32 2147483647, %v5400_v48  ;;  %v3300_v33 = vpop.eup %3299 }
 0x1a3   :  { %1971 = vperm.xlu0 %3189, %v7416_v54   ;;  %v5432_v54 = vsel %vm930_vm8, %v7422_v51, %v1301_v38  ;;  %v1394_v38 = vmax.f32 %v5280_v39, 0.0  ;;  %3309 = vlog2.f32 %v1560_v42  ;;  %vm921_vm12 = vcmp.eq.s32.totalorder %v5453_v4, 1  ;;  %v5471_v42 = vld [vmem:[%s7109_s3 + $0xc0] sm:$0xff]  ;;  %v3302_v29 = vpop.eup %3301 }
 0x1a4   :  { %v1279_v27 = vpop.permute.xlu0 %1278  ;;  %v5460_v51 = vsel %vm2653_vm10, %v5425_v12, -inf  ;;  %v1562_v39 = vadd.f32 1.0, %v3298_v25  ;;  %v1442_v45 = vand.u32 2147483647, %v5432_v54  ;;  %vm936_vm13 = vcmp.eq.s32.totalorder %v5471_v42, 1  ;;  %v5487_v25 = vld [vmem:[%s7111_s5 + $0x18] sm:$0xff]  ;;  %v3304_v10 = vpop.eup %3303 }
 0x1a5   :  { %v5478_v12 = vsel %vm919_vm5, %v7427_v50, %v1279_v27  ;;  %7428 = vst [vmem:[#allocation49_spill] sm:$0xff] %v5487_v25  ;;  %3311 = vpow2.f32 %v1494_v18  ;;  %v1461_v40 = vsub.f32 0.0, %v1429_v46  ;;  %v1648_v50 = vadd.f32 %v1585_v20, %v1392_v47  ;;  %v1309_v34 = vpop.permute.xlu1 %1308 }
 0x1a6   :  { %v1589_v27 = vmul.f32 0.6931472, %v3300_v33  ;;  %3313 = vpow2.f32 %v1516_v61  ;;  %v7430_v16 = vsub.f32 %v5027_v19, %v4825_v15  ;;  %v1431_v59 = vand.u32 2147483647, %v5478_v12 }
 0x1a7   :  { %1977 = vperm.xlu0 %3189, %v7425_v1   ;;  %v5465_v1 = vld [vmem:[%s7111_s5 + $0x10] sm:$0xff]  ;;  %3315 = vpow2.f32 %v1520_v13  ;;  %v1498_v18 = vmul.f32 1.442695, %v1461_v40  ;;  %v5507_v44 = vsel %vm2653_vm10, %v5487_v25, -inf  ;;  %v1593_v61 = vmul.f32 0.6931472, %v3302_v29 }
 0x1a8   :  { %v5456_v0 = vpop.permute.xlu0 %1282  ;;  %7426 = vst [vmem:[#allocation40_spill] sm:$0xff] %v5465_v1  ;;  %v5482_v14 = vsel %vm2653_vm10, %v5465_v1, -inf  ;;  %v5500_v1 = vsel %vm932_vm9, %v7430_v16, %v1305_v9  ;;  %3317 = vlog2.f32 %v1562_v39  ;;  %v1474_v47 = vsub.f32 0.0, %v1442_v45  ;;  %v7432_v9 = vld [vmem:[#allocation7_spill] sm:$0xff]  ;;  %v5519_v29 = vld [vmem:[%s7109_s3 + $0x58] sm:$0xff] }
 0x1a9   :  { %7431 = vst [vmem:[#allocation56_spill] sm:$0xff] %v5500_v1  ;;  %v5511_v15 = vsel %vm2653_vm10, %v5494_v35, -inf  ;;  %v1444_v40 = vand.u32 2147483647, %v5500_v1  ;;  %3319 = vpow2.f32 %v1498_v18  ;;  %v1680_v33 = vmul.f32 %v7432_v9, %v1648_v50 }
 0x1aa   :  { %v3306_v43 = vpop.eup %3305  ;;  %v1650_v13 = vadd.f32 %v1589_v27, %v1394_v38  ;;  %v1564_v16 = vadd.f32 1.0, %v3304_v10  ;;  %v1463_v25 = vsub.f32 0.0, %v1431_v59  ;;  %vm923_vm14 = vcmp.eq.s32.totalorder %v5519_v29, 1  ;;  %v1313_v27 = vpop.permute.xlu1 %1312  ;;  %v5531_v59 = vld [vmem:[%s7109_s3 + $0x68] sm:$0xff] }
 0x1ab   :  { %v3308_v20 = vpop.eup %3307  ;;  %v1553_v53 = vadd.f32 1.0, %v3306_v43  ;;  %v1652_v18 = vadd.f32 %v1593_v61, %v1396_v11  ;;  %v1524_v50 = vmul.f32 1.442695, %v1474_v47  ;;  %vm925_vm15 = vcmp.eq.s32.totalorder %v5531_v59, 1  ;;  %v5544_v61 = vld [vmem:[%s7109_s3 + $0xd0] sm:$0xff] }
 0x1ac   :  { %v5503_v46 = vpop.permute.xlu0 %1286  ;;  %v1597_v39 = vmul.f32 0.6931472, %v3308_v20  ;;  %v1476_v9 = vsub.f32 0.0, %v1444_v40  ;;  %vm938_vm1 = vcmp.eq.s32.totalorder %v5544_v61, 1  ;;  %v1502_v10 = vmul.f32 1.442695, %v1463_v25 }
 0x1ad   :  { %3321 = vlog2.f32 %v1553_v53  ;;  %v3310_v20 = vpop.eup %3309  ;;  %v7433_v53 = vsub.f32 %v5036_v28, %v4844_v58  ;;  %v5549_v38 = vsel %vm7233_vm0, %v1680_v33, 0.0  ;;  %v7435_v40 = vld [vmem:[#allocation5_spill] sm:$0xff]  ;;  %v7436_v58 = vsub.f32 %v5104_v56, %v4723_v30 }
 0x1ae   :  { %v1682_v19 = vmul.f32 %v7435_v40, %v1650_v13  ;;  %3323 = vlog2.f32 %v1564_v16  ;;  %v7437_v25 = vsub.f32 %v5045_v22, %v4863_v8  ;;  %v7439_v56 = vld [vmem:[#allocation9_spill] sm:$0xff]  ;;  %v1528_v22 = vmul.f32 1.442695, %v1476_v9  ;;  %v5580_v40 = vld [vmem:[%s7109_s3 + $0x78] sm:$0xff]  ;;  %v1317_v9 = vpop.permute.xlu1 %1316 }
 0x1af   :  { %v5539_v11 = vsel %vm934_vm11, %v7433_v53, %v1309_v34  ;;  %v5558_v28 = vsel %vm921_vm12, %v7436_v58, %v5456_v0  ;;  %v3312_v3 = vpop.eup %3311  ;;  %v1654_v34 = vadd.f32 %v1597_v39, %v1398_v52  ;;  %v1684_v4 = vmul.f32 %v7439_v56, %v1652_v18  ;;  %v3536_v39 = vld [vmem:[%s7109_s3 + $0xe0] sm:$0xff] }
 0x1b0   :  { %v5524_v43 = vpop.permute.xlu0 %1290  ;;  %7434 = vst [vmem:[#allocation7_spill] sm:$0xff] %v5539_v11  ;;  %v5566_v33 = vsel %vm936_vm13, %v7437_v25, %v1313_v27  ;;  %v1433_v13 = vand.u32 2147483647, %v5558_v28  ;;  %v3314_v30 = vpop.eup %3313  ;;  %v1601_v0 = vmul.f32 0.6931472, %v3310_v20  ;;  %3325 = vpow2.f32 %v1524_v50 }
 0x1b1   :  { %7438 = vst [vmem:[#allocation5_spill] sm:$0xff] %v5566_v33  ;;  %v1446_v52 = vand.u32 2147483647, %v5539_v11  ;;  %vm940_vm2 = vcmp.eq.s32.totalorder %v3536_v39, 1  ;;  %v3316_v8 = vpop.eup %3315  ;;  %v1555_v27 = vadd.f32 1.0, %v3312_v3  ;;  %3327 = vpow2.f32 %v1502_v10  ;;  %v7440_v3 = vld [vmem:[#allocation11_spill] sm:$0xff] }
 0x1b2   :  { %vm927_vm3 = vcmp.eq.s32.totalorder %v5580_v40, 1  ;;  %v3318_v18 = vpop.eup %3317  ;;  %v5584_v50 = vsel %vm7233_vm0, %v1682_v19, 0.0  ;;  %v1448_v58 = vand.u32 2147483647, %v5566_v33  ;;  %v1465_v25 = vsub.f32 0.0, %v1433_v13 }
 0x1b3   :  { %v3320_v56 = vpop.eup %3319  ;;  %v1686_v10 = vmul.f32 %v7440_v3, %v1654_v34  ;;  %v1566_v53 = vadd.f32 1.0, %v3314_v30  ;;  %3329 = vlog2.f32 %v1555_v27  ;;  %v1397_v42 = vmax.f32 %v5400_v48, 0.0  ;;  %v5720_v48 = vld [vmem:[%s7109_s3 + $0xc8] sm:$0xff]  ;;  %s3164_s23 = spop %3163 }
 0x1b4   :  { %v5569_v16 = vpop.permute.xlu0 %1294  ;;  %v5593_v47 = vsel %vm7233_vm0, %v1684_v4, 0.0  ;;  %v7441_v19 = vmax.f32 %v5299_v31, 0.0  ;;  %v1478_v20 = vsub.f32 0.0, %v1446_v52  ;;  %v1557_v1 = vadd.f32 1.0, %v3320_v56  ;;  %v5608_v31 = vld [vmem:[%s7109_s3 + $0x88] sm:$0xff]  ;;  %v7448_v56 = vld [vmem:[#allocation8_spill] sm:$0xff] }
 0x1b5   :  { %v1605_v11 = vmul.f32 0.6931472, %v3318_v18  ;;  %3331 = vpow2.f32 %v1528_v22  ;;  %v1506_v13 = vmul.f32 1.442695, %v1465_v25  ;;  %v7442_v34 = vsub.f32 %v5114_v55, %v4940_v36 }
 0x1b6   :  { %v1656_v35 = vadd.f32 %v1601_v0, %v7441_v19  ;;  %v1568_v27 = vadd.f32 1.0, %v3316_v8  ;;  %v1480_v4 = vsub.f32 0.0, %v1448_v58  ;;  %3333 = vlog2.f32 %v1557_v1 }
 0x1b7   :  { %v3322_v33 = vpop.eup %3321  ;;  %v5603_v30 = vsel %vm923_vm14, %v7442_v34, %v5503_v46  ;;  %vm929_vm4 = vcmp.eq.s32.totalorder %v5608_v31, 1  ;;  %v5612_v0 = vsel %vm7233_vm0, %v1686_v10, 0.0  ;;  %3335 = vlog2.f32 %v1566_v53 }
 0x1b8   :  { %v5590_v45 = vpop.permute.xlu0 %1298  ;;  %v1587_v3 = vmul.f32 0.6931472, %v3322_v33  ;;  %v1435_v36 = vand.u32 2147483647, %v5603_v30  ;;  %v7443_v55 = vsub.f32 %v7403_v5, %v7402_v60  ;;  %v3324_v29 = vpop.eup %3323  ;;  %v7444_v33 = vld [vmem:[#allocation13_spill] sm:$0xff]  ;;  %v7445_v22 = vsub.f32 %v5059_v17, %v4882_v6 }
 0x1b9   :  { %v1688_v52 = vmul.f32 %v7444_v33, %v1656_v35  ;;  %v1532_v8 = vmul.f32 1.442695, %v1478_v20  ;;  %v7446_v18 = vmax.f32 %v5345_v2, 0.0  ;;  %v1321_v5 = vpop.permute.xlu1 %1320  ;;  %3337 = vpow2.f32 %v1506_v13  ;;  %v5656_v13 = vld [vmem:[%s7109_s3 + $0x98] sm:$0xff] }
 0x1ba   :  { %v5621_v1 = vsel %vm925_vm15, %v7443_v55, %v5524_v43  ;;  %v5631_v53 = vsel %vm938_vm1, %v7445_v22, %v1317_v9  ;;  %v7447_v43 = vmax.f32 %v5307_v62, 0.0  ;;  %v1467_v58 = vsub.f32 0.0, %v1435_v36  ;;  %v3326_v35 = vpop.eup %3325  ;;  %v7451_v36 = vld [vmem:[#allocation15_spill] sm:$0xff] }
 0x1bb   :  { %v1649_v60 = vadd.f32 %v1587_v3, %v7446_v18  ;;  %v1437_v25 = vand.u32 2147483647, %v5621_v1  ;;  %3339 = vlog2.f32 %v1568_v27  ;;  %v1536_v20 = vmul.f32 1.442695, %v1480_v4  ;;  %v3328_v61 = vpop.eup %3327 }
 0x1bc   :  { %v5623_v46 = vpop.permute.xlu0 %1302  ;;  %v1658_v59 = vadd.f32 %v1605_v11, %v7447_v43  ;;  %v1399_v17 = vmax.f32 %v5478_v12, 0.0  ;;  %v1609_v9 = vmul.f32 0.6931472, %v3324_v29  ;;  %v1450_v2 = vand.u32 2147483647, %v5631_v53  ;;  %v5650_v11 = vld [vmem:[%s7109_s3 + $0xf0] sm:$0xff] }
 0x1bd   :  { %v1681_v6 = vmul.f32 %v7448_v56, %v1649_v60  ;;  %v7449_v10 = vsub.f32 %v5073_v23, %v4902_v7  ;;  %vm942_vm6 = vcmp.eq.s32.totalorder %v5650_v11, 1  ;;  %v1469_v19 = vsub.f32 0.0, %v1437_v25  ;;  %v3330_v3 = vpop.eup %3329  ;;  %v7468_v12 = vld [vmem:[#allocation53_spill] sm:$0xff] }
 0x1be   :  { %vm931_vm7 = vcmp.eq.s32.totalorder %v5656_v13, 1  ;;  %v1559_v23 = vadd.f32 1.0, %v3328_v61  ;;  %v1510_v39 = vmul.f32 1.442695, %v1467_v58  ;;  %v7450_v27 = vsub.f32 %v7405_v21, %v7404_v32  ;;  %v5676_v32 = vld [vmem:[%s7109_s3 + $0xa8] sm:$0xff] }
 0x1bf   :  { %v5645_v62 = vsel %vm940_vm2, %v7449_v10, %v1321_v5  ;;  %v1713_v7 = vsel %vm7233_vm0, %v1681_v6, 0.0  ;;  %v1690_v55 = vmul.f32 %v7451_v36, %v1658_v59  ;;  %3341 = vpow2.f32 %v1532_v8  ;;  %v3332_v21 = vpop.eup %3331  ;;  %v7456_v36 = vld [vmem:[#allocation17_spill] sm:$0xff] }
 0x1c0   :  { %v5659_v34 = vpop.permute.xlu0 %1306  ;;  %v5668_v4 = vsel %vm927_vm3, %v7450_v27, %v5569_v16  ;;  %v1714_v29 = vadd.f32 %v1713_v7, %v5549_v38  ;;  %v1514_v33 = vmul.f32 1.442695, %v1469_v19  ;;  %v1570_v22 = vadd.f32 1.0, %v3326_v35  ;;  %v3334_v5 = vpop.eup %3333 }
 0x1c1   :  { %v1452_v18 = vand.u32 2147483647, %v5645_v62  ;;  %v1591_v60 = vmul.f32 0.6931472, %v3330_v3  ;;  %3343 = vlog2.f32 %v1559_v23  ;;  %vm933_vm8 = vcmp.eq.s32.totalorder %v5676_v32, 1  ;;  %v3336_v56 = vpop.eup %3335 }
 0x1c2   :  { %v5680_v16 = vsel %vm7233_vm0, %v1688_v52, 0.0  ;;  %3345 = vpow2.f32 %v1536_v20  ;;  %v1482_v40 = vsub.f32 0.0, %v1450_v2  ;;  %v1439_v38 = vand.u32 2147483647, %v5668_v4  ;;  %v5706_v2 = vld [vmem:[%s7109_s3 + $0xb8] sm:$0xff] }
 0x1c3   :  { %v7452_v43 = vmax.f32 %v5315_v24, 0.0  ;;  %v7453_v58 = vmax.f32 %v5376_v49, 0.0  ;;  %v1716_v35 = vadd.f32 %v5584_v50, %v1714_v29  ;;  %3347 = vpow2.f32 %v1510_v39  ;;  %v7455_v50 = vld [vmem:[#allocation6_spill] sm:$0xff] }
 0x1c4   :  { %v5683_v8 = vpop.permute.xlu0 %1310  ;;  %v1595_v6 = vmul.f32 0.6931472, %v3334_v5  ;;  %3349 = vpow2.f32 %v1514_v33  ;;  %v1471_v52 = vsub.f32 0.0, %v1439_v38  ;;  %v7454_v20 = vsub.f32 %v7407_v57, %v7406_v37  ;;  %v3338_v57 = vpop.eup %3337  ;;  %v7457_v33 = vld [vmem:[#allocation10_spill] sm:$0xff]  ;;  %v7461_v5 = vld [vmem:[#allocation41_spill] sm:$0xff] }
 0x1c5   :  { %v1660_v59 = vadd.f32 %v1609_v9, %v7452_v43  ;;  %v1651_v25 = vadd.f32 %v1591_v60, %v7453_v58  ;;  %v5700_v24 = vsel %vm7233_vm0, %v1690_v55, 0.0  ;;  %3351 = vlog2.f32 %v1570_v22  ;;  %v3340_v7 = vpop.eup %3339  ;;  %v7458_v60 = vld [vmem:[#allocation52_spill] sm:$0xff]  ;;  %v7460_v38 = vld [vmem:[#allocation50_spill] sm:$0xff] }
 0x1c6   :  { %v5696_v61 = vsel %vm929_vm4, %v7454_v20, %v5590_v45  ;;  %2655 = vmax.xlane.f32.xlu0 %v5460_v51  ;;  %v1484_v49 = vsub.f32 0.0, %v1452_v18  ;;  %vm935_vm9 = vcmp.eq.s32.totalorder %v5706_v2, 1  ;;  %v1572_v37 = vadd.f32 1.0, %v3332_v21  ;;  %v1325_v45 = vpop.permute.xlu1 %1324 }
 0x1c7   :  { %v1683_v9 = vmul.f32 %v7455_v50, %v1651_v25  ;;  %v1653_v51 = vadd.f32 %v1595_v6, %v1397_v42  ;;  %v1518_v31 = vmul.f32 1.442695, %v1471_v52  ;;  %v1441_v10 = vand.u32 2147483647, %v5696_v61  ;;  %v7464_v50 = vld [vmem:[#allocation51_spill] sm:$0xff] }
 0x1c8   :  { %v5712_v19 = vpop.permute.xlu0 %1314  ;;  %v1613_v23 = vmul.f32 0.6931472, %v3336_v56  ;;  %v1540_v39 = vmul.f32 1.442695, %v1482_v40  ;;  %v1561_v3 = vadd.f32 1.0, %v3338_v57  ;;  %v1692_v55 = vmul.f32 %v7456_v36, %v1660_v59 }
 0x1c9   :  { %v1717_v27 = vsel %vm7233_vm0, %v1683_v9, 0.0  ;;  %v1685_v22 = vmul.f32 %v7457_v33, %v1653_v51  ;;  %v1473_v18 = vsub.f32 0.0, %v1441_v10  ;;  %vm937_vm5 = vcmp.eq.s32.totalorder %v5720_v48, 1  ;;  %v3342_v58 = vpop.eup %3341 }
 0x1ca   :  { %v1718_v29 = vadd.f32 %v1717_v27, %v1716_v35  ;;  %2661 = vmax.xlane.f32.xlu0 %v5482_v14  ;;  %v1544_v42 = vmul.f32 1.442695, %v1484_v49  ;;  %v7459_v21 = vsub.f32 %v5087_v63, %v7458_v60  ;;  %3353 = vlog2.f32 %v1561_v3 }
 0x1cb   :  { %v7462_v43 = vsub.f32 %v7460_v38, %v7461_v5  ;;  %v1721_v25 = vsel %vm7233_vm0, %v1685_v22, 0.0  ;;  %3355 = vpow2.f32 %v1518_v31  ;;  %v1522_v63 = vmul.f32 1.442695, %v1473_v18  ;;  %v3344_v35 = vpop.eup %3343 }
 0x1cc   :  { %v5729_v40 = vsel %vm942_vm6, %v7459_v21, %v1325_v45  ;;  %v1720_v14 = vadd.f32 %v5593_v47, %v1718_v29  ;;  %v7463_v11 = vmax.f32 %v5358_v26, 0.0  ;;  %3357 = vlog2.f32 %v1572_v37  ;;  %v1319_v13 = vpop.permute.xlu0 %1318  ;;  %v3545_v47 = vld [vmem:[%s7109_s3 + $0xe8] sm:$0xff]  ;;  %v3346_v20 = vpop.eup %3345 }
 0x1cd   :  { %v5737_v59 = vsel %vm931_vm7, %v7462_v43, %v5623_v46  ;;  %v1401_v6 = vmax.f32 %v5558_v28, 0.0  ;;  %v3544_v46 = vld [vmem:[%s7109_s3 + $0xd8] sm:$0xff]  ;;  %vm941_vm12 = vcmp.eq.s32.totalorder %v3545_v47, 1  ;;  %v1599_v26 = vmul.f32 0.6931472, %v3344_v35  ;;  %v7465_v28 = vld [vmem:[#allocation39_spill] sm:$0xff]  ;;  %v3348_v37 = vpop.eup %3347 }
 0x1ce   :  { %v1662_v56 = vadd.f32 %v1613_v23, %v7463_v11  ;;  %v1443_v52 = vand.u32 2147483647, %v5737_v59  ;;  %vm939_vm11 = vcmp.eq.s32.totalorder %v3544_v46, 1  ;;  %v1722_v49 = vadd.f32 %v1721_v25, %v1720_v14  ;;  %2664 = vmax.xlane.f32.xlu0 %v5507_v44  ;;  %v3350_v10 = vpop.eup %3349  ;;  %v7471_v25 = vld [vmem:[#allocation19_spill] sm:$0xff]  ;;  %v5822_v47 = vld [vmem:[%s7111_s5 + $0x38] sm:$0xff] }
 0x1cf   :  { %3359 = vpow2.f32 %v1522_v63  ;;  %v7466_v9 = vsub.f32 %v7464_v50, %v7465_v28  ;;  %v1617_v45 = vmul.f32 0.6931472, %v3340_v7  ;;  %v1454_v51 = vand.u32 2147483647, %v5729_v40  ;;  %v3352_v36 = vpop.eup %3351  ;;  %v3546_v7 = vld [vmem:[%s7109_s3 + $0xf8] sm:$0xff]  ;;  %s1787_s3 = smax.f32 %s3589_s0, %s3162_s15 }
 0x1d0   :  { %3361 = vpow2.f32 %v1540_v39  ;;  %v1475_v31 = vsub.f32 0.0, %v1443_v52  ;;  %v1655_v23 = vadd.f32 %v1599_v26, %v1399_v17  ;;  %v1563_v27 = vadd.f32 1.0, %v3348_v37  ;;  %v7467_v39 = vld [vmem:[#allocation12_spill] sm:$0xff]  ;;  %v7469_v17 = vld [vmem:[#allocation42_spill] sm:$0xff]  ;;  %v1323_v38 = vpop.permute.xlu0 %1322 }
 0x1d1   :  { %v5757_v57 = vsel %vm933_vm8, %v7466_v9, %v5659_v34  ;;  %3363 = vpow2.f32 %v1544_v42  ;;  %v1574_v32 = vadd.f32 1.0, %v3342_v58  ;;  %v1724_v34 = vadd.f32 %v5612_v0, %v1722_v49 }
 0x1d2   :  { %v1445_v3 = vand.u32 2147483647, %v5757_v57  ;;  %v1565_v29 = vadd.f32 1.0, %v3350_v10  ;;  %v1526_v44 = vmul.f32 1.442695, %v1475_v31  ;;  %vm943_vm13 = vcmp.eq.s32.totalorder %v3546_v7, 1  ;;  %2670 = vmax.xlane.f32.xlu0 %v5511_v15 }
 0x1d3   :  { %v1687_v33 = vmul.f32 %v7467_v39, %v1655_v23  ;;  %3365 = vlog2.f32 %v1563_v27  ;;  %v7470_v18 = vsub.f32 %v7468_v12, %v7469_v17  ;;  %v5779_v0 = vsel %vm7233_vm0, %v1692_v55, 0.0  ;;  %v7472_v15 = vld [vmem:[#allocation55_spill] sm:$0xff]  ;;  %v7477_v31 = vld [vmem:[#allocation46_spill] sm:$0xff]  ;;  %v7480_v23 = vld [vmem:[#allocation44_spill] sm:$0xff] }
 0x1d4   :  { %v1477_v22 = vsub.f32 0.0, %v1445_v3  ;;  %v1576_v60 = vadd.f32 1.0, %v3346_v20  ;;  %v1486_v21 = vsub.f32 0.0, %v1454_v51  ;;  %3367 = vlog2.f32 %v1565_v29  ;;  %v3354_v14 = vpop.eup %3353  ;;  %v7473_v55 = vld [vmem:[#allocation43_spill] sm:$0xff] }
 0x1d5   :  { %v5775_v42 = vsel %vm935_vm9, %v7470_v18, %v5683_v8  ;;  %v1725_v5 = vsel %vm7233_vm0, %v1687_v33, 0.0  ;;  %3369 = vpow2.f32 %v1526_v44  ;;  %v5784_v2 = vmul.f32 %v7471_v25, %v1662_v56  ;;  %v3356_v11 = vpop.eup %3355  ;;  %v7482_v33 = vld [vmem:[#allocation14_spill] sm:$0xff] }
 0x1d6   :  { %v1530_v43 = vmul.f32 1.442695, %v1477_v22  ;;  %v1447_v58 = vand.u32 2147483647, %v5775_v42  ;;  %3371 = vlog2.f32 %v1574_v32  ;;  %v1726_v8 = vadd.f32 %v1725_v5, %v1724_v34  ;;  %v5798_v56 = vpop.eup %3357 }
 0x1d7   :  { %v7474_v63 = vsub.f32 %v7472_v15, %v7473_v55  ;;  %v7475_v52 = vmax.f32 %v5366_v41, 0.0  ;;  %v1603_v49 = vmul.f32 0.6931472, %v3354_v14  ;;  %v1548_v50 = vmul.f32 1.442695, %v1486_v21 }
 0x1d8   :  { %3373 = vpow2.f32 %v1530_v43  ;;  %v1479_v26 = vsub.f32 0.0, %v1447_v58  ;;  %v1567_v28 = vadd.f32 1.0, %v3356_v11  ;;  %v1728_v34 = vadd.f32 %v5680_v16, %v1726_v8  ;;  %v5835_v8 = vld [vmem:[%s7111_s5 + $0x48] sm:$0xff] }
 0x1d9   :  { %v5792_v35 = vsel %vm937_vm5, %v7474_v63, %v5712_v19  ;;  %v5796_v20 = vadd.f32 %v1617_v45, %v7475_v52  ;;  %3375 = vlog2.f32 %v1576_v60  ;;  %v3360_v37 = vpop.eup %3359  ;;  %v1657_v51 = vadd.f32 %v1603_v49, %v1401_v6  ;;  %v7476_v19 = vld [vmem:[#allocation37_spill] sm:$0xff]  ;;  %v7479_v45 = vld [vmem:[#allocation47_spill] sm:$0xff]  ;;  %v1327_v6 = vpop.permute.xlu0 %1326 }
 0x1da   :  { %v1449_v9 = vand.u32 2147483647, %v5792_v35  ;;  %v1534_v48 = vmul.f32 1.442695, %v1479_v26  ;;  %v7478_v10 = vsub.f32 %v7476_v19, %v7477_v31  ;;  %v7481_v27 = vsub.f32 %v7479_v45, %v7480_v23  ;;  %v3362_v32 = vpop.eup %3361  ;;  %v7486_v19 = vld [vmem:[#allocation16_spill] sm:$0xff] }
 0x1db   :  { %3377 = vlog2.f32 %v1567_v28  ;;  %v1569_v29 = vadd.f32 1.0, %v3360_v37  ;;  %v5814_v39 = vpop.eup %3363  ;;  %v1689_v22 = vmul.f32 %v7482_v33, %v1657_v51  ;;  %v1403_v46 = vmax.f32 %v5603_v30, 0.0  ;;  %v7484_v30 = vld [vmem:[#allocation45_spill] sm:$0xff]  ;;  %v5852_v23 = vld [vmem:[%s7111_s5 + $0x58] sm:$0xff] }
 0x1dc   :  { %v5805_v41 = vsel %vm939_vm11, %v7478_v10, %v1319_v13  ;;  %v5811_v3 = vsel %vm941_vm12, %v7481_v27, %v1323_v38  ;;  %v1481_v44 = vsub.f32 0.0, %v1449_v9  ;;  %3379 = vpow2.f32 %v1534_v48  ;;  %v7483_v38 = vld [vmem:[#allocation48_spill] sm:$0xff] }
 0x1dd   :  { %v1451_v13 = vand.u32 2147483647, %v5805_v41  ;;  %v1621_v12 = vmul.f32 0.6931472, %v3352_v36  ;;  %3381 = vlog2.f32 %v1569_v29  ;;  %v1453_v17 = vand.u32 2147483647, %v5811_v3  ;;  %v3366_v18 = vpop.eup %3365 }
 0x1de   :  { %v1538_v16 = vmul.f32 1.442695, %v1481_v44  ;;  %3383 = vpow2.f32 %v1548_v50  ;;  %v1729_v60 = vsel %vm7233_vm0, %v1689_v22, 0.0  ;;  %v7485_v5 = vsub.f32 %v7483_v38, %v7484_v30  ;;  %v3368_v58 = vpop.eup %3367 }
 0x1df   :  { %v1483_v21 = vsub.f32 0.0, %v1451_v13  ;;  %v1730_v14 = vadd.f32 %v1729_v60, %v1728_v34  ;;  %v1607_v25 = vmul.f32 0.6931472, %v3366_v18  ;;  %v1485_v36 = vsub.f32 0.0, %v1453_v17  ;;  %v3370_v15 = vpop.eup %3369  ;;  %v5866_v60 = vld [vmem:[%s7111_s5 + $0x68] sm:$0xff] }
 0x1e0   :  { %v5830_v43 = vsel %vm943_vm13, %v7485_v5, %v1327_v6  ;;  %3385 = vpow2.f32 %v1538_v16  ;;  %v1405_v55 = vmax.f32 %v5621_v1, 0.0  ;;  %v1611_v63 = vmul.f32 0.6931472, %v3368_v58  ;;  %v5840_v52 = vpop.eup %3371 }
 0x1e1   :  { %v1542_v11 = vmul.f32 1.442695, %v1483_v21  ;;  %v2675_v7 = vsel %vm2653_vm10, %v5822_v47, -inf  ;;  %v1578_v49 = vadd.f32 1.0, %v3362_v32  ;;  %v1659_v26 = vadd.f32 %v1607_v25, %v1403_v46  ;;  %v7488_v32 = vld [vmem:[#allocation18_spill] sm:$0xff] }
 0x1e2   :  { %v1571_v50 = vadd.f32 1.0, %v3370_v15  ;;  %v1546_v28 = vmul.f32 1.442695, %v1485_v36  ;;  %2676 = vmax.xlane.f32.xlu0 %v2675_v7  ;;  %v3374_v9 = vpop.eup %3373  ;;  %v1732_v37 = vadd.f32 %v5700_v24, %v1730_v14  ;;  %v1661_v51 = vadd.f32 %v1611_v63, %v1405_v55  ;;  %v7487_v24 = vld [vmem:[#allocation21_spill] sm:$0xff]  ;;  %v7490_v63 = vld [vmem:[#allocation20_spill] sm:$0xff] }
 0x1e3   :  { %3387 = vpow2.f32 %v1542_v11  ;;  %v1455_v48 = vand.u32 2147483647, %v5830_v43  ;;  %v5844_v1 = vpop.eup %3375  ;;  %v1691_v31 = vmul.f32 %v7486_v19, %v1659_v26  ;;  %v1573_v10 = vadd.f32 1.0, %v3374_v9  ;;  %v7491_v26 = vld [vmem:[#allocation23_spill] sm:$0xff] }
 0x1e4   :  { %3389 = vlog2.f32 %v1571_v50  ;;  %v2681_v45 = vsel %vm2653_vm10, %v5835_v8, -inf  ;;  %v1696_v27 = vmul.f32 %v7487_v24, %v5796_v20  ;;  %v1693_v34 = vmul.f32 %v7488_v32, %v1661_v51 }
 0x1e5   :  { %3391 = vpow2.f32 %v1546_v28  ;;  %v1487_v29 = vsub.f32 0.0, %v1455_v48  ;;  %v3378_v44 = vpop.eup %3377  ;;  %v7489_v6 = vmax.f32 %v5432_v54, 0.0  ;;  %v1733_v22 = vsel %vm7233_vm0, %v1691_v31, 0.0  ;;  %v7493_v48 = vld [vmem:[#allocation22_spill] sm:$0xff] }
 0x1e6   :  { %v1407_v46 = vmax.f32 %v5668_v4, 0.0  ;;  %3393 = vlog2.f32 %v1573_v10  ;;  %2682 = vmax.xlane.f32.xlu0 %v2681_v45  ;;  %v3380_v13 = vpop.eup %3379  ;;  %v1734_v16 = vadd.f32 %v1733_v22, %v1732_v37  ;;  %v1615_v17 = vmul.f32 0.6931472, %v3378_v44 }
 0x1e7   :  { %v1666_v33 = vadd.f32 %v1621_v12, %v7489_v6  ;;  %v1550_v18 = vmul.f32 1.442695, %v1487_v29  ;;  %v2687_v20 = vsel %vm2653_vm10, %v5852_v23, -inf  ;;  %v3382_v54 = vpop.eup %3381  ;;  %3395 = vlog2.f32 %v1578_v49 }
 0x1e8   :  { %v1737_v12 = vsel %vm7233_vm0, %v1693_v34, 0.0  ;;  %v1409_v4 = vmax.f32 %v5696_v61, 0.0  ;;  %v1575_v21 = vadd.f32 1.0, %v3380_v13  ;;  %v3384_v38 = vpop.eup %3383  ;;  %v1736_v30 = vadd.f32 %v5779_v0, %v1734_v16 }
 0x1e9   :  { %v1663_v5 = vadd.f32 %v1615_v17, %v1407_v46  ;;  %v1619_v58 = vmul.f32 0.6931472, %v3382_v54  ;;  %3397 = vpow2.f32 %v1550_v18  ;;  %v1625_v25 = vmul.f32 0.6931472, %v5798_v56  ;;  %v7492_v56 = vld [vmem:[#allocation7_spill] sm:$0xff] }
 0x1ea   :  { %v3386_v14 = vpop.eup %3385  ;;  %v1580_v36 = vadd.f32 1.0, %v5814_v39  ;;  %3399 = vlog2.f32 %v1575_v21  ;;  %2688 = vmax.xlane.f32.xlu0 %v2687_v20  ;;  %v2693_v15 = vsel %vm2653_vm10, %v5866_v60, -inf  ;;  %v1738_v55 = vadd.f32 %v1737_v12, %v1736_v30  ;;  %v5884_v39 = vld [vmem:[%s7111_s5 + $0x78] sm:$0xff]  ;;  %v7496_v12 = vld [vmem:[#allocation25_spill] sm:$0xff] }
 0x1eb   :  { %v1695_v61 = vmul.f32 %v7490_v63, %v1663_v5  ;;  %v1665_v11 = vadd.f32 %v1619_v58, %v1409_v4  ;;  %v1577_v7 = vadd.f32 1.0, %v3386_v14  ;;  %v1739_v0 = vsel %vm7233_vm0, %v5784_v2, 0.0  ;;  %v7494_v2 = vld [vmem:[#allocation56_spill] sm:$0xff] }
 0x1ec   :  { %v1743_v49 = vsel %vm7233_vm0, %v1696_v27, 0.0  ;;  %v1698_v50 = vmul.f32 %v7491_v26, %v1666_v33  ;;  %v1414_v28 = vmax.f32 %v7492_v56, 0.0  ;;  %v1740_v37 = vadd.f32 %v1739_v0, %v1738_v55  ;;  %v7498_v5 = vld [vmem:[#allocation24_spill] sm:$0xff] }
 0x1ed   :  { %v3388_v9 = vpop.eup %3387  ;;  %v1741_v51 = vsel %vm7233_vm0, %v1695_v61, 0.0  ;;  %v1697_v19 = vmul.f32 %v7493_v48, %v1665_v11  ;;  %3401 = vlog2.f32 %v1577_v7  ;;  %v7495_v10 = vmax.f32 %v7494_v2, 0.0  ;;  %v7499_v11 = vld [vmem:[#allocation26_spill] sm:$0xff] }
 0x1ee   :  { %v3390_v31 = vpop.eup %3389  ;;  %3403 = vlog2.f32 %v1580_v36  ;;  %v1582_v24 = vadd.f32 1.0, %v3384_v38  ;;  %v1579_v27 = vadd.f32 1.0, %v3388_v9  ;;  %2694 = vmax.xlane.f32.xlu0 %v2693_v15  ;;  %v1742_v34 = vadd.f32 %v1741_v51, %v1740_v37  ;;  %v7500_v51 = vld [vmem:[#allocation27_spill] sm:$0xff] }
 0x1ef   :  { %v1668_v45 = vadd.f32 %v1625_v25, %v7495_v10  ;;  %v3392_v32 = vpop.eup %3391  ;;  %v1411_v29 = vmax.f32 %v5737_v59, 0.0  ;;  %v1623_v44 = vmul.f32 0.6931472, %v3390_v31  ;;  %v2699_v6 = vsel %vm2653_vm10, %v5884_v39, -inf  ;;  %v7497_v59 = vld [vmem:[#allocation5_spill] sm:$0xff]  ;;  %v7501_v10 = vld [vmem:[#allocation28_spill] sm:$0xff] }
 0x1f0   :  { %v3394_v33 = vpop.eup %3393  ;;  %v1629_v22 = vmul.f32 0.6931472, %v5840_v52  ;;  %v1745_v46 = vsel %vm7233_vm0, %v1697_v19, 0.0  ;;  %3405 = vlog2.f32 %v1579_v27  ;;  %v1581_v13 = vadd.f32 1.0, %v3392_v32  ;;  %v7502_v27 = vld [vmem:[#allocation29_spill] sm:$0xff] }
 0x1f1   :  { %v1744_v16 = vadd.f32 %v1743_v49, %v1742_v34  ;;  %v1667_v17 = vadd.f32 %v1623_v44, %v1411_v29  ;;  %v1413_v18 = vmax.f32 %v5757_v57, 0.0  ;;  %v1627_v20 = vmul.f32 0.6931472, %v3394_v33  ;;  %v3396_v54 = vpop.eup %3395 }
 0x1f2   :  { %v1700_v4 = vmul.f32 %v7496_v12, %v1668_v45  ;;  %v1416_v21 = vmax.f32 %v7497_v59, 0.0  ;;  %v1633_v38 = vmul.f32 0.6931472, %v5844_v1  ;;  %3407 = vlog2.f32 %v1581_v13  ;;  %2700 = vmax.xlane.f32.xlu0 %v2699_v6 }
 0x1f3   :  { %v3398_v30 = vpop.eup %3397  ;;  %3409 = vlog2.f32 %v1582_v24  ;;  %v1746_v52 = vadd.f32 %v1745_v46, %v1744_v16  ;;  %v1699_v58 = vmul.f32 %v7498_v5, %v1667_v17  ;;  %v1669_v14 = vadd.f32 %v1627_v20, %v1413_v18 }
 0x1f4   :  { %v3400_v25 = vpop.eup %3399  ;;  %v1747_v36 = vsel %vm7233_vm0, %v1698_v50, 0.0  ;;  %v1670_v57 = vadd.f32 %v1629_v22, %v1414_v28  ;;  %v1415_v15 = vmax.f32 %v5775_v42, 0.0  ;;  %v1583_v55 = vadd.f32 1.0, %v3398_v30 }
 0x1f5   :  { %v1748_v63 = vadd.f32 %v1747_v36, %v1746_v52  ;;  %v1749_v61 = vsel %vm7233_vm0, %v1699_v58, 0.0  ;;  %v1701_v1 = vmul.f32 %v7499_v11, %v1669_v14  ;;  %v1631_v7 = vmul.f32 0.6931472, %v3400_v25  ;;  %v7505_v14 = vld [vmem:[#allocation32_spill] sm:$0xff] }
 0x1f6   :  { %v1672_v0 = vadd.f32 %v1633_v38, %v1416_v21  ;;  %v1637_v49 = vmul.f32 0.6931472, %v3396_v54  ;;  %3411 = vlog2.f32 %v1583_v55  ;;  %v1751_v56 = vsel %vm7233_vm0, %v1700_v4, 0.0  ;;  %v7504_v21 = vld [vmem:[#allocation31_spill] sm:$0xff] }
 0x1f7   :  { %v3402_v26 = vpop.eup %3401  ;;  %v1418_v9 = vmax.f32 %v5631_v53, 0.0  ;;  %v1750_v37 = vadd.f32 %v1749_v61, %v1748_v63  ;;  %v1671_v50 = vadd.f32 %v1631_v7, %v1415_v15  ;;  %v1702_v42 = vmul.f32 %v7500_v51, %v1670_v57  ;;  %v7506_v63 = vld [vmem:[#allocation33_spill] sm:$0xff] }
 0x1f8   :  { %v3404_v28 = vpop.eup %3403  ;;  %v1753_v48 = vsel %vm7233_vm0, %v1701_v1, 0.0  ;;  %v1417_v19 = vmax.f32 %v5792_v35, 0.0  ;;  %v1635_v31 = vmul.f32 0.6931472, %v3402_v26  ;;  %v1704_v32 = vmul.f32 %v7502_v27, %v1672_v0  ;;  %v7503_v35 = vld [vmem:[#allocation30_spill] sm:$0xff]  ;;  %v5943_v27 = vld [vmem:[%s7111_s5 + $0x20] sm:$0xff] }
 0x1f9   :  { %v1752_v2 = vadd.f32 %v1751_v56, %v1750_v37  ;;  %v1703_v45 = vmul.f32 %v7501_v10, %v1671_v50  ;;  %v1674_v34 = vadd.f32 %v1637_v49, %v1418_v9  ;;  %v1641_v44 = vmul.f32 0.6931472, %v3404_v28  ;;  %v7507_v0 = vld [vmem:[#allocation34_spill] sm:$0xff]  ;;  %v7508_v50 = vld [vmem:[#allocation35_spill] sm:$0xff] }
 0x1fa   :  { %v3406_v24 = vpop.eup %3405  ;;  %v1673_v29 = vadd.f32 %v1635_v31, %v1417_v19  ;;  %v1419_v6 = vmax.f32 %v5805_v41, 0.0  ;;  %v1755_v46 = vsel %vm7233_vm0, %v1702_v42, 0.0  ;;  %v1420_v18 = vmax.f32 %v5645_v62, 0.0 }
 0x1fb   :  { %v1754_v53 = vadd.f32 %v1753_v48, %v1752_v2  ;;  %v1639_v33 = vmul.f32 0.6931472, %v3406_v24  ;;  %v1757_v13 = vsel %vm7233_vm0, %v1703_v45, 0.0  ;;  %v1421_v4 = vmax.f32 %v5811_v3, 0.0  ;;  %v5936_v45 = vld [vmem:[%s7111_s5 + $0x8] sm:$0xff] }
 0x1fc   :  { %v3408_v22 = vpop.eup %3407  ;;  %v1705_v16 = vmul.f32 %v7503_v35, %v1673_v29  ;;  %v1759_v59 = vsel %vm7233_vm0, %v1704_v32, 0.0  ;;  %v1706_v41 = vmul.f32 %v7504_v21, %v1674_v34  ;;  %v1676_v38 = vadd.f32 %v1641_v44, %v1420_v18  ;;  %v5950_v34 = vld [vmem:[%s7111_s5 + $0x30] sm:$0xff]  ;;  %v5957_v44 = vld [vmem:[%s7111_s5 + $0x40] sm:$0xff] }
 0x1fd   :  { %v3410_v17 = vpop.eup %3409  ;;  %v1756_v20 = vadd.f32 %v1755_v46, %v1754_v53  ;;  %v1675_v54 = vadd.f32 %v1639_v33, %v1419_v6  ;;  %v1643_v12 = vmul.f32 0.6931472, %v3408_v22  ;;  %v1422_v15 = vmax.f32 %v5729_v40, 0.0  ;;  %v5964_v6 = vld [vmem:[%s7111_s5 + $0x50] sm:$0xff]  ;;  %v5971_v22 = vld [vmem:[%s7111_s5 + $0x60] sm:$0xff] }
 0x1fe   :  { %v1645_v5 = vmul.f32 0.6931472, %v3410_v17  ;;  %v1761_v58 = vsel %vm7233_vm0, %v1705_v16, 0.0  ;;  %v1423_v55 = vmax.f32 %v5830_v43, 0.0  ;;  %v1763_v3 = vsel %vm7233_vm0, %v1706_v41, 0.0  ;;  %v7509_v43 = vld [vmem:[#allocation36_spill] sm:$0xff] }
 0x1ff   :  { %v1758_v30 = vadd.f32 %v1757_v13, %v1756_v20  ;;  %v1707_v25 = vmul.f32 %v7505_v14, %v1675_v54  ;;  %v1677_v36 = vadd.f32 %v1643_v12, %v1421_v4  ;;  %v1708_v61 = vmul.f32 %v7506_v63, %v1676_v38  ;;  %v5978_v13 = vld [vmem:[%s7111_s5 + $0x70] sm:$0xff]  ;;  %v7515_v14 = vld [vmem:[#allocation49_spill] sm:$0xff] }
 0x200   :  { %v3412_v52 = vpop.eup %3411  ;;  %v1678_v1 = vadd.f32 %v1645_v5, %v1422_v15  ;;  %v2657_v24 = vsel %vm2653_vm10, %v5936_v45, -inf  ;;  %v2666_v32 = vsel %vm2653_vm10, %v5943_v27, -inf  ;;  %v2672_v29 = vsel %vm2653_vm10, %v5950_v34, -inf }
 0x201   :  { %v1760_v57 = vadd.f32 %v1759_v59, %v1758_v30  ;;  %v1647_v62 = vmul.f32 0.6931472, %v3412_v52  ;;  %v1765_v7 = vsel %vm7233_vm0, %v1707_v25, 0.0  ;;  %v1709_v49 = vmul.f32 %v7507_v0, %v1677_v36  ;;  %v7513_v59 = vld [vmem:[#allocation38_spill] sm:$0xff]  ;;  %v7514_v30 = vld [vmem:[#allocation40_spill] sm:$0xff] }
 0x202   :  { %v1767_v37 = vsel %vm7233_vm0, %v1708_v61, 0.0  ;;  %v1710_v28 = vmul.f32 %v7508_v50, %v1678_v1  ;;  %v2678_v53 = vsel %vm2653_vm10, %v5957_v44, -inf  ;;  %v2684_v33 = vsel %vm2653_vm10, %v5964_v6, -inf }
 0x203   :  { %v1762_v11 = vadd.f32 %v1761_v58, %v1760_v57  ;;  %v1679_v26 = vadd.f32 %v1647_v62, %v1423_v55  ;;  %v1769_v40 = vsel %vm7233_vm0, %v1709_v49, 0.0  ;;  %v2690_v46 = vsel %vm2653_vm10, %v5971_v22, -inf  ;;  %v7516_v62 = vld [vmem:[#allocation54_spill] sm:$0xff] }
 0x204   :  { %v1771_v19 = vsel %vm7233_vm0, %v1710_v28, 0.0  ;;  %v2696_v16 = vsel %vm2653_vm10, %v5978_v13, -inf  ;;  %v1784_v28 = vstv %s3162_s15 }
 0x205   :  { %v1764_v56 = vadd.f32 %v1763_v3, %v1762_v11  ;;  %v1711_v51 = vmul.f32 %v7509_v43, %v1679_v26  ;;  %v6012_v26 = vpop.permute.xlu1 %1953  ;;  %v1788_v43 = vstv %s1787_s3 }
 0x206   :  { %7517 = vst [vmem:[#allocation8_spill] sm:$0xff] %v6012_v26 }
 0x207   :  { %v1766_v9 = vadd.f32 %v1765_v7, %v1764_v56  ;;  %v1773_v31 = vsel %vm7233_vm0, %v1711_v51, 0.0 }
 0x209   :  { %v1768_v42 = vadd.f32 %v1767_v37, %v1766_v9  ;;  %v6014_v56 = vpop.permute.xlu1 %1956 }
 0x20a   :  { %7518 = vst [vmem:[#allocation15_spill] sm:$0xff] %v6014_v56 }
 0x20b   :  { %v1770_v48 = vadd.f32 %v1769_v40, %v1768_v42 }
 0x20d   :  { %v1772_v2 = vadd.f32 %v1771_v19, %v1770_v48  ;;  %v6016_v37 = vpop.permute.xlu1 %1962 }
 0x20e   :  { %v1905_v35 = vpop.xlane.xlu0 %1904  ;;  %7519 = vst [vmem:[#allocation6_spill] sm:$0xff] %v6016_v37 }
 0x20f   :  { %v1774_v10 = vadd.f32 %v1773_v31, %v1772_v2  ;;  %v1906_v9 = vrot.slane %v1905_v35, 4 }
 0x211   :  { %1775 = vadd.xlane.f32.xlu1 %v1774_v10  ;;  %v1907_v50 = vadd.f32 %v1906_v9, %v1905_v35 }
 0x213   :  { %v1908_v42 = vrot.slane %v1907_v50, 2 }
 0x215   :  { %2658 = vmax.xlane.f32.xlu1 %v2657_v24  ;;  %v1909_v24 = vadd.f32 %v1908_v42, %v1907_v50 }
 0x216   :  { %v5982_v17 = vpop.permute.xlu0 %1950 }
 0x219   :  { %2667 = vmax.xlane.f32.xlu1 %v2666_v32 }
 0x21a   :  { %v5984_v18 = vpop.permute.xlu0 %1959 }
 0x21b   :  { %7510 = vst [vmem:[#allocation9_spill] sm:$0xff] %v5984_v18 }
 0x21d   :  { %2673 = vmax.xlane.f32.xlu1 %v2672_v29 }
 0x21e   :  { %v5986_v20 = vpop.permute.xlu0 %1965 }
 0x21f   :  { %7511 = vst [vmem:[#allocation11_spill] sm:$0xff] %v5986_v20 }
 0x221   :  { %2679 = vmax.xlane.f32.xlu1 %v2678_v53 }
 0x222   :  { %v5988_v54 = vpop.permute.xlu0 %1971 }
 0x223   :  { %7512 = vst [vmem:[#allocation13_spill] sm:$0xff] %v5988_v54 }
 0x225   :  { %2685 = vmax.xlane.f32.xlu1 %v2684_v33 }
 0x226   :  { %v5990_v12 = vpop.permute.xlu0 %1977 }
 0x229   :  { %2691 = vmax.xlane.f32.xlu1 %v2690_v46 }
 0x22d   :  { %2697 = vmax.xlane.f32.xlu1 %v2696_v16  ;;  %v1910_v16 = vrot.slane %v1909_v24, 1 }
 0x253   :  { %v5992_v4 = vpop.xlane.xlu0 %2655 }
 0x254   :  { %v2702_v21 = vsub.f32 %v7513_v59, %v5992_v4 }
 0x256   :  { %v2718_v41 = vmul.f32 1.442695, %v2702_v21 }
 0x257   :  { %v5996_v38 = vpop.xlane.xlu0 %2661 }
 0x258   :  { %3413 = vpow2.f32 %v2718_v41  ;;  %v2704_v52 = vsub.f32 %v7514_v30, %v5996_v38 }
 0x25a   :  { %v2722_v5 = vmul.f32 1.442695, %v2704_v52 }
 0x25b   :  { %v6000_v58 = vpop.xlane.xlu0 %2664 }
 0x25c   :  { %3415 = vpow2.f32 %v2722_v5  ;;  %v2705_v25 = vsub.f32 %v7515_v14, %v6000_v58 }
 0x25e   :  { %v2724_v36 = vmul.f32 1.442695, %v2705_v25 }
 0x25f   :  { %v6004_v57 = vpop.xlane.xlu0 %2670 }
 0x260   :  { %3417 = vpow2.f32 %v2724_v36  ;;  %v2707_v15 = vsub.f32 %v7516_v62, %v6004_v57  ;;  %v1911_v36 = vadd.f32 %v1910_v16, %v1909_v24 }
 0x262   :  { %v3414_v55 = vpop.eup %3413  ;;  %v2728_v3 = vmul.f32 1.442695, %v2707_v15 }
 0x263   :  { %v2750_v63 = vsel %vm2653_vm10, %v3414_v55, 0.0 }
 0x264   :  { %3419 = vpow2.f32 %v2728_v3  ;;  %2751 = vadd.xlane.f32.xlu0 %v2750_v63 }
 0x265   :  { %3421 = vrcp.f32 %v1784_v28  ;;  %v1945_v28 = vlaneseq }
 0x266   :  { %v3416_v61 = vpop.eup %3415  ;;  %3423 = vrcp.f32 %v1788_v43 }
 0x267   :  { %v2756_v11 = vsel %vm2653_vm10, %v3416_v61, 0.0 }
 0x268   :  { %2757 = vadd.xlane.f32.xlu0 %v2756_v11 }
 0x26a   :  { %v3418_v1 = vpop.eup %3417 }
 0x26b   :  { %v2759_v7 = vsel %vm2653_vm10, %v3418_v1, 0.0 }
 0x26c   :  { %2760 = vadd.xlane.f32.xlu0 %v2759_v7 }
 0x26e   :  { %v3420_v0 = vpop.eup %3419 }
 0x26f   :  { %v2765_v49 = vsel %vm2653_vm10, %v3420_v0, 0.0  ;;  %v6022_v10 = vpop.xlane.xlu0 %2676  ;;  %v3422_v5 = vpop.eup %3421 }
 0x270   :  { %2766 = vadd.xlane.f32.xlu0 %v2765_v49  ;;  %v2709_v33 = vsub.f32 %v5822_v47, %v6022_v10  ;;  %v3424_v25 = vpop.eup %3423 }
 0x272   :  { %v2732_v52 = vmul.f32 1.442695, %v2709_v33 }
 0x273   :  { %v6030_v41 = vpop.xlane.xlu0 %2682 }
 0x274   :  { %v2711_v3 = vsub.f32 %v5835_v8, %v6030_v41 }
 0x276   :  { %v2736_v49 = vmul.f32 1.442695, %v2711_v3 }
 0x277   :  { %v6042_v63 = vpop.xlane.xlu0 %2688 }
 0x278   :  { %7520 = vst [vmem:[#allocation17_spill] sm:$0xff] %v6042_v63  ;;  %v2713_v7 = vsub.f32 %v5852_v23, %v6042_v63  ;;  %v6317_v63 = vld [vmem:[%s7112_s6] sm:$0xff] }
 0x27a   :  { %v2740_v43 = vmul.f32 1.442695, %v2713_v7 }
 0x29e   :  { %v1776_v40 = vpop.xlane.xlu1 %1775 }
 0x29f   :  { %v1777_v51 = vrot.slane %v1776_v40, 4 }
 0x2a1   :  { %v1778_v48 = vadd.f32 %v1777_v51, %v1776_v40 }
 0x2a2   :  { %v6018_v19 = vpop.xlane.xlu1 %2658 }
 0x2a3   :  { %v2703_v31 = vsub.f32 %v5936_v45, %v6018_v19  ;;  %v1779_v2 = vrot.slane %v1778_v48, 2 }
 0x2a5   :  { %v2720_v32 = vmul.f32 1.442695, %v2703_v31  ;;  %v1780_v29 = vadd.f32 %v1779_v2, %v1778_v48  ;;  %v6056_v2 = vand.u32 127, %v1945_v28 }
 0x2a6   :  { %v6024_v53 = vpop.xlane.xlu1 %2667 }
 0x2a7   :  { %3425 = vpow2.f32 %v2720_v32  ;;  %v2706_v46 = vsub.f32 %v5943_v27, %v6024_v53  ;;  %v1781_v35 = vrot.slane %v1780_v29, 1  ;;  %vm2847_vm14 = vcmp.eq.s32.totalorder %v6056_v2, %v6012_v26 }
 0x2a8   :  { %vm2846_vm15 = vcmp.eq.s32.totalorder %v6056_v2, %v5982_v17  ;;  %vm2848_vm1 = vcmp.eq.s32.totalorder %v6056_v2, %v6014_v56  ;;  %vm2849_vm2 = vcmp.eq.s32.totalorder %v6056_v2, %v5984_v18  ;;  %vm2850_vm3 = vcmp.eq.s32.totalorder %v6056_v2, %v6016_v37 }
 0x2a9   :  { %v2726_v59 = vmul.f32 1.442695, %v2706_v46  ;;  %v1782_v21 = vadd.f32 %v1781_v35, %v1780_v29  ;;  %v3547_v35 = vld [vmem:[%s7111_s5] sm:$0xff]  ;;  %vm2851_vm4 = vcmp.eq.s32.totalorder %v6056_v2, %v5986_v20 }
 0x2aa   :  { %v6032_v30 = vpop.xlane.xlu1 %2673  ;;  %v2862_v16 = vsel %vm2846_vm15, %v3547_v35, 0.0  ;;  %v3556_v35 = vld [vmem:[%s7113_s7 + $0x70] sm:$0xff] }
 0x2ab   :  { %3427 = vpow2.f32 %v2726_v59  ;;  %v2708_v14 = vsub.f32 %v5950_v34, %v6032_v30  ;;  %3165 = vpush %v1782_v21  ;;  %v2863_v59 = vsel %vm2847_vm14, %v5936_v45, 0.0  ;;  %v6071_v21 = vpop.xlane.xlu0 %2694  ;;  %vm1823_vm13 = vcmp.gt.s32.totalorder %v3556_v35, 0 }
 0x2ac   :  { %3167 = vpush %v3422_v5  ;;  %3429 = vpow2.f32 %v2732_v52  ;;  %7523 = vst [vmem:[#allocation50_spill] sm:$0xff] %v6071_v21  ;;  %v2878_v5 = vsel %vm2653_vm10, %v2862_v16, 0.0  ;;  %v2715_v45 = vsub.f32 %v5866_v60, %v6071_v21  ;;  %v3549_v60 = vld [vmem:[%s7111_s5 + $0x18] sm:$0xff]  ;;  %v7524_v16 = vmov 0  }
 0x2ad   :  { %v2730_v62 = vmul.f32 1.442695, %v2708_v14  ;;  %3169 = vpush %v3424_v25  ;;  %v2881_v14 = vsel %vm2653_vm10, %v2863_v59, 0.0  ;;  %v3548_v25 = vld [vmem:[%s7111_s5 + $0x10] sm:$0xff]  ;;  %vm2853_vm14 = vcmp.eq.s32.totalorder %v6056_v2, %v5988_v54  ;;  %v7532_v21 = vmov 0 }
 0x2ae   :  { %3171 = vpush %v1911_v36  ;;  %v6036_v15 = vpop.xlane.xlu1 %2679  ;;  %v2864_v36 = vsel %vm2848_vm1, %v3548_v25, 0.0 }
 0x2af   :  { %3431 = vpow2.f32 %v2730_v62  ;;  %v2710_v55 = vsub.f32 %v5957_v44, %v6036_v15 }
 0x2b1   :  { %v3426_v61 = vpop.eup %3425  ;;  %v2734_v11 = vmul.f32 1.442695, %v2710_v55 }
 0x2b2   :  { %v2753_v1 = vsel %vm2653_vm10, %v3426_v61, 0.0  ;;  %v6047_v0 = vpop.xlane.xlu1 %2685  ;;  %v2884_v61 = vsel %vm2653_vm10, %v2864_v36, 0.0 }
 0x2b3   :  { %7521 = vst [vmem:[#allocation10_spill] sm:$0xff] %v6047_v0  ;;  %3433 = vpow2.f32 %v2734_v11  ;;  %2754 = vadd.xlane.f32.xlu1 %v2753_v1  ;;  %v2712_v9 = vsub.f32 %v5964_v6, %v6047_v0  ;;  %v2744_v11 = vmul.f32 1.442695, %v2715_v45  ;;  %v7210_v45 = vmov 2   ;;  %v3559_v0 = vld [vmem:[%s7113_s7 + $0x58] sm:$0xff] }
 0x2b4   :  { %3435 = vpow2.f32 %v2736_v49  ;;  %3272 = vset.pattern.permute.xlu0 %v7210_v45  ;;  %v6286_v45 = vld [vmem:[%s7112_s6 + $0x68] sm:$0xff] }
 0x2b5   :  { %v3428_v50 = vpop.eup %3427  ;;  %v2738_v42 = vmul.f32 1.442695, %v2712_v9  ;;  %3437 = vpow2.f32 %v2740_v43  ;;  %v2865_v9 = vsel %vm2849_vm2, %v3549_v60, 0.0  ;;  %v7208_v60 = vmov 1  }
 0x2b6   :  { %v2762_v40 = vsel %vm2653_vm10, %v3428_v50, 0.0  ;;  %v6052_v51 = vpop.xlane.xlu1 %2691  ;;  %v3430_v48 = vpop.eup %3429  ;;  %v2887_v28 = vsel %vm2653_vm10, %v2865_v9, 0.0  ;;  %vm2855_vm2 = vcmp.eq.s32.totalorder %v6056_v2, %v5990_v12 }
 0x2b7   :  { %7522 = vst [vmem:[#allocation52_spill] sm:$0xff] %v6052_v51  ;;  %2763 = vadd.xlane.f32.xlu1 %v2762_v40  ;;  %v2714_v23 = vsub.f32 %v5971_v22, %v6052_v51  ;;  %3439 = vpow2.f32 %v2738_v42  ;;  %v2771_v29 = vsel %vm2653_vm10, %v3430_v48, 0.0  ;;  %v2866_v40 = vsel %vm2850_vm3, %v5943_v27, 0.0  ;;  %v3550_v42 = vld [vmem:[%s7111_s5 + $0x28] sm:$0xff]  ;;  %v3551_v27 = vld [vmem:[%s7113_s7 + $0x30] sm:$0xff] }
 0x2b8   :  { %v2890_v43 = vsel %vm2653_vm10, %v2866_v40, 0.0  ;;  %vm1815_vm9 = vcmp.gt.s32.totalorder %v3551_v27, 0  ;;  %v6172_v40 = vpop.xlane.xlu0 %2700 }
 0x2b9   :  { %v3432_v31 = vpop.eup %3431  ;;  %v2742_v32 = vmul.f32 1.442695, %v2714_v23  ;;  %v2867_v23 = vsel %vm2851_vm4, %v3550_v42, 0.0  ;;  %v2019_v36 = vsel %vm1815_vm9, 1, %v7524_v16  ;;  %7526 = vst [vmem:[#allocation51_spill] sm:$0xff] %v6172_v40 }
 0x2ba   :  { %v2768_v24 = vsel %vm2653_vm10, %v3432_v31, 0.0  ;;  %v2893_v31 = vsel %vm2653_vm10, %v2867_v23, 0.0  ;;  %v6168_v9 = vpop.xlane.xlu1 %2697 }
 0x2bb   :  { %2769 = vadd.xlane.f32.xlu1 %v2768_v24  ;;  %3441 = vpow2.f32 %v2742_v32  ;;  %v3552_v32 = vld [vmem:[%s7113_s7 + $0x40] sm:$0xff]  ;;  %7525 = vst [vmem:[#allocation41_spill] sm:$0xff] %v6168_v9 }
 0x2bc   :  { %3443 = vpow2.f32 %v2744_v11  ;;  %vm1817_vm5 = vcmp.gt.s32.totalorder %v3552_v32, 0  ;;  %v6146_v11 = vld [vmem:[%s7112_s6 + $0x18] sm:$0xff] }
 0x2bd   :  { %v3434_v33 = vpop.eup %3433 }
 0x2be   :  { %v2774_v46 = vsel %vm2653_vm10, %v3434_v33, 0.0  ;;  %v3436_v52 = vpop.eup %3435  ;;  %v3554_v33 = vld [vmem:[%s7113_s7 + $0x60] sm:$0xff] }
 0x2bf   :  { %2772 = vadd.xlane.f32.xlu1 %v2771_v29  ;;  %2775 = vadd.xlane.f32.xlu0 %v2774_v46  ;;  %v3438_v62 = vpop.eup %3437  ;;  %v2777_v55 = vsel %vm2653_vm10, %v3436_v52, 0.0  ;;  %v3553_v29 = vld [vmem:[%s7113_s7 + $0x50] sm:$0xff]  ;;  %v3555_v46 = vld [vmem:[%s7113_s7] sm:$0xff]  ;;  %vm1821_vm12 = vcmp.gt.s32.totalorder %v3554_v33, 0 }
 0x2c0   :  { %v2783_v1 = vsel %vm2653_vm10, %v3438_v62, 0.0  ;;  %vm1809_vm6 = vcmp.gt.s32.totalorder %v3555_v46, 0  ;;  %v3557_v52 = vld [vmem:[%s7113_s7 + $0x10] sm:$0xff]  ;;  %v2021_v62 = vsel %vm1817_vm5, 1, %v7524_v16  ;;  %vm1819_vm11 = vcmp.gt.s32.totalorder %v3553_v29, 0 }
 0x2c1   :  { %v3440_v3 = vpop.eup %3439  ;;  %v2013_v59 = vsel %vm1809_vm6, 1, %v7524_v16  ;;  %vm1811_vm7 = vcmp.gt.s32.totalorder %v3557_v52, 0 }
 0x2c2   :  { %v2780_v7 = vsel %vm2653_vm10, %v3440_v3, 0.0  ;;  %v2025_v3 = vsel %vm1821_vm12, 1, %v7524_v16  ;;  %vm1820_vm12 = vcmp.gt.s32.totalorder %v3559_v0, 0 }
 0x2c3   :  { %2879 = vadd.xlane.f32.xlu1 %v2878_v5  ;;  %2882 = vadd.xlane.f32.xlu0 %v2881_v14  ;;  %v2015_v5 = vsel %vm1811_vm7, 1, %v7524_v16  ;;  %v3558_v14 = vld [vmem:[%s7113_s7 + $0x20] sm:$0xff] }
 0x2c4   :  { %vm1813_vm8 = vcmp.gt.s32.totalorder %v3558_v14, 0 }
 0x2c5   :  { %v3442_v49 = vpop.eup %3441  ;;  %v2017_v25 = vsel %vm1813_vm8, 1, %v7524_v16 }
 0x2c6   :  { %v2786_v50 = vsel %vm2653_vm10, %v3442_v49, 0.0  ;;  %v3444_v48 = vpop.eup %3443  ;;  %v6164_v49 = vld [vmem:[%s7112_s6 + $0x40] sm:$0xff] }
 0x2c7   :  { %2778 = vadd.xlane.f32.xlu1 %v2777_v55  ;;  %2885 = vadd.xlane.f32.xlu0 %v2884_v61  ;;  %v2789_v24 = vsel %vm2653_vm10, %v3444_v48, 0.0  ;;  %v2023_v55 = vsel %vm1819_vm11, 1, %v7524_v16  ;;  %v2027_v61 = vsel %vm1823_vm13, 1, %v7524_v16 }
 0x2cb   :  { %2784 = vadd.xlane.f32.xlu0 %v2783_v1  ;;  %2781 = vadd.xlane.f32.xlu1 %v2780_v7  ;;  %v6152_v1 = vld [vmem:[%s7112_s6 + $0x28] sm:$0xff]  ;;  %v6158_v7 = vld [vmem:[%s7112_s6 + $0x30] sm:$0xff] }
 0x2cf   :  { %2888 = vadd.xlane.f32.xlu1 %v2887_v28  ;;  %2787 = vadd.xlane.f32.xlu0 %v2786_v50  ;;  %v2716_v50 = vsub.f32 %v5978_v13, %v6168_v9  ;;  %v2871_v9 = vsel %vm2855_vm2, %v5835_v8, 0.0  ;;  %v3560_v8 = vld [vmem:[%s7113_s7 + $0x68] sm:$0xff] }
 0x2d0   :  { %v2905_v51 = vsel %vm2653_vm10, %v2871_v9, 0.0  ;;  %vm1822_vm13 = vcmp.gt.s32.totalorder %v3560_v8, 0 }
 0x2d1   :  { %v2746_v28 = vmul.f32 1.442695, %v2716_v50  ;;  %v6226_v50 = vld [vmem:[%s7112_s6 + $0x38] sm:$0xff] }
 0x2d3   :  { %2891 = vadd.xlane.f32.xlu1 %v2890_v43  ;;  %v2717_v43 = vsub.f32 %v5884_v39, %v6172_v40  ;;  %3445 = vpow2.f32 %v2746_v28  ;;  %v2869_v39 = vsel %vm2853_vm14, %v5822_v47, 0.0  ;;  %v6205_v47 = vld [vmem:[%s7112_s6 + $0x8] sm:$0xff] }
 0x2d5   :  { %v2748_v23 = vmul.f32 1.442695, %v2717_v43 }
 0x2d7   :  { %2894 = vadd.xlane.f32.xlu1 %v2893_v31  ;;  %3447 = vpow2.f32 %v2748_v23 }
 0x2db   :  { %2790 = vadd.xlane.f32.xlu1 %v2789_v24 }
 0x2dc   :  { %s3166_s24 = spop %3165 }
 0x2dd   :  { %s3168_s26 = spop %3167  ;;  %v3446_v24 = vpop.eup %3445 }
 0x2de   :  { %s6102_s27 = smul.f32 %s3168_s26, %s3164_s23  ;;  %s3170_s1 = spop %3169  ;;  %v2792_v13 = vsel %vm2653_vm10, %v3446_v24, 0.0 }
 0x2df   :  { %s6104_s28 = smul.f32 %s3170_s1, %s3166_s24  ;;  %s3172_s13 = spop %3171 }
 0x2e0   :  { %2987 = sst [smem:[#allocation2]] %s6102_s27 }
 0x2e1   :  { %s2983_s29 = sadd.f32 %s6104_s28, %s6102_s27 }
 0x2e2   :  { %2989 = sst [smem:[#allocation2 + $0x1]] %s6104_s28 }
 0x2ec   :  { %1968 = vperm.xlu1 %3195, %v3551_v27  }
 0x2f0   :  { %1974 = vperm.xlu1 %3195, %v3552_v32  }
 0x2f4   :  { %1980 = vperm.xlu1 %3195, %v3553_v29   ;;  %v3448_v29 = vpop.eup %3447 }
 0x2f8   :  { %1986 = vperm.xlu1 %3195, %v3554_v33   ;;  %v2899_v33 = vsel %vm2653_vm10, %v2869_v39, 0.0 }
 0x2fc   :  { %1992 = vperm.xlu1 %3195, %v3556_v35   ;;  %v2795_v35 = vsel %vm2653_vm10, %v3448_v29, 0.0 }
 0x300   :  { %2030 = vperm.xlu1 %3195, %v2013_v59  }
 0x304   :  { %2036 = vperm.xlu1 %3195, %v2015_v5  }
 0x308   :  { %2042 = vperm.xlu1 %3195, %v2017_v25  }
 0x30c   :  { %2048 = vperm.xlu1 %3195, %v2019_v36  }
 0x310   :  { %2054 = vperm.xlu1 %3195, %v2021_v62  }
 0x314   :  { %2060 = vperm.xlu1 %3195, %v2023_v55  }
 0x318   :  { %2066 = vperm.xlu1 %3195, %v2025_v3  }
 0x31c   :  { %2072 = vperm.xlu1 %3195, %v2027_v61  }
 0x320   :  { %2397 = vperm.xlu1 %3195, %v6146_v11  }
 0x324   :  { %2405 = vperm.xlu1 %3195, %v6152_v1  }
 0x328   :  { %2409 = vperm.xlu1 %3195, %v6158_v7  }
 0x32c   :  { %2417 = vperm.xlu1 %3195, %v6164_v49  }
 0x330   :  { %3271 = vset.pattern.permute.xlu1 %v7208_v60  ;;  %v6281_v60 = vshra.s32 %v6056_v2, 2 }
 0x340   :  { %v6176_v42 = vpop.xlane.xlu1 %2754 }
 0x341   :  { %3449 = vlog2.f32 %v6176_v42 }
 0x344   :  { %v6178_v48 = vpop.xlane.xlu1 %2763 }
 0x348   :  { %v6180_v31 = vpop.xlane.xlu1 %2769 }
 0x34b   :  { %v3450_v20 = vpop.eup %3449 }
 0x34c   :  { %v6182_v27 = vpop.xlane.xlu1 %2772 }
 0x350   :  { %2793 = vadd.xlane.f32.xlu1 %v2792_v13  ;;  %v6187_v32 = vpop.xlane.xlu1 %2879  ;;  %v7206_v13 = vmov 3  }
 0x354   :  { %2900 = vadd.xlane.f32.xlu1 %v2899_v33  ;;  %v6191_v46 = vpop.xlane.xlu1 %2778  ;;  %v6254_v33 = vld [vmem:[%s7112_s6 + $0x20] sm:$0xff] }
 0x358   :  { %2796 = vadd.xlane.f32.xlu1 %v2795_v35  ;;  %v6194_v59 = vpop.xlane.xlu1 %2781 }
 0x35c   :  { %v6196_v52 = vpop.xlane.xlu1 %2888 }
 0x360   :  { %v6198_v5 = vpop.xlane.xlu1 %2891 }
 0x364   :  { %v6200_v14 = vpop.xlane.xlu1 %2894 }
 0x368   :  { %v6207_v25 = vpop.xlane.xlu1 %2790 }
 0x369   :  { %2309 = vperm.xlu1 %3271, %v6205_v47  }
 0x36c   :  { %v6210_v36 = vpop.permute.xlu1 %1968 }
 0x36d   :  { %7527 = vst [vmem:[#allocation39_spill] sm:$0xff] %v6210_v36  ;;  %vm2852_vm15 = vcmp.eq.s32.totalorder %v6056_v2, %v6210_v36  ;;  %2317 = vperm.xlu1 %3271, %v6146_v11   ;;  %v2026_v36 = vsel %vm1822_vm13, 1, %v7524_v16 }
 0x36e   :  { %v2868_v62 = vsel %vm2852_vm15, %v5950_v34, 0.0 }
 0x36f   :  { %v2896_v55 = vsel %vm2653_vm10, %v2868_v62, 0.0 }
 0x370   :  { %2897 = vadd.xlane.f32.xlu0 %v2896_v55  ;;  %v6217_v3 = vpop.permute.xlu1 %1974  ;;  %v6265_v55 = vld [vmem:[%s7112_s6 + $0x50] sm:$0xff] }
 0x371   :  { %7528 = vst [vmem:[#allocation12_spill] sm:$0xff] %v6217_v3  ;;  %vm2854_vm1 = vcmp.eq.s32.totalorder %v6056_v2, %v6217_v3  ;;  %2329 = vperm.xlu1 %3271, %v6158_v7   ;;  %v3564_v3 = vld [vmem:[%s7113_s7 + $0x28] sm:$0xff] }
 0x372   :  { %v2870_v61 = vsel %vm2854_vm1, %v5957_v44, 0.0  ;;  %v6238_v44 = vld [vmem:[%s7112_s6 + $0x58] sm:$0xff]  ;;  %vm1814_vm9 = vcmp.gt.s32.totalorder %v3564_v3, 0 }
 0x373   :  { %v2902_v28 = vsel %vm2653_vm10, %v2870_v61, 0.0  ;;  %v2018_v54 = vsel %vm1814_vm9, 1, %v7524_v16 }
 0x374   :  { %2903 = vadd.xlane.f32.xlu0 %v2902_v28  ;;  %v6229_v34 = vpop.permute.xlu1 %1980  ;;  %v6273_v28 = vld [vmem:[%s7112_s6 + $0x60] sm:$0xff] }
 0x375   :  { %2333 = vperm.xlu1 %3271, %v6226_v50   ;;  %vm2856_vm15 = vcmp.eq.s32.totalorder %v6056_v2, %v6229_v34 }
 0x378   :  { %v6232_v43 = vpop.permute.xlu1 %1986 }
 0x379   :  { %2337 = vperm.xlu1 %3271, %v6164_v49   ;;  %vm2858_vm2 = vcmp.eq.s32.totalorder %v6056_v2, %v6232_v43 }
 0x37c   :  { %v6240_v23 = vpop.permute.xlu1 %1992 }
 0x37d   :  { %2349 = vperm.xlu1 %3271, %v6238_v44   ;;  %vm2011_vm3 = vcmp.eq.s32.totalorder %v6281_v60, %v6240_v23 }
 0x380   :  { %v6243_v24 = vpop.permute.xlu1 %2030 }
 0x381   :  { %3273 = vset.pattern.permute.xlu1 %v7206_v13 }
 0x384   :  { %v6246_v39 = vpop.permute.xlu1 %2036 }
 0x388   :  { %v6248_v29 = vpop.permute.xlu1 %2042 }
 0x389   :  { %7529 = vst [vmem:[#allocation53_spill] sm:$0xff] %v6248_v29 }
 0x38a   :  { %2151 = vperm.xlu0 %3272, %v6205_v47  }
 0x38c   :  { %v6256_v35 = vpop.permute.xlu1 %2048 }
 0x38d   :  { %7530 = vst [vmem:[#allocation42_spill] sm:$0xff] %v6256_v35 }
 0x38e   :  { %2166 = vperm.xlu0 %3272, %v6254_v33  }
 0x390   :  { %v6259_v62 = vpop.permute.xlu1 %2054 }
 0x391   :  { %7531 = vst [vmem:[#allocation19_spill] sm:$0xff] %v6259_v62 }
 0x392   :  { %2181 = vperm.xlu0 %3272, %v6226_v50  }
 0x394   :  { %v6267_v61 = vpop.permute.xlu1 %2060 }
 0x396   :  { %2196 = vperm.xlu0 %3272, %v6265_v55  }
 0x398   :  { %v6275_v13 = vpop.permute.xlu1 %2066 }
 0x39a   :  { %2206 = vperm.xlu0 %3272, %v6273_v28  }
 0x39c   :  { %v2073_v40 = vpop.permute.xlu1 %2072 }
 0x39d   :  { %vm2091_vm4 = vcmp.eq.s32.totalorder %v2073_v40, 1  ;;  %v3561_v40 = vld [vmem:[%s7113_s7 + $0x8] sm:$0xff] }
 0x39e   :  { %vm6291_vm6 = vmand %vm2011_vm3, %vm2091_vm4  ;;  %2211 = vperm.xlu0 %3272, %v6286_v45   ;;  %vm1810_vm7 = vcmp.gt.s32.totalorder %v3561_v40, 0 }
 0x39f   :  { %v7533_v21 = vsel %vm6291_vm6, 4294967295, %v7532_v21  ;;  %v2014_v9 = vsel %vm1810_vm7, 1, %v7524_v16 }
 0x3a0   :  { %7534 = vst [vmem:[#allocation55_spill] sm:$0xff] %v7533_v21  ;;  %v3563_v21 = vld [vmem:[%s7113_s7 + $0x18] sm:$0xff] }
 0x3a1   :  { %2906 = vadd.xlane.f32.xlu1 %v2905_v51  ;;  %v3562_v51 = vld [vmem:[%s7113_s7 + $0x78] sm:$0xff]  ;;  %vm1812_vm8 = vcmp.gt.s32.totalorder %v3563_v21, 0 }
 0x3a2   :  { %3275 = vset.pattern.permute.xlu0 %v7524_v16  ;;  %v2016_v40 = vsel %vm1812_vm8, 1, %v7524_v16  ;;  %v3565_v21 = vld [vmem:[%s7113_s7 + $0x38] sm:$0xff]  ;;  %vm1824_vm14 = vcmp.gt.s32.totalorder %v3562_v51, 0 }
 0x3a3   :  { %1983 = vperm.xlu0 %3275, %v3559_v0   ;;  %vm1816_vm5 = vcmp.gt.s32.totalorder %v3565_v21, 0  ;;  %v2752_v0 = vpop.xlane.xlu0 %2751 }
 0x3a4   :  { %v2020_v3 = vsel %vm1816_vm5, 1, %v7524_v16  ;;  %3451 = vlog2.f32 %v2752_v0  ;;  %v2872_v0 = vsel %vm2856_vm15, %v5964_v6, 0.0 }
 0x3a5   :  { %v2908_v18 = vsel %vm2653_vm10, %v2872_v0, 0.0 }
 0x3a7   :  { %1989 = vperm.xlu0 %3275, %v3560_v8   ;;  %v6352_v8 = vld [vmem:[%s7112_s6 + $0x10] sm:$0xff] }
 0x3ab   :  { %1995 = vperm.xlu0 %3275, %v3562_v51  }
 0x3af   :  { %2033 = vperm.xlu0 %3275, %v2014_v9   ;;  %v6332_v9 = vld [vmem:[%s7112_s6 + $0x48] sm:$0xff] }
 0x3b2   :  { %2225 = vperm.xlu1 %3273, %v6317_v63  }
 0x3b3   :  { %2039 = vperm.xlu0 %3275, %v2016_v40   ;;  %v3566_v40 = vld [vmem:[%s7113_s7 + $0x48] sm:$0xff] }
 0x3b4   :  { %vm1818_vm11 = vcmp.gt.s32.totalorder %v3566_v40, 0  ;;  %v7535_v40 = vmov 2  }
 0x3b5   :  { %v2022_v21 = vsel %vm1818_vm11, 1, %v7524_v16 }
 0x3b6   :  { %2245 = vperm.xlu1 %3273, %v6152_v1  }
 0x3b7   :  { %2045 = vperm.xlu0 %3275, %v2018_v54   ;;  %v2024_v54 = vsel %vm1820_vm12, 1, %v7524_v16 }
 0x3ba   :  { %2261 = vperm.xlu1 %3273, %v6332_v9  }
 0x3bb   :  { %2051 = vperm.xlu0 %3275, %v2020_v3   ;;  %v2028_v3 = vsel %vm1824_vm14, 1, %v7524_v16 }
 0x3be   :  { %2265 = vperm.xlu1 %3273, %v6265_v55  }
 0x3bf   :  { %2057 = vperm.xlu0 %3275, %v2022_v21   ;;  %v2758_v21 = vpop.xlane.xlu0 %2757 }
 0x3c0   :  { %3453 = vlog2.f32 %v2758_v21  ;;  %v3452_v21 = vpop.eup %3451 }
 0x3c2   :  { %2269 = vperm.xlu1 %3273, %v6238_v44  }
 0x3c3   :  { %2063 = vperm.xlu0 %3275, %v2024_v54   ;;  %v2761_v51 = vpop.xlane.xlu0 %2760  ;;  %v6357_v54 = vpop.permute.xlu1 %2397 }
 0x3c4   :  { %7536 = vst [vmem:[#allocation43_spill] sm:$0xff] %v6357_v54  ;;  %3455 = vlog2.f32 %v2761_v51  ;;  %v2801_v54 = vmul.f32 0.6931472, %v3450_v20 }
 0x3c5   :  { %3457 = vlog2.f32 %v6178_v48  ;;  %v2799_v48 = vmul.f32 0.6931472, %v3452_v21 }
 0x3c6   :  { %2273 = vperm.xlu1 %3273, %v6273_v28  }
 0x3c7   :  { %2069 = vperm.xlu0 %3275, %v2026_v36   ;;  %v2767_v36 = vpop.xlane.xlu0 %2766  ;;  %v6364_v42 = vpop.permute.xlu1 %2405  ;;  %v2830_v37 = vadd.f32 %v2799_v48, %v5992_v4 }
 0x3c8   :  { %3459 = vlog2.f32 %v2767_v36  ;;  %7537 = vst [vmem:[#allocation37_spill] sm:$0xff] %v6364_v42  ;;  %v2831_v42 = vadd.f32 %v2801_v54, %v6018_v19 }
 0x3c9   :  { %3461 = vlog2.f32 %v6180_v31 }
 0x3ca   :  { %3274 = vset.pattern.permute.xlu1 %v7535_v40  ;;  %v3454_v51 = vpop.eup %3453  ;;  %3463 = vlog2.f32 %v6182_v27  ;;  %v2926_v27 = vsub.f32 %v2830_v37, %v6187_v32 }
 0x3cb   :  { %2075 = vperm.xlu0 %3275, %v2028_v3   ;;  %v2776_v3 = vpop.xlane.xlu0 %2775  ;;  %v6371_v36 = vpop.permute.xlu1 %2409  ;;  %v2803_v6 = vmul.f32 0.6931472, %v3454_v51 }
 0x3cc   :  { %7538 = vst [vmem:[#allocation46_spill] sm:$0xff] %v6371_v36  ;;  %3465 = vlog2.f32 %v2776_v3 }
 0x3cd   :  { %v2832_v21 = vadd.f32 %v2803_v6, %v5996_v38  ;;  %3467 = vlog2.f32 %v6191_v46 }
 0x3ce   :  { %v3456_v26 = vpop.eup %3455 }
 0x3cf   :  { %2385 = vperm.xlu0 %3275, %v6317_v63   ;;  %v2883_v62 = vpop.xlane.xlu0 %2882  ;;  %v3458_v35 = vpop.eup %3457  ;;  %v2805_v20 = vmul.f32 0.6931472, %v3456_v26  ;;  %v7540_v26 = vmov 1  }
 0x3d0   :  { %v2927_v31 = vsub.f32 %v2831_v42, %v2883_v62  ;;  %v6379_v36 = vpop.permute.xlu1 %2417 }
 0x3d1   :  { %7539 = vst [vmem:[#allocation47_spill] sm:$0xff] %v6379_v36  ;;  %v2833_v19 = vadd.f32 %v2805_v20, %v6000_v58 }
 0x3d2   :  { %v3460_v0 = vpop.eup %3459  ;;  %v2943_v3 = vsel %vm7233_vm0, %v2927_v31, 0.0 }
 0x3d3   :  { %2389 = vperm.xlu0 %3275, %v6205_v47   ;;  %v2886_v29 = vpop.xlane.xlu0 %2885  ;;  %v2809_v51 = vmul.f32 0.6931472, %v3460_v0  ;;  %v3462_v4 = vpop.eup %3461  ;;  %v2929_v62 = vsub.f32 %v2833_v19, %v6196_v52 }
 0x3d4   :  { %v2928_v56 = vsub.f32 %v2832_v21, %v2886_v29  ;;  %v3464_v38 = vpop.eup %3463 }
 0x3d5   :  { %v2835_v42 = vadd.f32 %v2809_v51, %v6004_v57  ;;  %v2947_v6 = vsel %vm7233_vm0, %v2929_v62, 0.0  ;;  %v2813_v0 = vmul.f32 0.6931472, %v3464_v38 }
 0x3d6   :  { %v2945_v58 = vsel %vm7233_vm0, %v2928_v56, 0.0  ;;  %v3466_v52 = vpop.eup %3465 }
 0x3d7   :  { %2393 = vperm.xlu0 %3275, %v6352_v8   ;;  %v6382_v54 = vpop.xlane.xlu0 %2784  ;;  %v2931_v20 = vsub.f32 %v2835_v42, %v6200_v14  ;;  %v2815_v51 = vmul.f32 0.6931472, %v3466_v52 }
 0x3d8   :  { %3469 = vlog2.f32 %v6382_v54 }
 0x3d9   :  { %v2951_v57 = vsel %vm7233_vm0, %v2931_v20, 0.0  ;;  %3471 = vlog2.f32 %v6194_v59 }
 0x3db   :  { %2401 = vperm.xlu0 %3275, %v6254_v33   ;;  %v6398_v31 = vpop.xlane.xlu0 %2787 }
 0x3dc   :  { %3473 = vlog2.f32 %v6398_v31  ;;  %v7550_v31 = vld [vmem:[#allocation15_spill] sm:$0xff] }
 0x3dd   :  { %v6390_v32 = vpop.xlane.xlu1 %2793  ;;  %3475 = vlog2.f32 %v6207_v25  ;;  %v7551_v25 = vld [vmem:[#allocation6_spill] sm:$0xff] }
 0x3de   :  { %3477 = vlog2.f32 %v6390_v32  ;;  %v7552_v32 = vld [vmem:[#allocation53_spill] sm:$0xff] }
 0x3df   :  { %2413 = vperm.xlu0 %3275, %v6226_v50  }
 0x3e1   :  { %v2901_v21 = vpop.xlane.xlu1 %2900 }
 0x3e3   :  { %2421 = vperm.xlu0 %3275, %v6332_v9  }
 0x3e7   :  { %2425 = vperm.xlu0 %3275, %v6265_v55  }
 0x3ea   :  { %2909 = vadd.xlane.f32.xlu1 %v2908_v18  ;;  %v2807_v18 = vmul.f32 0.6931472, %v3458_v35  ;;  %v2942_v35 = vsel %vm7233_vm0, %v2926_v27, 0.0 }
 0x3eb   :  { %2429 = vperm.xlu0 %3275, %v6238_v44   ;;  %v2944_v48 = vadd.f32 %v2943_v3, %v2942_v35 }
 0x3ec   :  { %v2834_v37 = vadd.f32 %v2807_v18, %v6024_v53  ;;  %v2811_v53 = vmul.f32 0.6931472, %v3462_v4 }
 0x3ed   :  { %v2946_v18 = vadd.f32 %v2945_v58, %v2944_v48 }
 0x3ee   :  { %v2930_v29 = vsub.f32 %v2834_v37, %v6198_v5  ;;  %v2837_v5 = vadd.f32 %v2813_v0, %v6022_v10  ;;  %v2836_v14 = vadd.f32 %v2811_v53, %v6032_v30 }
 0x3ef   :  { %2433 = vperm.xlu0 %3275, %v6273_v28   ;;  %v2948_v56 = vadd.f32 %v2947_v6, %v2946_v18  ;;  %v6414_v6 = vpop.xlane.xlu1 %2796 }
 0x3f0   :  { %v2949_v27 = vsel %vm7233_vm0, %v2930_v29, 0.0  ;;  %v2933_v3 = vsub.f32 %v2837_v5, %v2901_v21  ;;  %3479 = vlog2.f32 %v6414_v6 }
 0x3f1   :  { %v2950_v19 = vadd.f32 %v2949_v27, %v2948_v56 }
 0x3f2   :  { %v2955_v58 = vsel %vm7233_vm0, %v2933_v3, 0.0  ;;  %v6466_v3 = vld [vmem:[%s7112_s6 + $0x78] sm:$0xff] }
 0x3f3   :  { %3276 = vset.pattern.permute.xlu0 %v7540_v26  ;;  %v2952_v62 = vadd.f32 %v2951_v57, %v2950_v19  ;;  %v6421_v20 = vpop.permute.xlu1 %2309  ;;  %v3567_v19 = vld [vmem:[%s7111_s5 + $0x58] sm:$0xff] }
 0x3f4   :  { %2305 = vperm.xlu0 %3276, %v6317_v63  }
 0x3f7   :  { %v6430_v52 = vpop.permute.xlu1 %2317 }
 0x3f8   :  { %2313 = vperm.xlu0 %3276, %v6352_v8  }
 0x3fb   :  { %2146 = vperm.xlu1 %3274, %v6317_v63   ;;  %v2838_v63 = vadd.f32 %v2815_v51, %v6036_v15  ;;  %v6435_v18 = vpop.permute.xlu1 %2329 }
 0x3fc   :  { %2321 = vperm.xlu0 %3276, %v6254_v33  }
 0x3fd   :  { %v2898_v4 = vpop.xlane.xlu0 %2897 }
 0x3fe   :  { %v2932_v35 = vsub.f32 %v2836_v14, %v2898_v4 }
 0x3ff   :  { %2156 = vperm.xlu1 %3274, %v6352_v8   ;;  %v6443_v21 = vpop.permute.xlu1 %2333 }
 0x400   :  { %v2953_v37 = vsel %vm7233_vm0, %v2932_v35, 0.0  ;;  %2325 = vperm.xlu0 %3276, %v6152_v1  }
 0x401   :  { %v2954_v38 = vadd.f32 %v2953_v37, %v2952_v62  ;;  %v2904_v10 = vpop.xlane.xlu0 %2903 }
 0x402   :  { %v2934_v29 = vsub.f32 %v2838_v63, %v2904_v10  ;;  %v2874_v10 = vsel %vm2858_vm2, %v5971_v22, 0.0  ;;  %v6490_v22 = vand.u32 3, %v6056_v2 }
 0x403   :  { %v2956_v30 = vadd.f32 %v2955_v58, %v2954_v38  ;;  %2161 = vperm.xlu1 %3274, %v6146_v11   ;;  %v6446_v57 = vpop.permute.xlu1 %2337 }
 0x404   :  { %v2957_v42 = vsel %vm7233_vm0, %v2934_v29, 0.0  ;;  %2341 = vperm.xlu0 %3276, %v6332_v9   ;;  %vm7234_vm3 = vcmp.eq.s32.totalorder %v6490_v22, 2 }
 0x405   :  { %v2958_v48 = vadd.f32 %v2957_v42, %v2956_v30  ;;  %v2914_v42 = vsel %vm2653_vm10, %v2874_v10, 0.0 }
 0x407   :  { %2171 = vperm.xlu1 %3274, %v6152_v1   ;;  %v7541_v1 = vmov 3   ;;  %v6454_v14 = vpop.permute.xlu1 %2349 }
 0x408   :  { %2345 = vperm.xlu0 %3276, %v6265_v55  }
 0x409   :  { %v6418_v15 = vpop.permute.xlu0 %2151 }
 0x40b   :  { %2176 = vperm.xlu1 %3274, %v6158_v7  }
 0x40c   :  { %2353 = vperm.xlu0 %3276, %v6273_v28   ;;  %v1943_v28 = vld [vmem:[%s7112_s6 + $0x70] sm:$0xff] }
 0x40d   :  { %v6424_v0 = vpop.permute.xlu0 %2166 }
 0x40f   :  { %2186 = vperm.xlu1 %3274, %v6164_v49  }
 0x410   :  { %2357 = vperm.xlu0 %3276, %v6286_v45  }
 0x411   :  { %v6428_v53 = vpop.permute.xlu0 %2181 }
 0x413   :  { %2191 = vperm.xlu1 %3274, %v6332_v9  }
 0x414   :  { %3280 = vset.pattern.permute.xlu0 %v7541_v1 }
 0x415   :  { %v2197_v55 = vpop.permute.xlu0 %2196 }
 0x417   :  { %2201 = vperm.xlu1 %3274, %v6238_v44   ;;  %v3468_v44 = vpop.eup %3467 }
 0x418   :  { %v2817_v46 = vmul.f32 0.6931472, %v3468_v44 }
 0x419   :  { %v2207_v27 = vpop.permute.xlu0 %2206 }
 0x41a   :  { %v2839_v35 = vadd.f32 %v2817_v46, %v6030_v41 }
 0x41b   :  { %2216 = vperm.xlu1 %3274, %v1943_v28  }
 0x41d   :  { %v6441_v56 = vpop.permute.xlu0 %2211 }
 0x41e   :  { %7542 = vst [vmem:[#allocation44_spill] sm:$0xff] %v6441_v56 }
 0x41f   :  { %3277 = vset.pattern.permute.xlu1 %v7541_v1 }
 0x420   :  { %2281 = vperm.xlu1 %3277, %v1943_v28  }
 0x422   :  { %v1984_v9 = vpop.permute.xlu0 %1983 }
 0x423   :  { %vm2857_vm1 = vcmp.eq.s32.totalorder %v6056_v2, %v1984_v9  ;;  %vm2008_vm4 = vcmp.eq.s32.totalorder %v6281_v60, %v1984_v9 }
 0x424   :  { %3278 = vset.pattern.permute.xlu1 %v7524_v16  ;;  %v2873_v4 = vsel %vm2857_vm1, %v3567_v19, 0.0  ;;  %vm2860_vm1 = vcmp.eq.s32.totalorder %v6056_v2, %v6240_v23  ;;  %v3570_v23 = vld [vmem:[%s7111_s5 + $0x78] sm:$0xff] }
 0x425   :  { %2437 = vperm.xlu1 %3278, %v6286_v45   ;;  %v2911_v63 = vsel %vm2653_vm10, %v2873_v4, 0.0 }
 0x426   :  { %v6450_v5 = vpop.permute.xlu0 %1989 }
 0x427   :  { %vm2010_vm9 = vcmp.eq.s32.totalorder %v6281_v60, %v6450_v5  ;;  %vm2859_vm15 = vcmp.eq.s32.totalorder %v6056_v2, %v6450_v5 }
 0x429   :  { %3279 = vset.pattern.permute.xlu1 %v7540_v26 }
 0x42a   :  { %v6456_v51 = vpop.permute.xlu0 %1995  ;;  %2361 = vperm.xlu1 %3279, %v1943_v28  }
 0x42b   :  { %vm2012_vm12 = vcmp.eq.s32.totalorder %v6281_v60, %v6456_v51  ;;  %vm2861_vm2 = vcmp.eq.s32.totalorder %v6056_v2, %v6456_v51 }
 0x42e   :  { %v6469_v62 = vpop.permute.xlu0 %2033  ;;  %3281 = vset.pattern.permute.xlu1 %v7535_v40  ;;  %v2907_v37 = vpop.xlane.xlu1 %2906 }
 0x42f   :  { %v2935_v38 = vsub.f32 %v2839_v35, %v2907_v37  ;;  %2912 = vadd.xlane.f32.xlu0 %v2911_v63  ;;  %2221 = vperm.xlu1 %3281, %v6466_v3  }
 0x431   :  { %v2959_v58 = vsel %vm7233_vm0, %v2935_v38, 0.0 }
 0x432   :  { %v6476_v29 = vadd.f32 %v2959_v58, %v2958_v48  ;;  %v6478_v30 = vpop.permute.xlu0 %2039  ;;  %v6480_v41 = vpop.permute.xlu1 %2225 }
 0x433   :  { %3282 = vset.pattern.permute.xlu1 %v7524_v16  ;;  %2915 = vadd.xlane.f32.xlu0 %v2914_v42  ;;  %v3568_v42 = vld [vmem:[%s7111_s5 + $0x68] sm:$0xff] }
 0x434   :  { %2441 = vperm.xlu1 %3282, %v1943_v28  }
 0x436   :  { %v6484_v40 = vpop.permute.xlu0 %2045  ;;  %v6486_v1 = vpop.permute.xlu1 %2245 }
 0x438   :  { %3283 = vset.pattern.permute.xlu1 %v7540_v26 }
 0x439   :  { %2365 = vperm.xlu1 %3283, %v6466_v3  }
 0x43a   :  { %v6493_v48 = vpop.permute.xlu0 %2051  ;;  %v6495_v44 = vpop.permute.xlu1 %2261 }
 0x43e   :  { %v6498_v46 = vpop.permute.xlu0 %2057  ;;  %v2266_v28 = vpop.permute.xlu1 %2265 }
 0x43f   :  { %v6502_v19 = vsel %vm7234_vm3, %v2197_v55, %v2266_v28  ;;  %v2875_v28 = vsel %vm2859_vm15, %v3568_v42, 0.0 }
 0x442   :  { %v2064_v4 = vpop.permute.xlu0 %2063  ;;  %v6504_v26 = vpop.permute.xlu1 %2269 }
 0x443   :  { %vm2088_vm7 = vcmp.eq.s32.totalorder %v2064_v4, 1 }
 0x444   :  { %vm6507_vm8 = vmand %vm2008_vm4, %vm2088_vm7  ;;  %vm7235_vm4 = vcmp.eq.s32.totalorder %v6490_v22, 1  ;;  %vm7236_vm7 = vcmp.eq.s32.totalorder %v6490_v22, 0 }
 0x446   :  { %v2070_v37 = vpop.permute.xlu0 %2069  ;;  %v2274_v63 = vpop.permute.xlu1 %2273 }
 0x447   :  { %vm2090_vm5 = vcmp.eq.s32.totalorder %v2070_v37, 1  ;;  %v6515_v55 = vsel %vm7234_vm3, %v2207_v27, %v2274_v63 }
 0x448   :  { %vm6517_vm11 = vmand %vm2010_vm9, %vm2090_vm5  ;;  %vm1997_vm9 = vcmp.eq.s32.totalorder %v6281_v60, %v5982_v17  ;;  %v7549_v17 = vmov 0.0  }
 0x449   :  { %2229 = vperm.xlu0 %3280, %v6205_v47  }
 0x44a   :  { %v2076_v9 = vpop.permute.xlu0 %2075 }
 0x44b   :  { %vm2092_vm13 = vcmp.eq.s32.totalorder %v2076_v9, 1 }
 0x44c   :  { %vm6524_vm14 = vmand %vm2012_vm12, %vm2092_vm13  ;;  %vm2087_vm12 = vcmp.eq.s32.totalorder %v6267_v61, 1  ;;  %vm2007_vm13 = vcmp.eq.s32.totalorder %v6281_v60, %v6229_v34  ;;  %v1925_v34 = vld [vmem:[%s7110_s4 + $0x60] sm:$0xff] }
 0x44d   :  { %2233 = vperm.xlu0 %3280, %v6352_v8   ;;  %v2917_v8 = vsel %vm2653_vm10, %v2875_v28, 0.0  ;;  %vm2103_vm15 = vmand %vm2007_vm13, %vm2087_vm12  ;;  %vm1999_vm13 = vcmp.eq.s32.totalorder %v6281_v60, %v7550_v31 }
 0x44e   :  { %v2386_v58 = vpop.permute.xlu0 %2385 }
 0x451   :  { %2237 = vperm.xlu0 %3280, %v6146_v11  }
 0x452   :  { %v6530_v27 = vpop.permute.xlu0 %2389 }
 0x455   :  { %2241 = vperm.xlu0 %3280, %v6254_v33   ;;  %v3569_v33 = vld [vmem:[%s7111_s5 + $0x70] sm:$0xff] }
 0x456   :  { %v6535_v47 = vpop.permute.xlu0 %2393 }
 0x459   :  { %2249 = vperm.xlu0 %3280, %v6158_v7   ;;  %v2876_v7 = vsel %vm2860_vm1, %v3569_v33, 0.0  ;;  %vm2089_vm1 = vcmp.eq.s32.totalorder %v6275_v13, 1 }
 0x45a   :  { %v6543_v11 = vpop.permute.xlu0 %2401  ;;  %v2920_v4 = vsel %vm2653_vm10, %v2876_v7, 0.0 }
 0x45d   :  { %2918 = vadd.xlane.f32.xlu1 %v2917_v8  ;;  %2253 = vperm.xlu0 %3280, %v6226_v50   ;;  %v2877_v50 = vsel %vm2861_vm2, %v3570_v23, 0.0  ;;  %vm2009_vm2 = vcmp.eq.s32.totalorder %v6281_v60, %v6232_v43 }
 0x45e   :  { %v6552_v5 = vpop.permute.xlu0 %2413  ;;  %v2923_v63 = vsel %vm2653_vm10, %v2877_v50, 0.0  ;;  %vm2077_vm10 = vcmp.eq.s32.totalorder %v6243_v24, 1 }
 0x45f   :  { %vm2093_vm5 = vmand %vm1997_vm9, %vm2077_vm10  ;;  %vm2086_vm9 = vcmp.eq.s32.totalorder %v6498_v46, 1 }
 0x460   :  { %v3129_v50 = vsel %vm2093_vm5, 1.0, %v7549_v17  ;;  %vm2105_vm10 = vmand %vm2009_vm2, %vm2089_vm1  ;;  %vm2006_vm5 = vcmp.eq.s32.totalorder %v6281_v60, %v5990_v12  ;;  %v1924_v12 = vld [vmem:[%s7110_s4 + $0x58] sm:$0xff]  ;;  %vm2081_vm1 = vcmp.eq.s32.totalorder %v7552_v32, 1 }
 0x461   :  { %2257 = vperm.xlu0 %3280, %v6164_v49   ;;  %2921 = vadd.xlane.f32.xlu1 %v2920_v4  ;;  %v3141_v43 = vsel %vm2105_vm10, 1.0, %v7549_v17  ;;  %vm2102_vm12 = vmand %vm2006_vm5, %vm2086_vm9 }
 0x462   :  { %v2422_v37 = vpop.permute.xlu0 %2421 }
 0x465   :  { %2277 = vperm.xlu0 %3280, %v6286_v45   ;;  %2924 = vadd.xlane.f32.xlu1 %v2923_v63 }
 0x466   :  { %v2426_v9 = vpop.permute.xlu0 %2425 }
 0x469   :  { %2285 = vperm.xlu0 %3280, %v6466_v3  }
 0x46a   :  { %v6562_v2 = vpop.permute.xlu0 %2429 }
 0x46d   :  { %3284 = vset.pattern.permute.xlu0 %v7524_v16  ;;  %v1913_v16 = vld [vmem:[%s7110_s4] sm:$0xff] }
 0x46e   :  { %v2434_v49 = vpop.permute.xlu0 %2433  ;;  %2445 = vperm.xlu0 %3284, %v6466_v3  }
 0x473   :  { %v2306_v51 = vpop.permute.xlu0 %2305 }
 0x477   :  { %v6566_v42 = vpop.permute.xlu0 %2313  ;;  %v6568_v28 = vpop.xlane.xlu1 %2909 }
 0x47b   :  { %v6572_v45 = vpop.permute.xlu0 %2321  ;;  %v2147_v8 = vpop.permute.xlu1 %2146 }
 0x47c   :  { %v2288_v3 = vsel %vm7234_vm3, %v2147_v8, %v6480_v41  ;;  %v1923_v41 = vld [vmem:[%s7110_s4 + $0x50] sm:$0xff] }
 0x47d   :  { %v2368_v24 = vsel %vm7235_vm4, %v2306_v51, %v2288_v3  ;;  %v3139_v3 = vsel %vm2103_vm15, 1.0, %v7549_v17  ;;  %vm2001_vm15 = vcmp.eq.s32.totalorder %v6281_v60, %v7551_v25 }
 0x47e   :  { %v2448_v33 = vsel %vm7236_vm7, %v2386_v58, %v2368_v24 }
 0x47f   :  { %v2464_v7 = vsub.f32 %v1913_v16, %v2448_v33  ;;  %v6587_v4 = vpop.permute.xlu0 %2325  ;;  %v6589_v23 = vpop.permute.xlu1 %2156 }
 0x481   :  { %v6592_v63 = vmul.f32 %v3129_v50, %v2464_v7 }
 0x483   :  { %v2342_v56 = vpop.permute.xlu0 %2341  ;;  %v6594_v36 = vpop.permute.xlu1 %2161  ;;  %v2496_v25 = vand.u32 2147483647, %v6592_v63  ;;  %v2528_v32 = vmul.f32 0.5, %v6592_v63 }
 0x487   :  { %v2346_v58 = vpop.permute.xlu0 %2345  ;;  %v2172_v51 = vpop.permute.xlu1 %2171 }
 0x488   :  { %v2378_v8 = vsel %vm7235_vm4, %v2346_v58, %v6502_v19  ;;  %v2293_v35 = vsel %vm7234_vm3, %v2172_v51, %v6486_v1  ;;  %v7555_v1 = vld [vmem:[#allocation9_spill] sm:$0xff] }
 0x489   :  { %v2458_v16 = vsel %vm7236_vm7, %v2426_v9, %v2378_v8 }
 0x48a   :  { %v2474_v61 = vsub.f32 %v1923_v41, %v2458_v16 }
 0x48b   :  { %v2354_v24 = vpop.permute.xlu0 %2353  ;;  %v6614_v33 = vpop.permute.xlu1 %2176 }
 0x48c   :  { %v6616_v19 = vmul.f32 %v3139_v3, %v2474_v61  ;;  %v2380_v13 = vsel %vm7235_vm4, %v2354_v24, %v6515_v55  ;;  %v1922_v55 = vld [vmem:[%s7110_s4 + $0x48] sm:$0xff] }
 0x48d   :  { %v2460_v9 = vsel %vm7236_vm7, %v2434_v49, %v2380_v13  ;;  %v3140_v13 = vsel %vm6507_vm8, 1.0, %v7549_v17  ;;  %vm2079_vm8 = vcmp.eq.s32.totalorder %v6246_v39, 1  ;;  %v2373_v39 = vsel %vm7235_vm4, %v6587_v4, %v2293_v35  ;;  %v7563_v4 = vld [vmem:[#allocation13_spill] sm:$0xff] }
 0x48e   :  { %v2476_v7 = vsub.f32 %v1925_v34, %v2460_v9  ;;  %v3138_v34 = vsel %vm2102_vm12, 1.0, %v7549_v17  ;;  %vm6688_vm5 = vmand %vm1999_vm13, %vm2079_vm8  ;;  %vm2078_vm8 = vcmp.eq.s32.totalorder %v6469_v62, 1  ;;  %vm2004_vm13 = vcmp.eq.s32.totalorder %v6281_v60, %v7563_v4  ;;  %v7587_v4 = vld [vmem:[#allocation51_spill] sm:$0xff] }
 0x48f   :  { %v6624_v50 = vpop.permute.xlu1 %2186 }
 0x490   :  { %v6626_v41 = vmul.f32 %v3141_v43, %v2476_v7  ;;  %v7553_v43 = vld [vmem:[#allocation42_spill] sm:$0xff] }
 0x491   :  { %vm2083_vm2 = vcmp.eq.s32.totalorder %v7553_v43, 1 }
 0x493   :  { %v2192_v58 = vpop.permute.xlu1 %2191 }
 0x494   :  { %v2297_v49 = vsel %vm7234_vm3, %v2192_v58, %v6495_v44  ;;  %v7554_v58 = vld [vmem:[#allocation8_spill] sm:$0xff] }
 0x495   :  { %v2377_v8 = vsel %vm7235_vm4, %v2342_v56, %v2297_v49  ;;  %vm1998_vm10 = vcmp.eq.s32.totalorder %v6281_v60, %v7554_v58  ;;  %v7558_v49 = vld [vmem:[#allocation19_spill] sm:$0xff]  ;;  %v2506_v58 = vand.u32 2147483647, %v6616_v19 }
 0x496   :  { %v2457_v16 = vsel %vm7236_vm7, %v2422_v37, %v2377_v8  ;;  %vm2085_vm12 = vcmp.eq.s32.totalorder %v7558_v49, 1  ;;  %v7559_v8 = vld [vmem:[#allocation11_spill] sm:$0xff]  ;;  %v7574_v49 = vld [vmem:[#allocation52_spill] sm:$0xff] }
 0x497   :  { %v2202_v46 = vpop.permute.xlu1 %2201  ;;  %v2473_v61 = vsub.f32 %v1922_v55, %v2457_v16  ;;  %vm2002_vm0 = vcmp.eq.s32.totalorder %v6281_v60, %v7559_v8  ;;  %v6848_v8 = vsel %vm6517_vm11, 1.0, %v7549_v17 }
 0x498   :  { %v2299_v3 = vsel %vm7234_vm3, %v2202_v46, %v6504_v26  ;;  %v3470_v26 = vpop.eup %3469  ;;  %vm6695_vm3 = vmand %vm2001_vm15, %vm2081_vm1  ;;  %vm2082_vm1 = vcmp.eq.s32.totalorder %v6484_v40, 1 }
 0x499   :  { %v2379_v44 = vsel %vm7235_vm4, %v6454_v14, %v2299_v3  ;;  %v6651_v56 = vmul.f32 %v3138_v34, %v2473_v61  ;;  %v6667_v14 = vpop.permute.xlu0 %2357  ;;  %v2821_v6 = vmul.f32 0.6931472, %v3470_v26  ;;  %v7562_v3 = vld [vmem:[#allocation39_spill] sm:$0xff]  ;;  %v6753_v62 = vsel %vm6695_vm3, 1.0, %v7549_v17 }
 0x49a   :  { %v2459_v37 = vsel %vm7236_vm7, %v6562_v2, %v2379_v44  ;;  %v3472_v2 = vpop.eup %3471  ;;  %vm2003_vm4 = vcmp.eq.s32.totalorder %v6281_v60, %v7562_v3 }
 0x49b   :  { %v2475_v24 = vsub.f32 %v1924_v12, %v2459_v37  ;;  %v3474_v54 = vpop.eup %3473  ;;  %v2819_v16 = vmul.f32 0.6931472, %v3472_v2  ;;  %vm6706_vm9 = vmand %vm2003_vm4, %vm2083_vm2  ;;  %v7566_v37 = vld [vmem:[#allocation12_spill] sm:$0xff]  ;;  %v7568_v2 = vld [vmem:[#allocation17_spill] sm:$0xff]  ;;  %vm2080_vm2 = vcmp.eq.s32.totalorder %v6478_v30, 1  ;;  %v6780_v12 = vsel %vm6291_vm6, 1.0, %v7549_v17 }
 0x49c   :  { %v3476_v59 = vpop.eup %3475  ;;  %v2823_v46 = vmul.f32 0.6931472, %v3474_v54  ;;  %vm2005_vm15 = vcmp.eq.s32.totalorder %v6281_v60, %v7566_v37  ;;  %v6720_v35 = vadd.f32 %v2821_v6, %v7568_v2  ;;  %v6770_v55 = vsel %vm6706_vm9, 1.0, %v7549_v17  ;;  %v7583_v2 = vld [vmem:[#allocation41_spill] sm:$0xff] }
 0x49d   :  { %v6659_v9 = vmul.f32 %v3140_v13, %v2475_v24  ;;  %v3478_v51 = vpop.eup %3477  ;;  %v2825_v34 = vmul.f32 0.6931472, %v3476_v59  ;;  %v1918_v24 = vld [vmem:[%s7110_s4 + $0x28] sm:$0xff]  ;;  %v7567_v13 = vld [vmem:[#allocation37_spill] sm:$0xff]  ;;  %vm6726_vm4 = vmand %vm2005_vm15, %vm2085_vm12  ;;  %vm2084_vm12 = vcmp.eq.s32.totalorder %v6493_v48, 1  ;;  %v2544_v30 = vmul.f32 %v2528_v32, %v6592_v63 }
 0x49e   :  { %v3480_v61 = vpop.eup %3479  ;;  %v2453_v26 = vsel %vm7236_vm7, %v7567_v13, %v2373_v39  ;;  %v2827_v31 = vmul.f32 0.6931472, %v3478_v51  ;;  %vm6738_vm7 = vmand %vm1998_vm10, %vm2078_vm8  ;;  %v7573_v39 = vld [vmem:[#allocation10_spill] sm:$0xff]  ;;  %v6745_v3 = vadd.f32 %v2823_v46, %v7574_v49  ;;  %v6775_v40 = vsel %vm6726_vm4, 1.0, %v7549_v17 }
 0x49f   :  { %v2829_v43 = vmul.f32 0.6931472, %v3480_v61  ;;  %v2840_v51 = vadd.f32 %v2819_v16, %v7573_v39  ;;  %v3131_v61 = vsel %vm6688_vm5, 1.0, %v7549_v17  ;;  %vm6760_vm10 = vmand %vm2002_vm0, %vm2082_vm1  ;;  %v2469_v16 = vsub.f32 %v1918_v24, %v2453_v26  ;;  %v7577_v46 = vld [vmem:[#allocation50_spill] sm:$0xff]  ;;  %v6792_v24 = vpop.permute.xlu1 %2216 }
 0x4a0   :  { %v6765_v37 = vadd.f32 %v2825_v34, %v7577_v46  ;;  %vm7579_vm0 = vcmp.eq.s32.totalorder %v6281_v60, %v7555_v1  ;;  %vm2100_vm6 = vmand %vm2004_vm13, %vm2084_vm12  ;;  %v3145_v26 = vadd.f32 -0.5, %v2496_v25  ;;  %v1914_v1 = vld [vmem:[%s7110_s4 + $0x8] sm:$0xff]  ;;  %vm7582_vm9 = vcmp.eq.s32.totalorder %v6490_v22, 2 }
 0x4a1   :  { %vm6787_vm3 = vmand %vm7579_vm0, %vm2080_vm2  ;;  %v2936_v44 = vsub.f32 %v2840_v51, %v6568_v28  ;;  %v6807_v59 = vadd.f32 %v2827_v31, %v7583_v2  ;;  %v3134_v48 = vsel %vm6760_vm10, 1.0, %v7549_v17  ;;  %vm6812_vm5 = vcmp.lt.f32.partialorder %v2496_v25, 1.0 }
 0x4a2   :  { %vm7586_vm8 = vcmp.eq.s32.totalorder %v6490_v22, 1  ;;  %v6820_v32 = vadd.f32 %v2829_v43, %v7587_v4  ;;  %vm2592_vm13 = vcmask 687104   ;;  %v2485_v31 = vmul.f32 %v3134_v48, %v2469_v16 }
 0x4a3   :  { %vm7588_vm15 = vcmp.eq.s32.totalorder %v6490_v22, 0  ;;  %v3132_v39 = vsel %vm6787_vm3, 1.0, %v7549_v17  ;;  %v6832_v51 = vsel %vm2100_vm6, 1.0, %v7549_v17  ;;  %vm7589_vm1 = vcmask 7168   ;;  %vm7591_vm4 = vmmov %vm7586_vm8 }
 0x4a4   :  { %v2576_v6 = vsel %vm6812_vm5, %v2544_v30, %v3145_v26  ;;  %v2538_v16 = vmul.f32 0.5, %v6616_v19  ;;  %v6853_v34 = vsel %vm6524_vm14, 1.0, %v7549_v17  ;;  %vm7592_vm11 = vmmov %vm7588_vm15  ;;  %vm6867_vm14 = vcmp.lt.f32.partialorder %v2506_v58, 1.0 }
 0x4a5   :  { %v2593_v10 = vsel %vm2592_vm13, %v2576_v6, 0.0  ;;  %vm7600_vm0 = vmmov %vm7591_vm4 }
 0x4a6   :  { %vm7602_vm3 = vmmov %vm7592_vm11 }
 0x4a7   :  { %vm7604_vm5 = vmmov %vm7600_vm0 }
 0x4bc   :  { %v6672_v7 = vpop.xlane.xlu0 %2912 }
 0x4c0   :  { %v6722_v54 = vpop.xlane.xlu0 %2915 }
 0x4c8   :  { %v2230_v13 = vpop.permute.xlu0 %2229 }
 0x4c9   :  { %v2289_v28 = vsel %vm7582_vm9, %v6418_v15, %v2230_v13  ;;  %v3130_v15 = vsel %vm6738_vm7, 1.0, %v7549_v17  ;;  %vm7590_vm7 = vmmov %vm7582_vm9 }
 0x4ca   :  { %v2369_v63 = vsel %vm7586_vm8, %v6421_v20, %v2289_v28  ;;  %v2961_v20 = vsel %vm7589_vm1, %v2936_v44, 0.0  ;;  %v6855_v44 = vpop.permute.xlu1 %2281  ;;  %vm7595_vm2 = vmmov %vm7590_vm7 }
 0x4cb   :  { %v2449_v25 = vsel %vm7588_vm15, %v6530_v27, %v2369_v63  ;;  %v1915_v27 = vld [vmem:[%s7110_s4 + $0x10] sm:$0xff]  ;;  %v6861_v26 = vadd.f32 %v2961_v20, %v6476_v29  ;;  %v6874_v29 = vadd.f32 -0.5, %v2506_v58  ;;  %vm7603_vm6 = vmmov %vm7595_vm2 }
 0x4cc   :  { %v2465_v43 = vsub.f32 %v1914_v1, %v2449_v25  ;;  %v2234_v49 = vpop.permute.xlu0 %2233  ;;  %v2533_v1 = vmul.f32 0.5, %v2485_v31  ;;  %vm7605_vm8 = vmmov %vm7602_vm3 }
 0x4cd   :  { %v2290_v46 = vsel %vm7590_vm7, %v6589_v23, %v2234_v49  ;;  %v2501_v23 = vand.u32 2147483647, %v2485_v31  ;;  %vm7606_vm15 = vmmov %vm7595_vm2 }
 0x4ce   :  { %v2481_v13 = vmul.f32 %v3130_v15, %v2465_v43  ;;  %v2370_v30 = vsel %vm7591_vm4, %v6566_v42, %v2290_v46  ;;  %v6872_v42 = vmul.f32 %v2538_v16, %v6616_v19  ;;  %v1916_v19 = vld [vmem:[%s7110_s4 + $0x18] sm:$0xff]  ;;  %v2549_v49 = vmul.f32 %v2533_v1, %v2485_v31  ;;  %vm7611_vm4 = vmmov %vm7600_vm0 }
 0x4cf   :  { %v2450_v38 = vsel %vm7592_vm11, %v6535_v47, %v2370_v30  ;;  %v6879_v47 = vpop.permute.xlu1 %2437  ;;  %vm6888_vm10 = vcmp.lt.f32.partialorder %v2501_v23, 1.0  ;;  %v3150_v6 = vadd.f32 -0.5, %v2501_v23  ;;  %vm7613_vm11 = vmmov %vm7602_vm3 }
 0x4d0   :  { %v2497_v17 = vand.u32 2147483647, %v2481_v13  ;;  %v2529_v28 = vmul.f32 0.5, %v2481_v13  ;;  %v2466_v2 = vsub.f32 %v1915_v27, %v2450_v38  ;;  %v2238_v48 = vpop.permute.xlu0 %2237  ;;  %v2586_v31 = vsel %vm6867_vm14, %v6872_v42, %v6874_v29 }
 0x4d1   :  { %v2291_v63 = vsel %vm7595_vm2, %v6594_v36, %v2238_v48  ;;  %v2540_v48 = vmul.f32 0.5, %v6626_v41 }
 0x4d2   :  { %vm6881_vm12 = vcmp.lt.f32.partialorder %v2497_v17, 1.0  ;;  %v2545_v15 = vmul.f32 %v2529_v28, %v2481_v13  ;;  %v3146_v25 = vadd.f32 -0.5, %v2497_v17  ;;  %v2482_v20 = vmul.f32 %v3131_v61, %v2466_v2  ;;  %v7601_v61 = vld [vmem:[#allocation43_spill] sm:$0xff]  ;;  %v1917_v28 = vld [vmem:[%s7110_s4 + $0x20] sm:$0xff] }
 0x4d3   :  { %v2371_v36 = vsel %vm7600_vm0, %v6430_v52, %v2291_v63  ;;  %v2581_v2 = vsel %vm6888_vm10, %v2549_v49, %v3150_v6  ;;  %vm7614_vm10 = vmmov %vm7600_vm0 }
 0x4d4   :  { %v2577_v58 = vsel %vm6881_vm12, %v2545_v15, %v3146_v25  ;;  %v2498_v16 = vand.u32 2147483647, %v2482_v20  ;;  %v2530_v27 = vmul.f32 0.5, %v2482_v20  ;;  %v2451_v46 = vsel %vm7602_vm3, %v7601_v61, %v2371_v36  ;;  %v2242_v13 = vpop.permute.xlu0 %2241  ;;  %v2362_v15 = vpop.permute.xlu1 %2361  ;;  %vm7615_vm0 = vmmov %vm7595_vm2 }
 0x4d5   :  { %v2594_v30 = vsel %vm2592_vm13, %v2577_v58, 0.0  ;;  %v2467_v23 = vsub.f32 %v1916_v19, %v2451_v46  ;;  %v2292_v52 = vsel %vm7603_vm6, %v6424_v0, %v2242_v13  ;;  %v2505_v0 = vand.u32 2147483647, %v6651_v56  ;;  %v1919_v13 = vld [vmem:[%s7110_s4 + $0x30] sm:$0xff]  ;;  %vm7616_vm6 = vmmov %vm7615_vm0 }
 0x4d6   :  { %v2595_v1 = vadd.f32 %v2594_v30, %v2593_v10  ;;  %vm2514_vm9 = vcmp.lt.f32.partialorder %v2498_v16, 1.0  ;;  %v2546_v38 = vmul.f32 %v2530_v27, %v2482_v20  ;;  %v3147_v17 = vadd.f32 -0.5, %v2498_v16 }
 0x4d7   :  { %v2483_v63 = vmul.f32 %v3132_v39, %v2467_v23  ;;  %v2372_v4 = vsel %vm7604_vm5, %v6572_v45, %v2292_v52  ;;  %v2537_v10 = vmul.f32 0.5, %v6651_v56  ;;  %v2602_v36 = vsel %vm2592_vm13, %v2581_v2, 0.0  ;;  %v7612_v2 = vld [vmem:[#allocation46_spill] sm:$0xff]  ;;  %vm7618_vm5 = vmmov %vm7611_vm4 }
 0x4d8   :  { %v2578_v25 = vsel %vm2514_vm9, %v2546_v38, %v3147_v17  ;;  %v2452_v20 = vsel %vm7605_vm8, %v6543_v11, %v2372_v4  ;;  %v2250_v19 = vpop.permute.xlu0 %2249  ;;  %v2508_v45 = vand.u32 2147483647, %v6626_v41  ;;  %v6937_v30 = vmul.f32 %v2540_v48, %v6626_v41  ;;  %v6946_v52 = vpop.permute.xlu1 %2221  ;;  %vm7617_vm9 = vmmov %vm7611_vm4 }
 0x4d9   :  { %v2596_v43 = vsel %vm2592_vm13, %v2578_v25, 0.0  ;;  %v2499_v49 = vand.u32 2147483647, %v2483_v63  ;;  %v2531_v6 = vmul.f32 0.5, %v2483_v63  ;;  %v2468_v39 = vsub.f32 %v1917_v28, %v2452_v20 }
 0x4da   :  { %v2597_v58 = vadd.f32 %v2596_v43, %v2595_v1  ;;  %v2294_v16 = vsel %vm7606_vm15, %v6614_v33, %v2250_v19  ;;  %vm6939_vm7 = vcmp.lt.f32.partialorder %v2505_v0, 1.0  ;;  %v6944_v33 = vmul.f32 %v2537_v10, %v6651_v56  ;;  %v1920_v19 = vld [vmem:[%s7110_s4 + $0x38] sm:$0xff]  ;;  %vm7622_vm15 = vmmov %vm7602_vm3 }
 0x4db   :  { %vm6928_vm1 = vcmp.lt.f32.partialorder %v2499_v49, 1.0  ;;  %v2547_v11 = vmul.f32 %v2531_v6, %v2483_v63  ;;  %v3148_v61 = vadd.f32 -0.5, %v2499_v49  ;;  %v2484_v46 = vmul.f32 %v6753_v62, %v2468_v39 }
 0x4dc   :  { %v2374_v62 = vsel %vm7611_vm4, %v6435_v18, %v2294_v16  ;;  %v2254_v1 = vpop.permute.xlu0 %2253  ;;  %v6956_v63 = vadd.f32 -0.5, %v2505_v0  ;;  %v2507_v43 = vand.u32 2147483647, %v6659_v9  ;;  %v6967_v0 = vmul.f32 0.5, %v6659_v9  ;;  %vm7625_vm4 = vmmov %vm7602_vm3 }
 0x4dd   :  { %v2579_v38 = vsel %vm6928_vm1, %v2547_v11, %v3148_v61  ;;  %v2500_v17 = vand.u32 2147483647, %v2484_v46  ;;  %v2532_v28 = vmul.f32 0.5, %v2484_v46  ;;  %v2454_v48 = vsel %vm7613_vm11, %v7612_v2, %v2374_v62  ;;  %vm7624_vm1 = vmmov %vm7615_vm0 }
 0x4de   :  { %v2598_v56 = vsel %vm2592_vm13, %v2579_v38, 0.0  ;;  %v2470_v4 = vsub.f32 %v1919_v13, %v2454_v48  ;;  %v2295_v10 = vsel %vm7595_vm2, %v6428_v53, %v2254_v1  ;;  %v2302_v39 = vsel %vm7615_vm0, %v6792_v24, %v6855_v44  ;;  %v7623_v48 = vld [vmem:[#allocation44_spill] sm:$0xff]  ;;  %vm7626_vm11 = vmmov %vm7618_vm5 }
 0x4df   :  { %v2599_v18 = vadd.f32 %v2598_v56, %v2597_v58  ;;  %vm2516_vm12 = vcmp.lt.f32.partialorder %v2500_v17, 1.0  ;;  %v2548_v25 = vmul.f32 %v2532_v28, %v2484_v46  ;;  %v3149_v20 = vadd.f32 -0.5, %v2500_v17  ;;  %v7621_v28 = vld [vmem:[#allocation47_spill] sm:$0xff]  ;;  %vm7630_vm0 = vmmov %vm7602_vm3 }
 0x4e0   :  { %v2486_v49 = vmul.f32 %v6770_v55, %v2470_v4  ;;  %v2375_v6 = vsel %vm7614_vm10, %v6443_v21, %v2295_v10  ;;  %v2258_v53 = vpop.permute.xlu0 %2257  ;;  %v2442_v55 = vpop.permute.xlu1 %2441  ;;  %v2382_v13 = vsel %vm7617_vm9, %v2362_v15, %v2302_v39  ;;  %v2937_v24 = vsub.f32 %v6720_v35, %v6672_v7  ;;  %vm7635_vm9 = vmmov %vm7618_vm5 }
 0x4e1   :  { %v2580_v58 = vsel %vm2516_vm12, %v2548_v25, %v3149_v20  ;;  %v2455_v16 = vsel %vm7602_vm3, %v6552_v5, %v2375_v6  ;;  %v2296_v27 = vsel %vm7616_vm6, %v6624_v50, %v2258_v53  ;;  %v1921_v5 = vld [vmem:[%s7110_s4 + $0x40] sm:$0xff]  ;;  %v2938_v7 = vsub.f32 %v6745_v3, %v6722_v54  ;;  %v1927_v54 = vld [vmem:[%s7110_s4 + $0x70] sm:$0xff]  ;;  %v1926_v25 = vld [vmem:[%s7110_s4 + $0x68] sm:$0xff] }
 0x4e2   :  { %v2600_v11 = vsel %vm2592_vm13, %v2580_v58, 0.0  ;;  %v2502_v61 = vand.u32 2147483647, %v2486_v49  ;;  %v2534_v21 = vmul.f32 0.5, %v2486_v49  ;;  %v2471_v46 = vsub.f32 %v1920_v19, %v2455_v16 }
 0x4e3   :  { %v2601_v44 = vadd.f32 %v2600_v11, %v2599_v18  ;;  %v2376_v50 = vsel %vm7618_vm5, %v6446_v57, %v2296_v27  ;;  %v2462_v3 = vsel %vm7625_vm4, %v2442_v55, %v2382_v13  ;;  %v2585_v19 = vsel %vm6939_vm7, %v6944_v33, %v6956_v63  ;;  %vm7631_vm7 = vmmov %vm7624_vm1 }
 0x4e4   :  { %vm6994_vm8 = vcmp.lt.f32.partialorder %v2502_v61, 1.0  ;;  %v2550_v1 = vmul.f32 %v2534_v21, %v2486_v49  ;;  %v3151_v38 = vadd.f32 -0.5, %v2502_v61  ;;  %v2487_v15 = vmul.f32 %v6832_v51, %v2471_v46  ;;  %v2278_v17 = vpop.permute.xlu0 %2277  ;;  %v2366_v56 = vpop.permute.xlu1 %2365 }
 0x4e5   :  { %v2603_v35 = vadd.f32 %v2602_v36, %v2601_v44  ;;  %v2456_v2 = vsel %vm7622_vm15, %v7621_v28, %v2376_v50  ;;  %v2301_v57 = vsel %vm7624_vm1, %v7623_v48, %v2278_v17  ;;  %vm7027_vm2 = vcmp.lt.f32.partialorder %v2507_v43, 1.0  ;;  %v1928_v44 = vld [vmem:[%s7110_s4 + $0x78] sm:$0xff]  ;;  %vm7639_vm15 = vmmov %vm7630_vm0  ;;  %s3593_s4 = smov 0.0  }
 0x4e6   :  { %v2582_v4 = vsel %vm6994_vm8, %v2550_v1, %v3151_v38  ;;  %v2503_v10 = vand.u32 2147483647, %v2487_v15  ;;  %v2535_v18 = vmul.f32 0.5, %v2487_v15  ;;  %v2472_v51 = vsub.f32 %v1921_v5, %v2456_v2  ;;  %2997 = sst [smem:[#allocation2 + $0x5]] %s3593_s4 }
 0x4e7   :  { %v2604_v36 = vsel %vm2592_vm13, %v2582_v4, 0.0  ;;  %v2381_v20 = vsel %vm7626_vm11, %v6667_v14, %v2301_v57  ;;  %vm7629_vm10 = vcmask 7168   ;;  %vm7041_vm3 = vcmp.lt.f32.partialorder %v2508_v45, 1.0  ;;  %2999 = sst [smem:[#allocation2 + $0x6]] %s3593_s4 }
 0x4e8   :  { %v2605_v6 = vadd.f32 %v2604_v36, %v2603_v35  ;;  %vm2519_vm12 = vcmp.lt.f32.partialorder %v2503_v10, 1.0  ;;  %v2551_v53 = vmul.f32 %v2535_v18, %v2487_v15  ;;  %v3152_v39 = vadd.f32 -0.5, %v2503_v10  ;;  %v2286_v58 = vpop.permute.xlu0 %2285  ;;  %vm7634_vm6 = vmmov %vm7629_vm10  ;;  %3001 = sst [smem:[#allocation2 + $0x7]] %s3593_s4 }
 0x4e9   :  { %v2963_v16 = vsel %vm7629_vm10, %v2937_v24, 0.0  ;;  %v2488_v14 = vmul.f32 %v6775_v40, %v2472_v51  ;;  %v2461_v23 = vsel %vm7630_vm0, %v6879_v47, %v2381_v20  ;;  %v2303_v33 = vsel %vm7631_vm7, %v6946_v52, %v2286_v58  ;;  %vm7638_vm8 = vmmov %vm7634_vm6 }
 0x4ea   :  { %v2478_v27 = vsub.f32 %v1927_v54, %v2462_v3  ;;  %v2965_v55 = vsel %vm7634_vm6, %v2938_v7, 0.0  ;;  %v2583_v11 = vsel %vm2519_vm12, %v2551_v53, %v3152_v39  ;;  %v2477_v61 = vsub.f32 %v1926_v25, %v2461_v23  ;;  %v2919_v40 = vpop.xlane.xlu1 %2918  ;;  %vm7640_vm1 = vmmov %vm7634_vm6 }
 0x4eb   :  { %v2606_v21 = vsel %vm2592_vm13, %v2583_v11, 0.0  ;;  %v2504_v46 = vand.u32 2147483647, %v2488_v14  ;;  %v2536_v47 = vmul.f32 0.5, %v2488_v14  ;;  %v2939_v13 = vsub.f32 %v6765_v37, %v2919_v40  ;;  %vm7641_vm4 = vmmov %vm7640_vm1 }
 0x4ec   :  { %v2964_v52 = vadd.f32 %v2963_v16, %v6861_v26  ;;  %v2493_v24 = vmul.f32 %v6848_v8, %v2477_v61  ;;  %v2383_v5 = vsel %vm7635_vm9, %v2366_v56, %v2303_v33  ;;  %v2607_v50 = vadd.f32 %v2606_v21, %v2605_v6 }
 0x4ed   :  { %vm7055_vm5 = vcmp.lt.f32.partialorder %v2504_v46, 1.0  ;;  %v2552_v1 = vmul.f32 %v2536_v47, %v2488_v14  ;;  %v3153_v38 = vadd.f32 -0.5, %v2504_v46  ;;  %v2967_v37 = vsel %vm7638_vm8, %v2939_v13, 0.0  ;;  %v2446_v15 = vpop.permute.xlu0 %2445 }
 0x4ee   :  { %v2555_v8 = vmul.f32 %v6967_v0, %v6659_v9  ;;  %v2494_v26 = vmul.f32 %v6780_v12, %v2478_v27  ;;  %v2966_v17 = vadd.f32 %v2965_v55, %v2964_v52  ;;  %v2463_v7 = vsel %vm7639_vm15, %v2446_v15, %v2383_v5  ;;  %v2922_v35 = vpop.xlane.xlu1 %2921 }
 0x4ef   :  { %v3156_v28 = vadd.f32 -0.5, %v2507_v43  ;;  %v2584_v2 = vsel %vm7055_vm5, %v2552_v1, %v3153_v38  ;;  %v2479_v48 = vsub.f32 %v1928_v44, %v2463_v7  ;;  %v2940_v57 = vsub.f32 %v6807_v59, %v2922_v35 }
 0x4f0   :  { %v2509_v56 = vand.u32 2147483647, %v2493_v24  ;;  %v2541_v4 = vmul.f32 0.5, %v2493_v24  ;;  %v2968_v10 = vadd.f32 %v2967_v37, %v2966_v17  ;;  %v2608_v0 = vsel %vm2592_vm13, %v2584_v2, 0.0 }
 0x4f1   :  { %v3157_v12 = vadd.f32 -0.5, %v2508_v45  ;;  %v2495_v22 = vmul.f32 %v6853_v34, %v2479_v48  ;;  %v2969_v18 = vsel %vm7640_vm1, %v2940_v57, 0.0  ;;  %v2609_v9 = vadd.f32 %v2608_v0, %v2607_v50 }
 0x4f2   :  { %v2510_v43 = vand.u32 2147483647, %v2494_v26  ;;  %v2542_v51 = vmul.f32 0.5, %v2494_v26  ;;  %v2970_v54 = vadd.f32 %v2969_v18, %v2968_v10  ;;  %v2925_v3 = vpop.xlane.xlu1 %2924  ;;  %v2610_v36 = vsel %vm2592_vm13, %v2585_v19, 0.0 }
 0x4f3   :  { %v2941_v59 = vsub.f32 %v6820_v32, %v2925_v3  ;;  %v2587_v25 = vsel %vm7027_vm2, %v2555_v8, %v3156_v28  ;;  %v2611_v20 = vadd.f32 %v2610_v36, %v2609_v9  ;;  %v2557_v6 = vmul.f32 %v2541_v4, %v2493_v24 }
 0x4f4   :  { %v2511_v41 = vand.u32 2147483647, %v2495_v22  ;;  %v2543_v45 = vmul.f32 0.5, %v2495_v22  ;;  %v3158_v53 = vadd.f32 -0.5, %v2509_v56  ;;  %vm7080_vm11 = vcmp.lt.f32.partialorder %v2509_v56, 1.0 }
 0x4f5   :  { %v2971_v34 = vsel %vm7641_vm4, %v2941_v59, 0.0  ;;  %v2588_v19 = vsel %vm7041_vm3, %v6937_v30, %v3157_v12  ;;  %v2612_v32 = vsel %vm2592_vm13, %v2586_v31, 0.0  ;;  %v2558_v49 = vmul.f32 %v2542_v51, %v2494_v26 }
 0x4f6   :  { %v3159_v58 = vadd.f32 -0.5, %v2510_v43  ;;  %v2972_v16 = vadd.f32 %v2971_v34, %v2970_v54  ;;  %v2613_v14 = vadd.f32 %v2612_v32, %v2611_v20  ;;  %vm2526_vm2 = vcmp.lt.f32.partialorder %v2510_v43, 1.0 }
 0x4f7   :  { %v2614_v23 = vsel %vm2592_vm13, %v2587_v25, 0.0  ;;  %v2559_v33 = vmul.f32 %v2543_v45, %v2495_v22  ;;  %v3160_v27 = vadd.f32 -0.5, %v2511_v41  ;;  %v2589_v30 = vsel %vm7080_vm11, %v2557_v6, %v3158_v53 }
 0x4f8   :  { %2973 = vadd.xlane.f32.xlu1 %v2972_v16  ;;  %v2615_v63 = vadd.f32 %v2614_v23, %v2613_v14  ;;  %vm2527_vm12 = vcmp.lt.f32.partialorder %v2511_v41, 1.0  ;;  %v2616_v60 = vsel %vm2592_vm13, %v2588_v19, 0.0  ;;  %v2590_v42 = vsel %vm2526_vm2, %v2558_v49, %v3159_v58 }
 0x4f9   :  { %v2618_v31 = vsel %vm2592_vm13, %v2589_v30, 0.0  ;;  %v2591_v55 = vsel %vm2527_vm12, %v2559_v33, %v3160_v27  ;;  %v2620_v61 = vsel %vm2592_vm13, %v2590_v42, 0.0  ;;  %v2633_v24 = vstv %s3172_s13 }
 0x4fa   :  { %v2617_v29 = vadd.f32 %v2616_v60, %v2615_v63  ;;  %v2622_v21 = vsel %vm2592_vm13, %v2591_v55, 0.0  ;;  %3481 = vrcp.f32 %v2633_v24 }
 0x4fc   :  { %v2619_v11 = vadd.f32 %v2618_v31, %v2617_v29 }
 0x4fe   :  { %v2621_v40 = vadd.f32 %v2620_v61, %v2619_v11 }
 0x500   :  { %v2623_v46 = vadd.f32 %v2622_v21, %v2621_v40 }
 0x502   :  { %2624 = vadd.xlane.f32.xlu0 %v2623_v46 }
 0x504   :  { %v3482_v17 = vpop.eup %3481 }
 0x585   :  { %v2974_v47 = vpop.xlane.xlu1 %2973 }
 0x586   :  { %v2975_v13 = vrot.slane %v2974_v47, 4 }
 0x588   :  { %v2976_v52 = vadd.f32 %v2975_v13, %v2974_v47 }
 0x58a   :  { %v2977_v5 = vrot.slane %v2976_v52, 2 }
 0x58c   :  { %v2978_v1 = vadd.f32 %v2977_v5, %v2976_v52 }
 0x58e   :  { %v2979_v8 = vrot.slane %v2978_v1, 1 }
 0x58f   :  { %v2625_v44 = vpop.xlane.xlu0 %2624 }
 0x590   :  { %v2626_v50 = vrot.slane %v2625_v44, 4  ;;  %v2980_v7 = vadd.f32 %v2979_v8, %v2978_v1 }
 0x592   :  { %v2627_v62 = vadd.f32 %v2626_v50, %v2625_v44 }
 0x594   :  { %v2628_v38 = vrot.slane %v2627_v62, 2 }
 0x596   :  { %v2629_v37 = vadd.f32 %v2628_v38, %v2627_v62 }
 0x598   :  { %v2630_v15 = vrot.slane %v2629_v37, 1 }
 0x59a   :  { %v2631_v26 = vadd.f32 %v2630_v15, %v2629_v37 }
 0x59c   :  { %3173 = vpush %v2631_v26 }
 0x59d   :  { %3175 = vpush %v3482_v17 }
 0x59e   :  { %3177 = vpush %v2980_v7 }
 0x5cd   :  { %s3174_s14 = spop %3173 }
 0x5ce   :  { %s3176_s15 = spop %3175 }
 0x5cf   :  { %s2636_s7 = smul.f32 %s3176_s15, %s3174_s14  ;;  %s3178_s16 = spop %3177 }
 0x5d0   :  { %s2982_s17 = smul.f32 0.0078125, %s3178_s16 }
 0x5d1   :  { %s2984_s18 = sadd.f32 %s2983_s29, %s2636_s7 }
 0x5d2   :  { %2991 = sst [smem:[#allocation2 + $0x2]] %s2636_s7 }
 0x5d3   :  { %s2985_s19 = sadd.f32 %s2984_s18, %s2982_s17 }
 0x5d4   :  { %2993 = sst [smem:[#allocation2 + $0x3]] %s2982_s17 }
 0x5d5   :  { %2995 = sst [smem:[#allocation2 + $0x4]] %s2985_s19 }
 0x5d6   :  { %3582 = shalt.err (!%p3579_p4)
}
 0x5d7   :  { %s3594_s21 = smov [#allocation2]  }
 0x5d8   :  { %3011 = dma.smem_to_vmem %s3594_s21, 16, %s3009_s2, [#allocation3]  }
 0x5d9   :  { %3583 = dma.done.wait [#allocation3], 16  }
 0x5da   :  { %3584 = vsyncadd [#allocation3], 4294967280 }
 0x5db   :  { %3015 = sfence }
 0x5dc   :  { %3016 = vsyncpa [#allocation3], 1 }

</bundles_post_ra>
